<compile_context>
chip_gen: v5e
topology: v5e:2x2
jax: 0.10.0
libtpu: 0.0.40
codegen_flags: <defaults>
</compile_context>

<pallas_src>
import math

import jax
import jax.numpy as jnp
from jax import lax
from jax.experimental import pallas as pl
from jax.experimental.pallas import tpu as pltpu

EPS = 1e-5  # nn.InstanceNorm2d default (affine=False, no running stats)


def _pad8(x):
    return ((x + 7) // 8) * 8


# ------------------------------ fused kernel ------------------------------

def _make_kernel(plan, H, W):
    HW = H * W
    WPAD = 128                      # lane-tile-aligned zero padding for the shifted slices
    c3 = _pad8(4 * plan["k"])       # bottleneck hidden width (= 16 for k=4)
    fun_cfg = plan["fun"]

    def inst_norm_relu(v):          # v: (C, HW) f32; per-channel IN over HW, then ReLU
        m = jnp.mean(v, axis=1, keepdims=True)
        xc = v - m
        var = jnp.mean(xc * xc, axis=1, keepdims=True)   # biased variance (PyTorch)
        return jnp.maximum(xc * lax.rsqrt(var + EPS), 0.0)

    def kernel(patch_ref, wc1_ref, w1x1_ref, w3x3_ref, o_ref):
        # Horizontal-boundary masks for the 3x3 taps (built once, hoisted out of all loops).
        col = lax.broadcasted_iota(jnp.int32, (1, HW), 1) % W
        mask_l = jnp.broadcast_to((col != 0).astype(jnp.float32), (c3, HW))      # dj = -1
        mask_r = jnp.broadcast_to((col != W - 1).astype(jnp.float32), (c3, HW))  # dj = +1
        zpad = jnp.zeros((c3, WPAD), jnp.float32)

        def conv1x1(x, slab, rout, kpad):
            # x: (kpad, HW) sublane-aligned concat of padded chunks; weight columns were
            # placed at the matching padded offsets at init -> one matmul, exact.
            w = w1x1_ref[slab][:rout, :kpad]
            return jnp.dot(w, x, preferred_element_type=jnp.float32)

        def conv3x3(h, slab):
            # h: (c3, HW).  3x3 conv (pad=1) = single (pad8(k), 9*c3) @ (9*c3, HW) matmul
            # against an on-chip im2col built from 9 lane-shifted copies.  Vertical
            # out-of-bounds taps read the zero lane-padding; horizontal wrap is masked.
            hp = jnp.concatenate([zpad, h, zpad], axis=1)          # (c3, HW + 2*WPAD)
            rows = []
            for di in (-1, 0, 1):
                for dj in (-1, 0, 1):
                    s = WPAD + di * W + dj
                    sh = hp[:, s:s + HW]
                    if dj == -1:
                        sh = sh * mask_l
                    elif dj == 1:
                        sh = sh * mask_r
                    rows.append(sh)
            im2col = jnp.concatenate(rows, axis=0)                 # (9*c3, HW)
            return jnp.dot(w3x3_ref[slab], im2col,
                           preferred_element_type=jnp.float32)     # (pad8(k), HW)

        # conv1 (7x7, pad 3, no bias): one matmul over the wrapper-hoisted im2col patches.
        chunk0 = jnp.dot(wc1_ref[...], patch_ref[0],
                         preferred_element_type=jnp.float32)       # (pad8(2k), HW)

        for st in plan["stages"]:
            # IN+ReLU is cached once per chunk (exact: IN is per-channel over HW).
            nchunks = [inst_norm_relu(chunk0)]
            for bn in st["bottlenecks"]:
                ncat = nchunks[0] if len(nchunks) == 1 else jnp.concatenate(nchunks, axis=0)
                assert ncat.shape[0] == bn["kpad"]
                h = inst_norm_relu(conv1x1(ncat, bn["w1_slab"], c3, bn["kpad"]))
                newc = conv3x3(h, bn["w3_slab"])                   # (8, HW), rows k..7 zero
                nchunks.append(inst_norm_relu(newc))
            ncat = jnp.concatenate(nchunks, axis=0)
            tr = st["trans"]
            assert ncat.shape[0] == tr["kpad"]
            chunk0 = conv1x1(ncat, tr["slab"], tr["rout"], tr["kpad"])   # raw transition out

        # fun: 1x1 conv (bias dropped -- exact no-op under the following InstanceNorm),
        # then InstanceNorm + ReLU.  Zero-padded rows stay zero through IN/ReLU.
        y = conv1x1(chunk0, fun_cfg["slab"], fun_cfg["rout"], fun_cfg["kpad"])
        o_ref[0] = inst_norm_relu(y)

    return kernel


# ------------------------------ forward wrapper ------------------------------

def generator_forward(params, x_nchw):
    plan = params["plan"]
    n, cin, h, w = x_nchw.shape
    hw = h * w
    assert hw % 128 == 0, "H*W must be lane-tile aligned for this kernel"
    kpad1 = params["w_conv1"].shape[1]

    # XLA-side im2col for the 7x7 stem conv: (N, 49*Cin padded to 152, HW).  ~150 KB/sample
    # of extra HBM traffic, trivially hidden by the input pipeline; removes 49 tiny matmuls
    # and all padded-slice relayouts from the kernel.
    xp = jnp.pad(x_nchw, ((0, 0), (0, 0), (3, 3), (3, 3)))
    taps = [xp[:, :, a:a + h, b:b + w] for a in range(7) for b in range(7)]
    patches = jnp.stack(taps, axis=1).reshape(n, 49 * cin, hw)
    patches = jnp.pad(patches, ((0, 0), (0, kpad1 - 49 * cin), (0, 0)))

    kernel = _make_kernel(plan, h, w)
    rout = plan["fun"]["rout"]

    out = pl.pallas_call(
        kernel,
        out_shape=jax.ShapeDtypeStruct((n, rout, hw), jnp.float32),
        grid=(n,),
        in_specs=[
            pl.BlockSpec((1, kpad1, hw), lambda i: (i, 0, 0)),
            pl.BlockSpec(params["w_conv1"].shape, lambda i: (0, 0)),
            pl.BlockSpec(params["w_1x1"].shape, lambda i: (0, 0, 0)),
            pl.BlockSpec(params["w_3x3"].shape, lambda i: (0, 0, 0)),
        ],
        out_specs=pl.BlockSpec((1, rout, hw), lambda i: (i, 0, 0)),
        compiler_params=pltpu.CompilerParams(
            dimension_semantics=("parallel",),   # one sample per TensorCore on v7x megacore
        ),
    )(patches, params["w_conv1"], params["w_1x1"], params["w_3x3"])

    # Lane-dense (N, C, HW) output -> NCHW is a pure reshape (no transpose).
    return out[:, :3, :].reshape(n, 3, h, w)


# ------------------------------ parameter init ------------------------------

def init_params(key, k=4, depth=16, reduction=0.75):
    n_dense = (depth - 4) // 3 // 2
    keys = iter(jax.random.split(key, 64))

    def conv_w(cout, cin, kh, kw):
        nfan = kh * kw * cout                       # PyTorch module init: N(0, sqrt(2/n))
        return jax.random.normal(next(keys), (cout, cin, kh, kw),
                                 jnp.float32) * math.sqrt(2.0 / nfan)

    # ---- conv1 (7x7, pad 3): im2col-major (Cout, 49*Cin), K padded to a multiple of 8.
    c1_out = 2 * k
    w1c = conv_w(c1_out, 3, 7, 7)
    k1, k1p = 49 * 3, _pad8(49 * 3)
    w_conv1 = jnp.zeros((_pad8(c1_out), k1p), jnp.float32)
    w_conv1 = w_conv1.at[:c1_out, :k1].set(
        jnp.transpose(w1c, (0, 2, 3, 1)).reshape(c1_out, k1))

    # ---- dense blocks / transitions ----
    one_by_one = []     # (real weight (cout, cin), consumed chunk layout [(real, pad), ...])
    threes = []         # raw (k, 4k, 3, 3) weights
    plan_stages = []
    n_ch = c1_out
    chunk_layout = [(c1_out, _pad8(c1_out))]
    for _ in range(3):
        bneck = []
        for _ in range(n_dense):
            w1 = conv_w(4 * k, n_ch, 1, 1).reshape(4 * k, n_ch)
            one_by_one.append((w1, list(chunk_layout)))
            bneck.append({"w1_slab": len(one_by_one) - 1,
                          "kpad": sum(p for _, p in chunk_layout),
                          "w3_slab": len(threes)})
            threes.append(conv_w(k, 4 * k, 3, 3))
            chunk_layout.append((k, _pad8(k)))
            n_ch += k
        n_out = int(math.floor(n_ch * reduction))
        wt = conv_w(n_out, n_ch, 1, 1).reshape(n_out, n_ch)
        one_by_one.append((wt, list(chunk_layout)))
        plan_stages.append({"bottlenecks": bneck,
                            "trans": {"slab": len(one_by_one) - 1,
                                      "rout": _pad8(n_out),
                                      "kpad": sum(p for _, p in chunk_layout)}})
        n_ch = n_out
        chunk_layout = [(n_out, _pad8(n_out))]

    assert n_ch == 17, "self.fun = nn.Conv2d(17, 3, 1) requires trans3 to emit 17 channels"
    # fun: 1x1 conv 17->3.  Its bias is dropped: InstanceNorm(affine=False) follows
    # immediately and IN(x + b) == IN(x), so the omission is numerically exact.
    wf = conv_w(3, 17, 1, 1).reshape(3, 17)
    one_by_one.append((wf, [(17, _pad8(17))]))
    fun = {"slab": len(one_by_one) - 1, "rout": _pad8(3), "kpad": _pad8(17)}

    # ---- pack the 1x1-family weights (bottleneck w1, transitions, fun) into one array,
    #      scattering real columns to the padded chunk offsets used in-kernel.
    rmax = _pad8(max(wr.shape[0] for wr, _ in one_by_one))
    cmax = _pad8(max(sum(p for _, p in lay) for _, lay in one_by_one))
    slabs = []
    for w_real, lay in one_by_one:
        slab = jnp.zeros((rmax, cmax), jnp.float32)
        src = dst = 0
        for real, padw in lay:
            slab = slab.at[:w_real.shape[0], dst:dst + real].set(w_real[:, src:src + real])
            src += real
            dst += padw
        slabs.append(slab)
    w_1x1 = jnp.stack(slabs, axis=0)

    # ---- pack the 3x3 weights: (k, 4k, 3, 3) -> (pad8(k), 9*pad8(4k)), tap-major columns.
    cin_p = _pad8(4 * k)
    w3_list = []
    for w3 in threes:
        co = w3.shape[0]
        wt = jnp.transpose(w3, (0, 2, 3, 1))                      # (co, 3, 3, 4k)
        mat = jnp.zeros((_pad8(co), 9 * cin_p), jnp.float32)
        for t in range(9):
            a, b = divmod(t, 3)
            mat = mat.at[:co, t * cin_p:t * cin_p + 4 * k].set(wt[:, a, b, :])
        w3_list.append(mat)
    w_3x3 = jnp.stack(w3_list, axis=0)

    plan = {"k": k, "n_dense": n_dense, "stages": plan_stages, "fun": fun}
    return {"w_conv1": w_conv1, "w_1x1": w_1x1, "w_3x3": w_3x3, "plan": plan}


# ---------------------------------- main ----------------------------------

if __name__ == "__main__":
    key = jax.random.PRNGKey(0)
    pkey, xkey = jax.random.split(key)
    params = init_params(pkey, k=4, depth=16, reduction=0.75)  # -> trans3 output = 17 ch

    x = jax.random.normal(xkey, (2, 3, 16, 16), jnp.float32)   # NCHW, like PyTorch

    fwd = jax.jit(lambda inp: generator_forward(params, inp))
    y = fwd(x)
    jax.block_until_ready(y)
    assert y.shape == (2, 3, 16, 16) and y.dtype == jnp.float32
    assert bool(jnp.all(jnp.isfinite(y)))
    print("KERNEL_OK")
</pallas_src>

<mosaic_0001>
module attributes {stable_mosaic.version = 11 : i64} {
  func.func @kernel(%arg0: i32, %arg1: memref<1x152x256xf32, #tpu.memory_space<vmem>>, %arg2: memref<8x152xf32, #tpu.memory_space<vmem>>, %arg3: memref<10x24x32xf32, #tpu.memory_space<vmem>>, %arg4: memref<6x8x144xf32, #tpu.memory_space<vmem>>, %arg5: memref<1x8x256xf32, #tpu.memory_space<vmem>>) attributes {dimension_semantics = [#tpu.dimension_semantics<parallel>], iteration_bounds = array<i64: 2>, scalar_prefetch = 0 : i64, scratch_operands = 0 : i64, tpu.core_type = #tpu.core_type<tc>, window_params = [{transform_indices = @transform_0, window_bounds = array<i64: 1, 152, 256>}, {pipeline_mode = #tpu.pipeline_mode<synchronous>, transform_indices = @transform_1, window_bounds = array<i64: 8, 152>}, {pipeline_mode = #tpu.pipeline_mode<synchronous>, transform_indices = @transform_2, window_bounds = array<i64: 10, 24, 32>}, {pipeline_mode = #tpu.pipeline_mode<synchronous>, transform_indices = @transform_3, window_bounds = array<i64: 6, 8, 144>}, {transform_indices = @transform_4, window_bounds = array<i64: 1, 8, 256>}]} {
    %0 = tpu.iota {dimensions = array<i32: 1>} : vector<1x256xi32>
    %c16_i32 = arith.constant 16 : i32
    %c0_i32 = arith.constant 0 : i32
    %1 = arith.cmpi eq, %c16_i32, %c0_i32 : i32
    %c1_i32 = arith.constant 1 : i32
    %2 = arith.select %1, %c1_i32, %c16_i32 : i32
    %3 = vector.broadcast %2 : i32 to vector<1x256xi32>
    %4 = arith.remsi %0, %3 : vector<1x256xi32>
    %c0_i32_0 = arith.constant 0 : i32
    %5 = vector.broadcast %c0_i32_0 : i32 to vector<1x256xi32>
    %6 = arith.cmpi ne, %4, %5 : vector<1x256xi32>
    %c0_i32_1 = arith.constant 0 : i32
    %7 = vector.broadcast %c0_i32_1 : i32 to vector<1x256xi32>
    %8 = arith.cmpi slt, %4, %7 : vector<1x256xi32>
    %c0_i32_2 = arith.constant 0 : i32
    %9 = arith.cmpi slt, %2, %c0_i32_2 : i32
    %10 = vector.broadcast %9 : i1 to vector<1x256xi1>
    %11 = vector.broadcast %10 : vector<1x256xi1> to vector<1x256xi1>
    %12 = arith.xori %8, %11 : vector<1x256xi1>
    %13 = arith.andi %12, %6 : vector<1x256xi1>
    %14 = vector.broadcast %2 : i32 to vector<1x256xi32>
    %15 = arith.addi %4, %14 : vector<1x256xi32>
    %16 = arith.select %13, %15, %4 : vector<1x256xi1>, vector<1x256xi32>
    %c0_i32_3 = arith.constant 0 : i32
    %17 = vector.broadcast %c0_i32_3 : i32 to vector<1x256xi32>
    %18 = arith.cmpi ne, %16, %17 : vector<1x256xi32>
    %19 = arith.extui %18 : vector<1x256xi1> to vector<1x256xi32>
    %20 = arith.sitofp %19 : vector<1x256xi32> to vector<1x256xf32>
    %21 = vector.shape_cast %20 : vector<1x256xf32> to vector<1x256xf32>
    %22 = vector.broadcast %21 : vector<1x256xf32> to vector<16x256xf32>
    %c15_i32 = arith.constant 15 : i32
    %23 = vector.broadcast %c15_i32 : i32 to vector<1x256xi32>
    %24 = arith.cmpi ne, %16, %23 : vector<1x256xi32>
    %25 = arith.extui %24 : vector<1x256xi1> to vector<1x256xi32>
    %26 = arith.sitofp %25 : vector<1x256xi32> to vector<1x256xf32>
    %27 = vector.shape_cast %26 : vector<1x256xf32> to vector<1x256xf32>
    %28 = vector.broadcast %27 : vector<1x256xf32> to vector<16x256xf32>
    %cst = arith.constant 0.000000e+00 : f32
    %29 = vector.broadcast %cst : f32 to vector<16x128xf32>
    %c0 = arith.constant 0 : index
    %c0_4 = arith.constant 0 : index
    %30 = vector.load %arg2[%c0, %c0_4] : memref<8x152xf32, #tpu.memory_space<vmem>>, vector<8x152xf32>
    %c0_5 = arith.constant 0 : index
    %c0_6 = arith.constant 0 : index
    %c0_7 = arith.constant 0 : index
    %31 = vector.load %arg1[%c0_5, %c0_6, %c0_7] : memref<1x152x256xf32, #tpu.memory_space<vmem>>, vector<1x152x256xf32>
    %32 = vector.shape_cast %31 : vector<1x152x256xf32> to vector<152x256xf32>
    %cst_8 = arith.constant dense<0.000000e+00> : vector<8x256xf32>
    %33 = tpu.matmul %30, %32, %cst_8 {dimension_numbers = #tpu.dot_dimension_numbers<[1], [0], [0], [1], [0, 0, 1, 1], [], []>} : vector<8x152xf32>, vector<152x256xf32>, vector<8x256xf32> -> vector<8x256xf32>
    %cst_9 = arith.constant dense<0.000000e+00> : vector<8xf32>
    %34 = vector.multi_reduction <add>, %33, %cst_9 [1] : vector<8x256xf32> to vector<8xf32>
    %35 = vector.shape_cast %34 : vector<8xf32> to vector<8x1xf32>
    %cst_10 = arith.constant 2.560000e+02 : f32
    %36 = vector.broadcast %cst_10 : f32 to vector<8x1xf32>
    %37 = arith.divf %35, %36 : vector<8x1xf32>
    %38 = vector.broadcast %37 : vector<8x1xf32> to vector<8x256xf32>
    %39 = arith.subf %33, %38 : vector<8x256xf32>
    %40 = arith.mulf %39, %39 : vector<8x256xf32>
    %cst_11 = arith.constant dense<0.000000e+00> : vector<8xf32>
    %41 = vector.multi_reduction <add>, %40, %cst_11 [1] : vector<8x256xf32> to vector<8xf32>
    %42 = vector.shape_cast %41 : vector<8xf32> to vector<8x1xf32>
    %cst_12 = arith.constant 2.560000e+02 : f32
    %43 = vector.broadcast %cst_12 : f32 to vector<8x1xf32>
    %44 = arith.divf %42, %43 : vector<8x1xf32>
    %cst_13 = arith.constant 9.99999974E-6 : f32
    %45 = vector.broadcast %cst_13 : f32 to vector<8x1xf32>
    %46 = arith.addf %44, %45 : vector<8x1xf32>
    %47 = math.rsqrt %46 : vector<8x1xf32>
    %48 = vector.broadcast %47 : vector<8x1xf32> to vector<8x256xf32>
    %49 = arith.mulf %39, %48 : vector<8x256xf32>
    %cst_14 = arith.constant 0.000000e+00 : f32
    %50 = vector.broadcast %cst_14 : f32 to vector<8x256xf32>
    %51 = arith.maximumf %49, %50 : vector<8x256xf32>
    %c0_15 = arith.constant 0 : index
    %c0_16 = arith.constant 0 : index
    %c0_17 = arith.constant 0 : index
    %52 = vector.load %arg3[%c0_15, %c0_16, %c0_17] : memref<10x24x32xf32, #tpu.memory_space<vmem>>, vector<1x24x32xf32>
    %53 = vector.shape_cast %52 : vector<1x24x32xf32> to vector<24x32xf32>
    %54 = vector.extract_strided_slice %53 {offsets = [0, 0], sizes = [16, 8], strides = [1, 1]} : vector<24x32xf32> to vector<16x8xf32>
    %cst_18 = arith.constant dense<0.000000e+00> : vector<16x256xf32>
    %55 = tpu.matmul %54, %51, %cst_18 {dimension_numbers = #tpu.dot_dimension_numbers<[1], [0], [0], [1], [0, 0, 1, 1], [], []>} : vector<16x8xf32>, vector<8x256xf32>, vector<16x256xf32> -> vector<16x256xf32>
    %cst_19 = arith.constant dense<0.000000e+00> : vector<16xf32>
    %56 = vector.multi_reduction <add>, %55, %cst_19 [1] : vector<16x256xf32> to vector<16xf32>
    %57 = vector.shape_cast %56 : vector<16xf32> to vector<16x1xf32>
    %cst_20 = arith.constant 2.560000e+02 : f32
    %58 = vector.broadcast %cst_20 : f32 to vector<16x1xf32>
    %59 = arith.divf %57, %58 : vector<16x1xf32>
    %60 = vector.broadcast %59 : vector<16x1xf32> to vector<16x256xf32>
    %61 = arith.subf %55, %60 : vector<16x256xf32>
    %62 = arith.mulf %61, %61 : vector<16x256xf32>
    %cst_21 = arith.constant dense<0.000000e+00> : vector<16xf32>
    %63 = vector.multi_reduction <add>, %62, %cst_21 [1] : vector<16x256xf32> to vector<16xf32>
    %64 = vector.shape_cast %63 : vector<16xf32> to vector<16x1xf32>
    %cst_22 = arith.constant 2.560000e+02 : f32
    %65 = vector.broadcast %cst_22 : f32 to vector<16x1xf32>
    %66 = arith.divf %64, %65 : vector<16x1xf32>
    %cst_23 = arith.constant 9.99999974E-6 : f32
    %67 = vector.broadcast %cst_23 : f32 to vector<16x1xf32>
    %68 = arith.addf %66, %67 : vector<16x1xf32>
    %69 = math.rsqrt %68 : vector<16x1xf32>
    %70 = vector.broadcast %69 : vector<16x1xf32> to vector<16x256xf32>
    %71 = arith.mulf %61, %70 : vector<16x256xf32>
    %cst_24 = arith.constant 0.000000e+00 : f32
    %72 = vector.broadcast %cst_24 : f32 to vector<16x256xf32>
    %73 = arith.maximumf %71, %72 : vector<16x256xf32>
    %74 = tpu.concatenate %29, %73, %29 in 1 : vector<16x128xf32>, vector<16x256xf32>, vector<16x128xf32> -> vector<16x512xf32>
    %75 = vector.extract_strided_slice %74 {offsets = [0, 111], sizes = [16, 256], strides = [1, 1]} : vector<16x512xf32> to vector<16x256xf32>
    %76 = arith.mulf %75, %22 : vector<16x256xf32>
    %77 = vector.extract_strided_slice %74 {offsets = [0, 112], sizes = [16, 256], strides = [1, 1]} : vector<16x512xf32> to vector<16x256xf32>
    %78 = vector.extract_strided_slice %74 {offsets = [0, 113], sizes = [16, 256], strides = [1, 1]} : vector<16x512xf32> to vector<16x256xf32>
    %79 = arith.mulf %78, %28 : vector<16x256xf32>
    %80 = vector.extract_strided_slice %74 {offsets = [0, 127], sizes = [16, 256], strides = [1, 1]} : vector<16x512xf32> to vector<16x256xf32>
    %81 = arith.mulf %80, %22 : vector<16x256xf32>
    %82 = vector.extract_strided_slice %74 {offsets = [0, 128], sizes = [16, 256], strides = [1, 1]} : vector<16x512xf32> to vector<16x256xf32>
    %83 = vector.extract_strided_slice %74 {offsets = [0, 129], sizes = [16, 256], strides = [1, 1]} : vector<16x512xf32> to vector<16x256xf32>
    %84 = arith.mulf %83, %28 : vector<16x256xf32>
    %85 = vector.extract_strided_slice %74 {offsets = [0, 143], sizes = [16, 256], strides = [1, 1]} : vector<16x512xf32> to vector<16x256xf32>
    %86 = arith.mulf %85, %22 : vector<16x256xf32>
    %87 = vector.extract_strided_slice %74 {offsets = [0, 144], sizes = [16, 256], strides = [1, 1]} : vector<16x512xf32> to vector<16x256xf32>
    %88 = vector.extract_strided_slice %74 {offsets = [0, 145], sizes = [16, 256], strides = [1, 1]} : vector<16x512xf32> to vector<16x256xf32>
    %89 = arith.mulf %88, %28 : vector<16x256xf32>
    %90 = tpu.concatenate %76, %77, %79, %81, %82, %84, %86, %87, %89 in 0 : vector<16x256xf32>, vector<16x256xf32>, vector<16x256xf32>, vector<16x256xf32>, vector<16x256xf32>, vector<16x256xf32>, vector<16x256xf32>, vector<16x256xf32>, vector<16x256xf32> -> vector<144x256xf32>
    %c0_25 = arith.constant 0 : index
    %c0_26 = arith.constant 0 : index
    %c0_27 = arith.constant 0 : index
    %91 = vector.load %arg4[%c0_25, %c0_26, %c0_27] : memref<6x8x144xf32, #tpu.memory_space<vmem>>, vector<1x8x144xf32>
    %92 = vector.shape_cast %91 : vector<1x8x144xf32> to vector<8x144xf32>
    %cst_28 = arith.constant dense<0.000000e+00> : vector<8x256xf32>
    %93 = tpu.matmul %92, %90, %cst_28 {dimension_numbers = #tpu.dot_dimension_numbers<[1], [0], [0], [1], [0, 0, 1, 1], [], []>} : vector<8x144xf32>, vector<144x256xf32>, vector<8x256xf32> -> vector<8x256xf32>
    %cst_29 = arith.constant dense<0.000000e+00> : vector<8xf32>
    %94 = vector.multi_reduction <add>, %93, %cst_29 [1] : vector<8x256xf32> to vector<8xf32>
    %95 = vector.shape_cast %94 : vector<8xf32> to vector<8x1xf32>
    %cst_30 = arith.constant 2.560000e+02 : f32
    %96 = vector.broadcast %cst_30 : f32 to vector<8x1xf32>
    %97 = arith.divf %95, %96 : vector<8x1xf32>
    %98 = vector.broadcast %97 : vector<8x1xf32> to vector<8x256xf32>
    %99 = arith.subf %93, %98 : vector<8x256xf32>
    %100 = arith.mulf %99, %99 : vector<8x256xf32>
    %cst_31 = arith.constant dense<0.000000e+00> : vector<8xf32>
    %101 = vector.multi_reduction <add>, %100, %cst_31 [1] : vector<8x256xf32> to vector<8xf32>
    %102 = vector.shape_cast %101 : vector<8xf32> to vector<8x1xf32>
    %cst_32 = arith.constant 2.560000e+02 : f32
    %103 = vector.broadcast %cst_32 : f32 to vector<8x1xf32>
    %104 = arith.divf %102, %103 : vector<8x1xf32>
    %cst_33 = arith.constant 9.99999974E-6 : f32
    %105 = vector.broadcast %cst_33 : f32 to vector<8x1xf32>
    %106 = arith.addf %104, %105 : vector<8x1xf32>
    %107 = math.rsqrt %106 : vector<8x1xf32>
    %108 = vector.broadcast %107 : vector<8x1xf32> to vector<8x256xf32>
    %109 = arith.mulf %99, %108 : vector<8x256xf32>
    %cst_34 = arith.constant 0.000000e+00 : f32
    %110 = vector.broadcast %cst_34 : f32 to vector<8x256xf32>
    %111 = arith.maximumf %109, %110 : vector<8x256xf32>
    %112 = tpu.concatenate %51, %111 in 0 : vector<8x256xf32>, vector<8x256xf32> -> vector<16x256xf32>
    %c1 = arith.constant 1 : index
    %c0_35 = arith.constant 0 : index
    %c0_36 = arith.constant 0 : index
    %113 = vector.load %arg3[%c1, %c0_35, %c0_36] : memref<10x24x32xf32, #tpu.memory_space<vmem>>, vector<1x24x32xf32>
    %114 = vector.shape_cast %113 : vector<1x24x32xf32> to vector<24x32xf32>
    %115 = vector.extract_strided_slice %114 {offsets = [0, 0], sizes = [16, 16], strides = [1, 1]} : vector<24x32xf32> to vector<16x16xf32>
    %cst_37 = arith.constant dense<0.000000e+00> : vector<16x256xf32>
    %116 = tpu.matmul %115, %112, %cst_37 {dimension_numbers = #tpu.dot_dimension_numbers<[1], [0], [0], [1], [0, 0, 1, 1], [], []>} : vector<16x16xf32>, vector<16x256xf32>, vector<16x256xf32> -> vector<16x256xf32>
    %cst_38 = arith.constant dense<0.000000e+00> : vector<16xf32>
    %117 = vector.multi_reduction <add>, %116, %cst_38 [1] : vector<16x256xf32> to vector<16xf32>
    %118 = vector.shape_cast %117 : vector<16xf32> to vector<16x1xf32>
    %cst_39 = arith.constant 2.560000e+02 : f32
    %119 = vector.broadcast %cst_39 : f32 to vector<16x1xf32>
    %120 = arith.divf %118, %119 : vector<16x1xf32>
    %121 = vector.broadcast %120 : vector<16x1xf32> to vector<16x256xf32>
    %122 = arith.subf %116, %121 : vector<16x256xf32>
    %123 = arith.mulf %122, %122 : vector<16x256xf32>
    %cst_40 = arith.constant dense<0.000000e+00> : vector<16xf32>
    %124 = vector.multi_reduction <add>, %123, %cst_40 [1] : vector<16x256xf32> to vector<16xf32>
    %125 = vector.shape_cast %124 : vector<16xf32> to vector<16x1xf32>
    %cst_41 = arith.constant 2.560000e+02 : f32
    %126 = vector.broadcast %cst_41 : f32 to vector<16x1xf32>
    %127 = arith.divf %125, %126 : vector<16x1xf32>
    %cst_42 = arith.constant 9.99999974E-6 : f32
    %128 = vector.broadcast %cst_42 : f32 to vector<16x1xf32>
    %129 = arith.addf %127, %128 : vector<16x1xf32>
    %130 = math.rsqrt %129 : vector<16x1xf32>
    %131 = vector.broadcast %130 : vector<16x1xf32> to vector<16x256xf32>
    %132 = arith.mulf %122, %131 : vector<16x256xf32>
    %cst_43 = arith.constant 0.000000e+00 : f32
    %133 = vector.broadcast %cst_43 : f32 to vector<16x256xf32>
    %134 = arith.maximumf %132, %133 : vector<16x256xf32>
    %135 = tpu.concatenate %29, %134, %29 in 1 : vector<16x128xf32>, vector<16x256xf32>, vector<16x128xf32> -> vector<16x512xf32>
    %136 = vector.extract_strided_slice %135 {offsets = [0, 111], sizes = [16, 256], strides = [1, 1]} : vector<16x512xf32> to vector<16x256xf32>
    %137 = arith.mulf %136, %22 : vector<16x256xf32>
    %138 = vector.extract_strided_slice %135 {offsets = [0, 112], sizes = [16, 256], strides = [1, 1]} : vector<16x512xf32> to vector<16x256xf32>
    %139 = vector.extract_strided_slice %135 {offsets = [0, 113], sizes = [16, 256], strides = [1, 1]} : vector<16x512xf32> to vector<16x256xf32>
    %140 = arith.mulf %139, %28 : vector<16x256xf32>
    %141 = vector.extract_strided_slice %135 {offsets = [0, 127], sizes = [16, 256], strides = [1, 1]} : vector<16x512xf32> to vector<16x256xf32>
    %142 = arith.mulf %141, %22 : vector<16x256xf32>
    %143 = vector.extract_strided_slice %135 {offsets = [0, 128], sizes = [16, 256], strides = [1, 1]} : vector<16x512xf32> to vector<16x256xf32>
    %144 = vector.extract_strided_slice %135 {offsets = [0, 129], sizes = [16, 256], strides = [1, 1]} : vector<16x512xf32> to vector<16x256xf32>
    %145 = arith.mulf %144, %28 : vector<16x256xf32>
    %146 = vector.extract_strided_slice %135 {offsets = [0, 143], sizes = [16, 256], strides = [1, 1]} : vector<16x512xf32> to vector<16x256xf32>
    %147 = arith.mulf %146, %22 : vector<16x256xf32>
    %148 = vector.extract_strided_slice %135 {offsets = [0, 144], sizes = [16, 256], strides = [1, 1]} : vector<16x512xf32> to vector<16x256xf32>
    %149 = vector.extract_strided_slice %135 {offsets = [0, 145], sizes = [16, 256], strides = [1, 1]} : vector<16x512xf32> to vector<16x256xf32>
    %150 = arith.mulf %149, %28 : vector<16x256xf32>
    %151 = tpu.concatenate %137, %138, %140, %142, %143, %145, %147, %148, %150 in 0 : vector<16x256xf32>, vector<16x256xf32>, vector<16x256xf32>, vector<16x256xf32>, vector<16x256xf32>, vector<16x256xf32>, vector<16x256xf32>, vector<16x256xf32>, vector<16x256xf32> -> vector<144x256xf32>
    %c1_44 = arith.constant 1 : index
    %c0_45 = arith.constant 0 : index
    %c0_46 = arith.constant 0 : index
    %152 = vector.load %arg4[%c1_44, %c0_45, %c0_46] : memref<6x8x144xf32, #tpu.memory_space<vmem>>, vector<1x8x144xf32>
    %153 = vector.shape_cast %152 : vector<1x8x144xf32> to vector<8x144xf32>
    %cst_47 = arith.constant dense<0.000000e+00> : vector<8x256xf32>
    %154 = tpu.matmul %153, %151, %cst_47 {dimension_numbers = #tpu.dot_dimension_numbers<[1], [0], [0], [1], [0, 0, 1, 1], [], []>} : vector<8x144xf32>, vector<144x256xf32>, vector<8x256xf32> -> vector<8x256xf32>
    %cst_48 = arith.constant dense<0.000000e+00> : vector<8xf32>
    %155 = vector.multi_reduction <add>, %154, %cst_48 [1] : vector<8x256xf32> to vector<8xf32>
    %156 = vector.shape_cast %155 : vector<8xf32> to vector<8x1xf32>
    %cst_49 = arith.constant 2.560000e+02 : f32
    %157 = vector.broadcast %cst_49 : f32 to vector<8x1xf32>
    %158 = arith.divf %156, %157 : vector<8x1xf32>
    %159 = vector.broadcast %158 : vector<8x1xf32> to vector<8x256xf32>
    %160 = arith.subf %154, %159 : vector<8x256xf32>
    %161 = arith.mulf %160, %160 : vector<8x256xf32>
    %cst_50 = arith.constant dense<0.000000e+00> : vector<8xf32>
    %162 = vector.multi_reduction <add>, %161, %cst_50 [1] : vector<8x256xf32> to vector<8xf32>
    %163 = vector.shape_cast %162 : vector<8xf32> to vector<8x1xf32>
    %cst_51 = arith.constant 2.560000e+02 : f32
    %164 = vector.broadcast %cst_51 : f32 to vector<8x1xf32>
    %165 = arith.divf %163, %164 : vector<8x1xf32>
    %cst_52 = arith.constant 9.99999974E-6 : f32
    %166 = vector.broadcast %cst_52 : f32 to vector<8x1xf32>
    %167 = arith.addf %165, %166 : vector<8x1xf32>
    %168 = math.rsqrt %167 : vector<8x1xf32>
    %169 = vector.broadcast %168 : vector<8x1xf32> to vector<8x256xf32>
    %170 = arith.mulf %160, %169 : vector<8x256xf32>
    %cst_53 = arith.constant 0.000000e+00 : f32
    %171 = vector.broadcast %cst_53 : f32 to vector<8x256xf32>
    %172 = arith.maximumf %170, %171 : vector<8x256xf32>
    %173 = tpu.concatenate %51, %111, %172 in 0 : vector<8x256xf32>, vector<8x256xf32>, vector<8x256xf32> -> vector<24x256xf32>
    %c2 = arith.constant 2 : index
    %c0_54 = arith.constant 0 : index
    %c0_55 = arith.constant 0 : index
    %174 = vector.load %arg3[%c2, %c0_54, %c0_55] : memref<10x24x32xf32, #tpu.memory_space<vmem>>, vector<1x24x32xf32>
    %175 = vector.shape_cast %174 : vector<1x24x32xf32> to vector<24x32xf32>
    %176 = vector.extract_strided_slice %175 {offsets = [0, 0], sizes = [16, 24], strides = [1, 1]} : vector<24x32xf32> to vector<16x24xf32>
    %cst_56 = arith.constant dense<0.000000e+00> : vector<16x256xf32>
    %177 = tpu.matmul %176, %173, %cst_56 {dimension_numbers = #tpu.dot_dimension_numbers<[1], [0], [0], [1], [0, 0, 1, 1], [], []>} : vector<16x24xf32>, vector<24x256xf32>, vector<16x256xf32> -> vector<16x256xf32>
    %cst_57 = arith.constant dense<0.000000e+00> : vector<16xf32>
    %178 = vector.multi_reduction <add>, %177, %cst_57 [1] : vector<16x256xf32> to vector<16xf32>
    %179 = vector.shape_cast %178 : vector<16xf32> to vector<16x1xf32>
    %cst_58 = arith.constant 2.560000e+02 : f32
    %180 = vector.broadcast %cst_58 : f32 to vector<16x1xf32>
    %181 = arith.divf %179, %180 : vector<16x1xf32>
    %182 = vector.broadcast %181 : vector<16x1xf32> to vector<16x256xf32>
    %183 = arith.subf %177, %182 : vector<16x256xf32>
    %184 = arith.mulf %183, %183 : vector<16x256xf32>
    %cst_59 = arith.constant dense<0.000000e+00> : vector<16xf32>
    %185 = vector.multi_reduction <add>, %184, %cst_59 [1] : vector<16x256xf32> to vector<16xf32>
    %186 = vector.shape_cast %185 : vector<16xf32> to vector<16x1xf32>
    %cst_60 = arith.constant 2.560000e+02 : f32
    %187 = vector.broadcast %cst_60 : f32 to vector<16x1xf32>
    %188 = arith.divf %186, %187 : vector<16x1xf32>
    %cst_61 = arith.constant 9.99999974E-6 : f32
    %189 = vector.broadcast %cst_61 : f32 to vector<16x1xf32>
    %190 = arith.addf %188, %189 : vector<16x1xf32>
    %191 = math.rsqrt %190 : vector<16x1xf32>
    %192 = vector.broadcast %191 : vector<16x1xf32> to vector<16x256xf32>
    %193 = arith.mulf %183, %192 : vector<16x256xf32>
    %cst_62 = arith.constant 0.000000e+00 : f32
    %194 = vector.broadcast %cst_62 : f32 to vector<16x256xf32>
    %195 = arith.maximumf %193, %194 : vector<16x256xf32>
    %c3 = arith.constant 3 : index
    %c0_63 = arith.constant 0 : index
    %c0_64 = arith.constant 0 : index
    %196 = vector.load %arg3[%c3, %c0_63, %c0_64] : memref<10x24x32xf32, #tpu.memory_space<vmem>>, vector<1x24x32xf32>
    %197 = vector.shape_cast %196 : vector<1x24x32xf32> to vector<24x32xf32>
    %198 = vector.extract_strided_slice %197 {offsets = [0, 0], sizes = [16, 16], strides = [1, 1]} : vector<24x32xf32> to vector<16x16xf32>
    %cst_65 = arith.constant dense<0.000000e+00> : vector<16x256xf32>
    %199 = tpu.matmul %198, %195, %cst_65 {dimension_numbers = #tpu.dot_dimension_numbers<[1], [0], [0], [1], [0, 0, 1, 1], [], []>} : vector<16x16xf32>, vector<16x256xf32>, vector<16x256xf32> -> vector<16x256xf32>
    %cst_66 = arith.constant dense<0.000000e+00> : vector<16xf32>
    %200 = vector.multi_reduction <add>, %199, %cst_66 [1] : vector<16x256xf32> to vector<16xf32>
    %201 = vector.shape_cast %200 : vector<16xf32> to vector<16x1xf32>
    %cst_67 = arith.constant 2.560000e+02 : f32
    %202 = vector.broadcast %cst_67 : f32 to vector<16x1xf32>
    %203 = arith.divf %201, %202 : vector<16x1xf32>
    %204 = vector.broadcast %203 : vector<16x1xf32> to vector<16x256xf32>
    %205 = arith.subf %199, %204 : vector<16x256xf32>
    %206 = arith.mulf %205, %205 : vector<16x256xf32>
    %cst_68 = arith.constant dense<0.000000e+00> : vector<16xf32>
    %207 = vector.multi_reduction <add>, %206, %cst_68 [1] : vector<16x256xf32> to vector<16xf32>
    %208 = vector.shape_cast %207 : vector<16xf32> to vector<16x1xf32>
    %cst_69 = arith.constant 2.560000e+02 : f32
    %209 = vector.broadcast %cst_69 : f32 to vector<16x1xf32>
    %210 = arith.divf %208, %209 : vector<16x1xf32>
    %cst_70 = arith.constant 9.99999974E-6 : f32
    %211 = vector.broadcast %cst_70 : f32 to vector<16x1xf32>
    %212 = arith.addf %210, %211 : vector<16x1xf32>
    %213 = math.rsqrt %212 : vector<16x1xf32>
    %214 = vector.broadcast %213 : vector<16x1xf32> to vector<16x256xf32>
    %215 = arith.mulf %205, %214 : vector<16x256xf32>
    %cst_71 = arith.constant 0.000000e+00 : f32
    %216 = vector.broadcast %cst_71 : f32 to vector<16x256xf32>
    %217 = arith.maximumf %215, %216 : vector<16x256xf32>
    %218 = tpu.concatenate %29, %217, %29 in 1 : vector<16x128xf32>, vector<16x256xf32>, vector<16x128xf32> -> vector<16x512xf32>
    %219 = vector.extract_strided_slice %218 {offsets = [0, 111], sizes = [16, 256], strides = [1, 1]} : vector<16x512xf32> to vector<16x256xf32>
    %220 = arith.mulf %219, %22 : vector<16x256xf32>
    %221 = vector.extract_strided_slice %218 {offsets = [0, 112], sizes = [16, 256], strides = [1, 1]} : vector<16x512xf32> to vector<16x256xf32>
    %222 = vector.extract_strided_slice %218 {offsets = [0, 113], sizes = [16, 256], strides = [1, 1]} : vector<16x512xf32> to vector<16x256xf32>
    %223 = arith.mulf %222, %28 : vector<16x256xf32>
    %224 = vector.extract_strided_slice %218 {offsets = [0, 127], sizes = [16, 256], strides = [1, 1]} : vector<16x512xf32> to vector<16x256xf32>
    %225 = arith.mulf %224, %22 : vector<16x256xf32>
    %226 = vector.extract_strided_slice %218 {offsets = [0, 128], sizes = [16, 256], strides = [1, 1]} : vector<16x512xf32> to vector<16x256xf32>
    %227 = vector.extract_strided_slice %218 {offsets = [0, 129], sizes = [16, 256], strides = [1, 1]} : vector<16x512xf32> to vector<16x256xf32>
    %228 = arith.mulf %227, %28 : vector<16x256xf32>
    %229 = vector.extract_strided_slice %218 {offsets = [0, 143], sizes = [16, 256], strides = [1, 1]} : vector<16x512xf32> to vector<16x256xf32>
    %230 = arith.mulf %229, %22 : vector<16x256xf32>
    %231 = vector.extract_strided_slice %218 {offsets = [0, 144], sizes = [16, 256], strides = [1, 1]} : vector<16x512xf32> to vector<16x256xf32>
    %232 = vector.extract_strided_slice %218 {offsets = [0, 145], sizes = [16, 256], strides = [1, 1]} : vector<16x512xf32> to vector<16x256xf32>
    %233 = arith.mulf %232, %28 : vector<16x256xf32>
    %234 = tpu.concatenate %220, %221, %223, %225, %226, %228, %230, %231, %233 in 0 : vector<16x256xf32>, vector<16x256xf32>, vector<16x256xf32>, vector<16x256xf32>, vector<16x256xf32>, vector<16x256xf32>, vector<16x256xf32>, vector<16x256xf32>, vector<16x256xf32> -> vector<144x256xf32>
    %c2_72 = arith.constant 2 : index
    %c0_73 = arith.constant 0 : index
    %c0_74 = arith.constant 0 : index
    %235 = vector.load %arg4[%c2_72, %c0_73, %c0_74] : memref<6x8x144xf32, #tpu.memory_space<vmem>>, vector<1x8x144xf32>
    %236 = vector.shape_cast %235 : vector<1x8x144xf32> to vector<8x144xf32>
    %cst_75 = arith.constant dense<0.000000e+00> : vector<8x256xf32>
    %237 = tpu.matmul %236, %234, %cst_75 {dimension_numbers = #tpu.dot_dimension_numbers<[1], [0], [0], [1], [0, 0, 1, 1], [], []>} : vector<8x144xf32>, vector<144x256xf32>, vector<8x256xf32> -> vector<8x256xf32>
    %cst_76 = arith.constant dense<0.000000e+00> : vector<8xf32>
    %238 = vector.multi_reduction <add>, %237, %cst_76 [1] : vector<8x256xf32> to vector<8xf32>
    %239 = vector.shape_cast %238 : vector<8xf32> to vector<8x1xf32>
    %cst_77 = arith.constant 2.560000e+02 : f32
    %240 = vector.broadcast %cst_77 : f32 to vector<8x1xf32>
    %241 = arith.divf %239, %240 : vector<8x1xf32>
    %242 = vector.broadcast %241 : vector<8x1xf32> to vector<8x256xf32>
    %243 = arith.subf %237, %242 : vector<8x256xf32>
    %244 = arith.mulf %243, %243 : vector<8x256xf32>
    %cst_78 = arith.constant dense<0.000000e+00> : vector<8xf32>
    %245 = vector.multi_reduction <add>, %244, %cst_78 [1] : vector<8x256xf32> to vector<8xf32>
    %246 = vector.shape_cast %245 : vector<8xf32> to vector<8x1xf32>
    %cst_79 = arith.constant 2.560000e+02 : f32
    %247 = vector.broadcast %cst_79 : f32 to vector<8x1xf32>
    %248 = arith.divf %246, %247 : vector<8x1xf32>
    %cst_80 = arith.constant 9.99999974E-6 : f32
    %249 = vector.broadcast %cst_80 : f32 to vector<8x1xf32>
    %250 = arith.addf %248, %249 : vector<8x1xf32>
    %251 = math.rsqrt %250 : vector<8x1xf32>
    %252 = vector.broadcast %251 : vector<8x1xf32> to vector<8x256xf32>
    %253 = arith.mulf %243, %252 : vector<8x256xf32>
    %cst_81 = arith.constant 0.000000e+00 : f32
    %254 = vector.broadcast %cst_81 : f32 to vector<8x256xf32>
    %255 = arith.maximumf %253, %254 : vector<8x256xf32>
    %256 = tpu.concatenate %195, %255 in 0 : vector<16x256xf32>, vector<8x256xf32> -> vector<24x256xf32>
    %c4 = arith.constant 4 : index
    %c0_82 = arith.constant 0 : index
    %c0_83 = arith.constant 0 : index
    %257 = vector.load %arg3[%c4, %c0_82, %c0_83] : memref<10x24x32xf32, #tpu.memory_space<vmem>>, vector<1x24x32xf32>
    %258 = vector.shape_cast %257 : vector<1x24x32xf32> to vector<24x32xf32>
    %259 = vector.extract_strided_slice %258 {offsets = [0, 0], sizes = [16, 24], strides = [1, 1]} : vector<24x32xf32> to vector<16x24xf32>
    %cst_84 = arith.constant dense<0.000000e+00> : vector<16x256xf32>
    %260 = tpu.matmul %259, %256, %cst_84 {dimension_numbers = #tpu.dot_dimension_numbers<[1], [0], [0], [1], [0, 0, 1, 1], [], []>} : vector<16x24xf32>, vector<24x256xf32>, vector<16x256xf32> -> vector<16x256xf32>
    %cst_85 = arith.constant dense<0.000000e+00> : vector<16xf32>
    %261 = vector.multi_reduction <add>, %260, %cst_85 [1] : vector<16x256xf32> to vector<16xf32>
    %262 = vector.shape_cast %261 : vector<16xf32> to vector<16x1xf32>
    %cst_86 = arith.constant 2.560000e+02 : f32
    %263 = vector.broadcast %cst_86 : f32 to vector<16x1xf32>
    %264 = arith.divf %262, %263 : vector<16x1xf32>
    %265 = vector.broadcast %264 : vector<16x1xf32> to vector<16x256xf32>
    %266 = arith.subf %260, %265 : vector<16x256xf32>
    %267 = arith.mulf %266, %266 : vector<16x256xf32>
    %cst_87 = arith.constant dense<0.000000e+00> : vector<16xf32>
    %268 = vector.multi_reduction <add>, %267, %cst_87 [1] : vector<16x256xf32> to vector<16xf32>
    %269 = vector.shape_cast %268 : vector<16xf32> to vector<16x1xf32>
    %cst_88 = arith.constant 2.560000e+02 : f32
    %270 = vector.broadcast %cst_88 : f32 to vector<16x1xf32>
    %271 = arith.divf %269, %270 : vector<16x1xf32>
    %cst_89 = arith.constant 9.99999974E-6 : f32
    %272 = vector.broadcast %cst_89 : f32 to vector<16x1xf32>
    %273 = arith.addf %271, %272 : vector<16x1xf32>
    %274 = math.rsqrt %273 : vector<16x1xf32>
    %275 = vector.broadcast %274 : vector<16x1xf32> to vector<16x256xf32>
    %276 = arith.mulf %266, %275 : vector<16x256xf32>
    %cst_90 = arith.constant 0.000000e+00 : f32
    %277 = vector.broadcast %cst_90 : f32 to vector<16x256xf32>
    %278 = arith.maximumf %276, %277 : vector<16x256xf32>
    %279 = tpu.concatenate %29, %278, %29 in 1 : vector<16x128xf32>, vector<16x256xf32>, vector<16x128xf32> -> vector<16x512xf32>
    %280 = vector.extract_strided_slice %279 {offsets = [0, 111], sizes = [16, 256], strides = [1, 1]} : vector<16x512xf32> to vector<16x256xf32>
    %281 = arith.mulf %280, %22 : vector<16x256xf32>
    %282 = vector.extract_strided_slice %279 {offsets = [0, 112], sizes = [16, 256], strides = [1, 1]} : vector<16x512xf32> to vector<16x256xf32>
    %283 = vector.extract_strided_slice %279 {offsets = [0, 113], sizes = [16, 256], strides = [1, 1]} : vector<16x512xf32> to vector<16x256xf32>
    %284 = arith.mulf %283, %28 : vector<16x256xf32>
    %285 = vector.extract_strided_slice %279 {offsets = [0, 127], sizes = [16, 256], strides = [1, 1]} : vector<16x512xf32> to vector<16x256xf32>
    %286 = arith.mulf %285, %22 : vector<16x256xf32>
    %287 = vector.extract_strided_slice %279 {offsets = [0, 128], sizes = [16, 256], strides = [1, 1]} : vector<16x512xf32> to vector<16x256xf32>
    %288 = vector.extract_strided_slice %279 {offsets = [0, 129], sizes = [16, 256], strides = [1, 1]} : vector<16x512xf32> to vector<16x256xf32>
    %289 = arith.mulf %288, %28 : vector<16x256xf32>
    %290 = vector.extract_strided_slice %279 {offsets = [0, 143], sizes = [16, 256], strides = [1, 1]} : vector<16x512xf32> to vector<16x256xf32>
    %291 = arith.mulf %290, %22 : vector<16x256xf32>
    %292 = vector.extract_strided_slice %279 {offsets = [0, 144], sizes = [16, 256], strides = [1, 1]} : vector<16x512xf32> to vector<16x256xf32>
    %293 = vector.extract_strided_slice %279 {offsets = [0, 145], sizes = [16, 256], strides = [1, 1]} : vector<16x512xf32> to vector<16x256xf32>
    %294 = arith.mulf %293, %28 : vector<16x256xf32>
    %295 = tpu.concatenate %281, %282, %284, %286, %287, %289, %291, %292, %294 in 0 : vector<16x256xf32>, vector<16x256xf32>, vector<16x256xf32>, vector<16x256xf32>, vector<16x256xf32>, vector<16x256xf32>, vector<16x256xf32>, vector<16x256xf32>, vector<16x256xf32> -> vector<144x256xf32>
    %c3_91 = arith.constant 3 : index
    %c0_92 = arith.constant 0 : index
    %c0_93 = arith.constant 0 : index
    %296 = vector.load %arg4[%c3_91, %c0_92, %c0_93] : memref<6x8x144xf32, #tpu.memory_space<vmem>>, vector<1x8x144xf32>
    %297 = vector.shape_cast %296 : vector<1x8x144xf32> to vector<8x144xf32>
    %cst_94 = arith.constant dense<0.000000e+00> : vector<8x256xf32>
    %298 = tpu.matmul %297, %295, %cst_94 {dimension_numbers = #tpu.dot_dimension_numbers<[1], [0], [0], [1], [0, 0, 1, 1], [], []>} : vector<8x144xf32>, vector<144x256xf32>, vector<8x256xf32> -> vector<8x256xf32>
    %cst_95 = arith.constant dense<0.000000e+00> : vector<8xf32>
    %299 = vector.multi_reduction <add>, %298, %cst_95 [1] : vector<8x256xf32> to vector<8xf32>
    %300 = vector.shape_cast %299 : vector<8xf32> to vector<8x1xf32>
    %cst_96 = arith.constant 2.560000e+02 : f32
    %301 = vector.broadcast %cst_96 : f32 to vector<8x1xf32>
    %302 = arith.divf %300, %301 : vector<8x1xf32>
    %303 = vector.broadcast %302 : vector<8x1xf32> to vector<8x256xf32>
    %304 = arith.subf %298, %303 : vector<8x256xf32>
    %305 = arith.mulf %304, %304 : vector<8x256xf32>
    %cst_97 = arith.constant dense<0.000000e+00> : vector<8xf32>
    %306 = vector.multi_reduction <add>, %305, %cst_97 [1] : vector<8x256xf32> to vector<8xf32>
    %307 = vector.shape_cast %306 : vector<8xf32> to vector<8x1xf32>
    %cst_98 = arith.constant 2.560000e+02 : f32
    %308 = vector.broadcast %cst_98 : f32 to vector<8x1xf32>
    %309 = arith.divf %307, %308 : vector<8x1xf32>
    %cst_99 = arith.constant 9.99999974E-6 : f32
    %310 = vector.broadcast %cst_99 : f32 to vector<8x1xf32>
    %311 = arith.addf %309, %310 : vector<8x1xf32>
    %312 = math.rsqrt %311 : vector<8x1xf32>
    %313 = vector.broadcast %312 : vector<8x1xf32> to vector<8x256xf32>
    %314 = arith.mulf %304, %313 : vector<8x256xf32>
    %cst_100 = arith.constant 0.000000e+00 : f32
    %315 = vector.broadcast %cst_100 : f32 to vector<8x256xf32>
    %316 = arith.maximumf %314, %315 : vector<8x256xf32>
    %317 = tpu.concatenate %195, %255, %316 in 0 : vector<16x256xf32>, vector<8x256xf32>, vector<8x256xf32> -> vector<32x256xf32>
    %c5 = arith.constant 5 : index
    %c0_101 = arith.constant 0 : index
    %c0_102 = arith.constant 0 : index
    %318 = vector.load %arg3[%c5, %c0_101, %c0_102] : memref<10x24x32xf32, #tpu.memory_space<vmem>>, vector<1x24x32xf32>
    %319 = vector.shape_cast %318 : vector<1x24x32xf32> to vector<24x32xf32>
    %320 = vector.extract_strided_slice %319 {offsets = [0, 0], sizes = [16, 32], strides = [1, 1]} : vector<24x32xf32> to vector<16x32xf32>
    %cst_103 = arith.constant dense<0.000000e+00> : vector<16x256xf32>
    %321 = tpu.matmul %320, %317, %cst_103 {dimension_numbers = #tpu.dot_dimension_numbers<[1], [0], [0], [1], [0, 0, 1, 1], [], []>} : vector<16x32xf32>, vector<32x256xf32>, vector<16x256xf32> -> vector<16x256xf32>
    %cst_104 = arith.constant dense<0.000000e+00> : vector<16xf32>
    %322 = vector.multi_reduction <add>, %321, %cst_104 [1] : vector<16x256xf32> to vector<16xf32>
    %323 = vector.shape_cast %322 : vector<16xf32> to vector<16x1xf32>
    %cst_105 = arith.constant 2.560000e+02 : f32
    %324 = vector.broadcast %cst_105 : f32 to vector<16x1xf32>
    %325 = arith.divf %323, %324 : vector<16x1xf32>
    %326 = vector.broadcast %325 : vector<16x1xf32> to vector<16x256xf32>
    %327 = arith.subf %321, %326 : vector<16x256xf32>
    %328 = arith.mulf %327, %327 : vector<16x256xf32>
    %cst_106 = arith.constant dense<0.000000e+00> : vector<16xf32>
    %329 = vector.multi_reduction <add>, %328, %cst_106 [1] : vector<16x256xf32> to vector<16xf32>
    %330 = vector.shape_cast %329 : vector<16xf32> to vector<16x1xf32>
    %cst_107 = arith.constant 2.560000e+02 : f32
    %331 = vector.broadcast %cst_107 : f32 to vector<16x1xf32>
    %332 = arith.divf %330, %331 : vector<16x1xf32>
    %cst_108 = arith.constant 9.99999974E-6 : f32
    %333 = vector.broadcast %cst_108 : f32 to vector<16x1xf32>
    %334 = arith.addf %332, %333 : vector<16x1xf32>
    %335 = math.rsqrt %334 : vector<16x1xf32>
    %336 = vector.broadcast %335 : vector<16x1xf32> to vector<16x256xf32>
    %337 = arith.mulf %327, %336 : vector<16x256xf32>
    %cst_109 = arith.constant 0.000000e+00 : f32
    %338 = vector.broadcast %cst_109 : f32 to vector<16x256xf32>
    %339 = arith.maximumf %337, %338 : vector<16x256xf32>
    %c6 = arith.constant 6 : index
    %c0_110 = arith.constant 0 : index
    %c0_111 = arith.constant 0 : index
    %340 = vector.load %arg3[%c6, %c0_110, %c0_111] : memref<10x24x32xf32, #tpu.memory_space<vmem>>, vector<1x24x32xf32>
    %341 = vector.shape_cast %340 : vector<1x24x32xf32> to vector<24x32xf32>
    %342 = vector.extract_strided_slice %341 {offsets = [0, 0], sizes = [16, 16], strides = [1, 1]} : vector<24x32xf32> to vector<16x16xf32>
    %cst_112 = arith.constant dense<0.000000e+00> : vector<16x256xf32>
    %343 = tpu.matmul %342, %339, %cst_112 {dimension_numbers = #tpu.dot_dimension_numbers<[1], [0], [0], [1], [0, 0, 1, 1], [], []>} : vector<16x16xf32>, vector<16x256xf32>, vector<16x256xf32> -> vector<16x256xf32>
    %cst_113 = arith.constant dense<0.000000e+00> : vector<16xf32>
    %344 = vector.multi_reduction <add>, %343, %cst_113 [1] : vector<16x256xf32> to vector<16xf32>
    %345 = vector.shape_cast %344 : vector<16xf32> to vector<16x1xf32>
    %cst_114 = arith.constant 2.560000e+02 : f32
    %346 = vector.broadcast %cst_114 : f32 to vector<16x1xf32>
    %347 = arith.divf %345, %346 : vector<16x1xf32>
    %348 = vector.broadcast %347 : vector<16x1xf32> to vector<16x256xf32>
    %349 = arith.subf %343, %348 : vector<16x256xf32>
    %350 = arith.mulf %349, %349 : vector<16x256xf32>
    %cst_115 = arith.constant dense<0.000000e+00> : vector<16xf32>
    %351 = vector.multi_reduction <add>, %350, %cst_115 [1] : vector<16x256xf32> to vector<16xf32>
    %352 = vector.shape_cast %351 : vector<16xf32> to vector<16x1xf32>
    %cst_116 = arith.constant 2.560000e+02 : f32
    %353 = vector.broadcast %cst_116 : f32 to vector<16x1xf32>
    %354 = arith.divf %352, %353 : vector<16x1xf32>
    %cst_117 = arith.constant 9.99999974E-6 : f32
    %355 = vector.broadcast %cst_117 : f32 to vector<16x1xf32>
    %356 = arith.addf %354, %355 : vector<16x1xf32>
    %357 = math.rsqrt %356 : vector<16x1xf32>
    %358 = vector.broadcast %357 : vector<16x1xf32> to vector<16x256xf32>
    %359 = arith.mulf %349, %358 : vector<16x256xf32>
    %cst_118 = arith.constant 0.000000e+00 : f32
    %360 = vector.broadcast %cst_118 : f32 to vector<16x256xf32>
    %361 = arith.maximumf %359, %360 : vector<16x256xf32>
    %362 = tpu.concatenate %29, %361, %29 in 1 : vector<16x128xf32>, vector<16x256xf32>, vector<16x128xf32> -> vector<16x512xf32>
    %363 = vector.extract_strided_slice %362 {offsets = [0, 111], sizes = [16, 256], strides = [1, 1]} : vector<16x512xf32> to vector<16x256xf32>
    %364 = arith.mulf %363, %22 : vector<16x256xf32>
    %365 = vector.extract_strided_slice %362 {offsets = [0, 112], sizes = [16, 256], strides = [1, 1]} : vector<16x512xf32> to vector<16x256xf32>
    %366 = vector.extract_strided_slice %362 {offsets = [0, 113], sizes = [16, 256], strides = [1, 1]} : vector<16x512xf32> to vector<16x256xf32>
    %367 = arith.mulf %366, %28 : vector<16x256xf32>
    %368 = vector.extract_strided_slice %362 {offsets = [0, 127], sizes = [16, 256], strides = [1, 1]} : vector<16x512xf32> to vector<16x256xf32>
    %369 = arith.mulf %368, %22 : vector<16x256xf32>
    %370 = vector.extract_strided_slice %362 {offsets = [0, 128], sizes = [16, 256], strides = [1, 1]} : vector<16x512xf32> to vector<16x256xf32>
    %371 = vector.extract_strided_slice %362 {offsets = [0, 129], sizes = [16, 256], strides = [1, 1]} : vector<16x512xf32> to vector<16x256xf32>
    %372 = arith.mulf %371, %28 : vector<16x256xf32>
    %373 = vector.extract_strided_slice %362 {offsets = [0, 143], sizes = [16, 256], strides = [1, 1]} : vector<16x512xf32> to vector<16x256xf32>
    %374 = arith.mulf %373, %22 : vector<16x256xf32>
    %375 = vector.extract_strided_slice %362 {offsets = [0, 144], sizes = [16, 256], strides = [1, 1]} : vector<16x512xf32> to vector<16x256xf32>
    %376 = vector.extract_strided_slice %362 {offsets = [0, 145], sizes = [16, 256], strides = [1, 1]} : vector<16x512xf32> to vector<16x256xf32>
    %377 = arith.mulf %376, %28 : vector<16x256xf32>
    %378 = tpu.concatenate %364, %365, %367, %369, %370, %372, %374, %375, %377 in 0 : vector<16x256xf32>, vector<16x256xf32>, vector<16x256xf32>, vector<16x256xf32>, vector<16x256xf32>, vector<16x256xf32>, vector<16x256xf32>, vector<16x256xf32>, vector<16x256xf32> -> vector<144x256xf32>
    %c4_119 = arith.constant 4 : index
    %c0_120 = arith.constant 0 : index
    %c0_121 = arith.constant 0 : index
    %379 = vector.load %arg4[%c4_119, %c0_120, %c0_121] : memref<6x8x144xf32, #tpu.memory_space<vmem>>, vector<1x8x144xf32>
    %380 = vector.shape_cast %379 : vector<1x8x144xf32> to vector<8x144xf32>
    %cst_122 = arith.constant dense<0.000000e+00> : vector<8x256xf32>
    %381 = tpu.matmul %380, %378, %cst_122 {dimension_numbers = #tpu.dot_dimension_numbers<[1], [0], [0], [1], [0, 0, 1, 1], [], []>} : vector<8x144xf32>, vector<144x256xf32>, vector<8x256xf32> -> vector<8x256xf32>
    %cst_123 = arith.constant dense<0.000000e+00> : vector<8xf32>
    %382 = vector.multi_reduction <add>, %381, %cst_123 [1] : vector<8x256xf32> to vector<8xf32>
    %383 = vector.shape_cast %382 : vector<8xf32> to vector<8x1xf32>
    %cst_124 = arith.constant 2.560000e+02 : f32
    %384 = vector.broadcast %cst_124 : f32 to vector<8x1xf32>
    %385 = arith.divf %383, %384 : vector<8x1xf32>
    %386 = vector.broadcast %385 : vector<8x1xf32> to vector<8x256xf32>
    %387 = arith.subf %381, %386 : vector<8x256xf32>
    %388 = arith.mulf %387, %387 : vector<8x256xf32>
    %cst_125 = arith.constant dense<0.000000e+00> : vector<8xf32>
    %389 = vector.multi_reduction <add>, %388, %cst_125 [1] : vector<8x256xf32> to vector<8xf32>
    %390 = vector.shape_cast %389 : vector<8xf32> to vector<8x1xf32>
    %cst_126 = arith.constant 2.560000e+02 : f32
    %391 = vector.broadcast %cst_126 : f32 to vector<8x1xf32>
    %392 = arith.divf %390, %391 : vector<8x1xf32>
    %cst_127 = arith.constant 9.99999974E-6 : f32
    %393 = vector.broadcast %cst_127 : f32 to vector<8x1xf32>
    %394 = arith.addf %392, %393 : vector<8x1xf32>
    %395 = math.rsqrt %394 : vector<8x1xf32>
    %396 = vector.broadcast %395 : vector<8x1xf32> to vector<8x256xf32>
    %397 = arith.mulf %387, %396 : vector<8x256xf32>
    %cst_128 = arith.constant 0.000000e+00 : f32
    %398 = vector.broadcast %cst_128 : f32 to vector<8x256xf32>
    %399 = arith.maximumf %397, %398 : vector<8x256xf32>
    %400 = tpu.concatenate %339, %399 in 0 : vector<16x256xf32>, vector<8x256xf32> -> vector<24x256xf32>
    %c7 = arith.constant 7 : index
    %c0_129 = arith.constant 0 : index
    %c0_130 = arith.constant 0 : index
    %401 = vector.load %arg3[%c7, %c0_129, %c0_130] : memref<10x24x32xf32, #tpu.memory_space<vmem>>, vector<1x24x32xf32>
    %402 = vector.shape_cast %401 : vector<1x24x32xf32> to vector<24x32xf32>
    %403 = vector.extract_strided_slice %402 {offsets = [0, 0], sizes = [16, 24], strides = [1, 1]} : vector<24x32xf32> to vector<16x24xf32>
    %cst_131 = arith.constant dense<0.000000e+00> : vector<16x256xf32>
    %404 = tpu.matmul %403, %400, %cst_131 {dimension_numbers = #tpu.dot_dimension_numbers<[1], [0], [0], [1], [0, 0, 1, 1], [], []>} : vector<16x24xf32>, vector<24x256xf32>, vector<16x256xf32> -> vector<16x256xf32>
    %cst_132 = arith.constant dense<0.000000e+00> : vector<16xf32>
    %405 = vector.multi_reduction <add>, %404, %cst_132 [1] : vector<16x256xf32> to vector<16xf32>
    %406 = vector.shape_cast %405 : vector<16xf32> to vector<16x1xf32>
    %cst_133 = arith.constant 2.560000e+02 : f32
    %407 = vector.broadcast %cst_133 : f32 to vector<16x1xf32>
    %408 = arith.divf %406, %407 : vector<16x1xf32>
    %409 = vector.broadcast %408 : vector<16x1xf32> to vector<16x256xf32>
    %410 = arith.subf %404, %409 : vector<16x256xf32>
    %411 = arith.mulf %410, %410 : vector<16x256xf32>
    %cst_134 = arith.constant dense<0.000000e+00> : vector<16xf32>
    %412 = vector.multi_reduction <add>, %411, %cst_134 [1] : vector<16x256xf32> to vector<16xf32>
    %413 = vector.shape_cast %412 : vector<16xf32> to vector<16x1xf32>
    %cst_135 = arith.constant 2.560000e+02 : f32
    %414 = vector.broadcast %cst_135 : f32 to vector<16x1xf32>
    %415 = arith.divf %413, %414 : vector<16x1xf32>
    %cst_136 = arith.constant 9.99999974E-6 : f32
    %416 = vector.broadcast %cst_136 : f32 to vector<16x1xf32>
    %417 = arith.addf %415, %416 : vector<16x1xf32>
    %418 = math.rsqrt %417 : vector<16x1xf32>
    %419 = vector.broadcast %418 : vector<16x1xf32> to vector<16x256xf32>
    %420 = arith.mulf %410, %419 : vector<16x256xf32>
    %cst_137 = arith.constant 0.000000e+00 : f32
    %421 = vector.broadcast %cst_137 : f32 to vector<16x256xf32>
    %422 = arith.maximumf %420, %421 : vector<16x256xf32>
    %423 = tpu.concatenate %29, %422, %29 in 1 : vector<16x128xf32>, vector<16x256xf32>, vector<16x128xf32> -> vector<16x512xf32>
    %424 = vector.extract_strided_slice %423 {offsets = [0, 111], sizes = [16, 256], strides = [1, 1]} : vector<16x512xf32> to vector<16x256xf32>
    %425 = arith.mulf %424, %22 : vector<16x256xf32>
    %426 = vector.extract_strided_slice %423 {offsets = [0, 112], sizes = [16, 256], strides = [1, 1]} : vector<16x512xf32> to vector<16x256xf32>
    %427 = vector.extract_strided_slice %423 {offsets = [0, 113], sizes = [16, 256], strides = [1, 1]} : vector<16x512xf32> to vector<16x256xf32>
    %428 = arith.mulf %427, %28 : vector<16x256xf32>
    %429 = vector.extract_strided_slice %423 {offsets = [0, 127], sizes = [16, 256], strides = [1, 1]} : vector<16x512xf32> to vector<16x256xf32>
    %430 = arith.mulf %429, %22 : vector<16x256xf32>
    %431 = vector.extract_strided_slice %423 {offsets = [0, 128], sizes = [16, 256], strides = [1, 1]} : vector<16x512xf32> to vector<16x256xf32>
    %432 = vector.extract_strided_slice %423 {offsets = [0, 129], sizes = [16, 256], strides = [1, 1]} : vector<16x512xf32> to vector<16x256xf32>
    %433 = arith.mulf %432, %28 : vector<16x256xf32>
    %434 = vector.extract_strided_slice %423 {offsets = [0, 143], sizes = [16, 256], strides = [1, 1]} : vector<16x512xf32> to vector<16x256xf32>
    %435 = arith.mulf %434, %22 : vector<16x256xf32>
    %436 = vector.extract_strided_slice %423 {offsets = [0, 144], sizes = [16, 256], strides = [1, 1]} : vector<16x512xf32> to vector<16x256xf32>
    %437 = vector.extract_strided_slice %423 {offsets = [0, 145], sizes = [16, 256], strides = [1, 1]} : vector<16x512xf32> to vector<16x256xf32>
    %438 = arith.mulf %437, %28 : vector<16x256xf32>
    %439 = tpu.concatenate %425, %426, %428, %430, %431, %433, %435, %436, %438 in 0 : vector<16x256xf32>, vector<16x256xf32>, vector<16x256xf32>, vector<16x256xf32>, vector<16x256xf32>, vector<16x256xf32>, vector<16x256xf32>, vector<16x256xf32>, vector<16x256xf32> -> vector<144x256xf32>
    %c5_138 = arith.constant 5 : index
    %c0_139 = arith.constant 0 : index
    %c0_140 = arith.constant 0 : index
    %440 = vector.load %arg4[%c5_138, %c0_139, %c0_140] : memref<6x8x144xf32, #tpu.memory_space<vmem>>, vector<1x8x144xf32>
    %441 = vector.shape_cast %440 : vector<1x8x144xf32> to vector<8x144xf32>
    %cst_141 = arith.constant dense<0.000000e+00> : vector<8x256xf32>
    %442 = tpu.matmul %441, %439, %cst_141 {dimension_numbers = #tpu.dot_dimension_numbers<[1], [0], [0], [1], [0, 0, 1, 1], [], []>} : vector<8x144xf32>, vector<144x256xf32>, vector<8x256xf32> -> vector<8x256xf32>
    %cst_142 = arith.constant dense<0.000000e+00> : vector<8xf32>
    %443 = vector.multi_reduction <add>, %442, %cst_142 [1] : vector<8x256xf32> to vector<8xf32>
    %444 = vector.shape_cast %443 : vector<8xf32> to vector<8x1xf32>
    %cst_143 = arith.constant 2.560000e+02 : f32
    %445 = vector.broadcast %cst_143 : f32 to vector<8x1xf32>
    %446 = arith.divf %444, %445 : vector<8x1xf32>
    %447 = vector.broadcast %446 : vector<8x1xf32> to vector<8x256xf32>
    %448 = arith.subf %442, %447 : vector<8x256xf32>
    %449 = arith.mulf %448, %448 : vector<8x256xf32>
    %cst_144 = arith.constant dense<0.000000e+00> : vector<8xf32>
    %450 = vector.multi_reduction <add>, %449, %cst_144 [1] : vector<8x256xf32> to vector<8xf32>
    %451 = vector.shape_cast %450 : vector<8xf32> to vector<8x1xf32>
    %cst_145 = arith.constant 2.560000e+02 : f32
    %452 = vector.broadcast %cst_145 : f32 to vector<8x1xf32>
    %453 = arith.divf %451, %452 : vector<8x1xf32>
    %cst_146 = arith.constant 9.99999974E-6 : f32
    %454 = vector.broadcast %cst_146 : f32 to vector<8x1xf32>
    %455 = arith.addf %453, %454 : vector<8x1xf32>
    %456 = math.rsqrt %455 : vector<8x1xf32>
    %457 = vector.broadcast %456 : vector<8x1xf32> to vector<8x256xf32>
    %458 = arith.mulf %448, %457 : vector<8x256xf32>
    %cst_147 = arith.constant 0.000000e+00 : f32
    %459 = vector.broadcast %cst_147 : f32 to vector<8x256xf32>
    %460 = arith.maximumf %458, %459 : vector<8x256xf32>
    %461 = tpu.concatenate %339, %399, %460 in 0 : vector<16x256xf32>, vector<8x256xf32>, vector<8x256xf32> -> vector<32x256xf32>
    %c8 = arith.constant 8 : index
    %c0_148 = arith.constant 0 : index
    %c0_149 = arith.constant 0 : index
    %462 = vector.load %arg3[%c8, %c0_148, %c0_149] : memref<10x24x32xf32, #tpu.memory_space<vmem>>, vector<1x24x32xf32>
    %463 = vector.shape_cast %462 : vector<1x24x32xf32> to vector<24x32xf32>
    %cst_150 = arith.constant dense<0.000000e+00> : vector<24x256xf32>
    %464 = tpu.matmul %463, %461, %cst_150 {dimension_numbers = #tpu.dot_dimension_numbers<[1], [0], [0], [1], [0, 0, 1, 1], [], []>} : vector<24x32xf32>, vector<32x256xf32>, vector<24x256xf32> -> vector<24x256xf32>
    %c9 = arith.constant 9 : index
    %c0_151 = arith.constant 0 : index
    %c0_152 = arith.constant 0 : index
    %465 = vector.load %arg3[%c9, %c0_151, %c0_152] : memref<10x24x32xf32, #tpu.memory_space<vmem>>, vector<1x24x32xf32>
    %466 = vector.shape_cast %465 : vector<1x24x32xf32> to vector<24x32xf32>
    %467 = vector.extract_strided_slice %466 {offsets = [0, 0], sizes = [8, 24], strides = [1, 1]} : vector<24x32xf32> to vector<8x24xf32>
    %cst_153 = arith.constant dense<0.000000e+00> : vector<8x256xf32>
    %468 = tpu.matmul %467, %464, %cst_153 {dimension_numbers = #tpu.dot_dimension_numbers<[1], [0], [0], [1], [0, 0, 1, 1], [], []>} : vector<8x24xf32>, vector<24x256xf32>, vector<8x256xf32> -> vector<8x256xf32>
    %cst_154 = arith.constant dense<0.000000e+00> : vector<8xf32>
    %469 = vector.multi_reduction <add>, %468, %cst_154 [1] : vector<8x256xf32> to vector<8xf32>
    %470 = vector.shape_cast %469 : vector<8xf32> to vector<8x1xf32>
    %cst_155 = arith.constant 2.560000e+02 : f32
    %471 = vector.broadcast %cst_155 : f32 to vector<8x1xf32>
    %472 = arith.divf %470, %471 : vector<8x1xf32>
    %473 = vector.broadcast %472 : vector<8x1xf32> to vector<8x256xf32>
    %474 = arith.subf %468, %473 : vector<8x256xf32>
    %475 = arith.mulf %474, %474 : vector<8x256xf32>
    %cst_156 = arith.constant dense<0.000000e+00> : vector<8xf32>
    %476 = vector.multi_reduction <add>, %475, %cst_156 [1] : vector<8x256xf32> to vector<8xf32>
    %477 = vector.shape_cast %476 : vector<8xf32> to vector<8x1xf32>
    %cst_157 = arith.constant 2.560000e+02 : f32
    %478 = vector.broadcast %cst_157 : f32 to vector<8x1xf32>
    %479 = arith.divf %477, %478 : vector<8x1xf32>
    %cst_158 = arith.constant 9.99999974E-6 : f32
    %480 = vector.broadcast %cst_158 : f32 to vector<8x1xf32>
    %481 = arith.addf %479, %480 : vector<8x1xf32>
    %482 = math.rsqrt %481 : vector<8x1xf32>
    %483 = vector.broadcast %482 : vector<8x1xf32> to vector<8x256xf32>
    %484 = arith.mulf %474, %483 : vector<8x256xf32>
    %cst_159 = arith.constant 0.000000e+00 : f32
    %485 = vector.broadcast %cst_159 : f32 to vector<8x256xf32>
    %486 = arith.maximumf %484, %485 : vector<8x256xf32>
    %c0_160 = arith.constant 0 : index
    %c0_161 = arith.constant 0 : index
    %c0_162 = arith.constant 0 : index
    %487 = vector.load %arg5[%c0_160, %c0_161, %c0_162] : memref<1x8x256xf32, #tpu.memory_space<vmem>>, vector<1x8x256xf32>
    %488 = vector.shape_cast %487 : vector<1x8x256xf32> to vector<8x256xf32>
    %489 = vector.shape_cast %486 : vector<8x256xf32> to vector<1x8x256xf32>
    tpu.vector_store %arg5[%c0_160, %c0_161, %c0_162], %489 {strides = array<i32>} : memref<1x8x256xf32, #tpu.memory_space<vmem>>, vector<1x8x256xf32>,
    return
  }
  func.func @transform_0(%arg0: i32) -> (i32, i32, i32) {
    %c0_i32 = arith.constant 0 : i32
    %c0_i32_0 = arith.constant 0 : i32
    %c0_i32_1 = arith.constant 0 : i32
    return %arg0, %c0_i32, %c0_i32_0 : i32, i32, i32
  }
  func.func @transform_1(%arg0: i32) -> (i32, i32) {
    %c0_i32 = arith.constant 0 : i32
    %c0_i32_0 = arith.constant 0 : i32
    %c0_i32_1 = arith.constant 0 : i32
    return %c0_i32, %c0_i32_0 : i32, i32
  }
  func.func @transform_2(%arg0: i32) -> (i32, i32, i32) {
    %c0_i32 = arith.constant 0 : i32
    %c0_i32_0 = arith.constant 0 : i32
    %c0_i32_1 = arith.constant 0 : i32
    %c0_i32_2 = arith.constant 0 : i32
    return %c0_i32, %c0_i32_0, %c0_i32_1 : i32, i32, i32
  }
  func.func @transform_3(%arg0: i32) -> (i32, i32, i32) {
    %c0_i32 = arith.constant 0 : i32
    %c0_i32_0 = arith.constant 0 : i32
    %c0_i32_1 = arith.constant 0 : i32
    %c0_i32_2 = arith.constant 0 : i32
    return %c0_i32, %c0_i32_0, %c0_i32_1 : i32, i32, i32
  }
  func.func @transform_4(%arg0: i32) -> (i32, i32, i32) {
    %c0_i32 = arith.constant 0 : i32
    %c0_i32_0 = arith.constant 0 : i32
    %c0_i32_1 = arith.constant 0 : i32
    return %arg0, %c0_i32, %c0_i32_0 : i32, i32, i32
  }
}

</mosaic_0001>

<bundles_post_ra>
// kernel: _lambda_.1
= control target key start
LH: loop header
LB: loop body
LE: loop exit
PB: predicated region body
PF: predicated region fallthrough
CT: control target
= control target key end

     0   :  { %s5672_s15 = smov 0   ;;  %s7740_s0 = inlined_call_operand.vmem [shape: f32[2,152,256], index: 0, kind: input, shape index: {}]   ;;  %s7741_s1 = inlined_call_operand.vmem [shape: f32[8,152], index: 1, kind: input, shape index: {}]   ;;  %s7742_s2 = inlined_call_operand.vmem [shape: f32[10,24,32], index: 2, kind: input, shape index: {}]   ;;  %s7743_s3 = inlined_call_operand.vmem [shape: f32[6,8,144], index: 3, kind: input, shape index: {}]   ;;  %s7744_s4 = inlined_call_operand.vmem [shape: f32[2,8,256], index: 4, kind: output, shape index: {}]  }
   0x1 LB: > { %s4165_s16 = sadd.s32 4294967295, %s5631_s15   ;;  %p4169_p0 = scmp.ge.s32.totalorder %s5631_s15, 1  ;;  %s5631_s15 = sphi %s5672_s15, %s14_s15  }
   0x2   : > { %p162_p1 = scmp.lt.s32.totalorder %s5631_s15, 3 }
   0x4   : > { %p163_p2 = pnand %p4169_p0, %p162_p1 }
   0x5   : > { %p188_p3 = scmp.lt.s32.totalorder (!%p163_p2), %s4165_s16, 1  ;;  %s5635_s25 = smov (!%p163_p2), 127  }
   0x6   : > { %166 = sbr.rel (%p163_p2) target bundleno = 8639 (0x21bf), region = 36  ;;  %s5636_s30 = smov (!%p163_p2), 17  }
   0x7   : > { %s5637_s5 = smov (!%p163_p2), 15   ;;  %s5638_s6 = smov (!%p163_p2), 113  }
   0x8   : > { %s5639_s7 = smov (!%p163_p2), 112   ;;  %s5640_s8 = smov (!%p163_p2), 94  }
   0x9   : > { %s5641_s9 = smov (!%p163_p2), 111   ;;  %s5642_s10 = smov (!%p163_p2), 1  }
   0xa   : > { %s5643_s11 = smov (!%p163_p2), 126   ;;  %s5644_s12 = smov (!%p163_p2), 95  }
   0xb   : > { %s7776_s16 = smov (!%p188_p3, %s4165_s16), 1  ;;  %v238_v17 = vld [vmem:[%s7741_s1 + $0x8] sm:$0xff]  ;;  %vm7751_vm0 = vcmask 195584   ;;  %v237_v38 = vld [vmem:[%s7741_s1] sm:$0xff]  ;;  %v5633_v47 = vmov 256.0   ;;  %vm397_vm7 = vcmask 64512  }
   0xc   : > { %s4262_s17 = smul.u32 304, %s7776_s16  ;;  %5575 = vrcp.f32 %v5633_v47  ;;  %vm540_vm13 = vcmask 1039360   ;;  %vm510_vm14 = vcmask 908288   ;;  %s5645_s13 = smov 96  }
   0xd   : > { %s5646_s14 = smov 110   ;;  %s4261_s23 = sshll.u32 %s7776_s16, 4 }
   0xe   : > { %s5686_s20 = scalar_lea.vmem %s7740_s0, %s4262_s17  ;;  %s197_s27 = scalar_lea.vmem %s7744_s4, %s4261_s23 }
   0xf   : > { %v270_v0 = vld [vmem:[%s5686_s20 + $0xf8] sm:$0xff]  ;;  %v268_v1 = vld [vmem:[%s5686_s20 + $0xe8] sm:$0xff]  ;;  %v269_v2 = vld [vmem:[%s5686_s20 + $0xf0] sm:$0xff] }
  0x10   : > { %321 = vmatpush.msra.mxu2 %v270_v0  ;;  %v267_v3 = vld [vmem:[%s5686_s20 + $0xe0] sm:$0xff]  ;;  %v266_v4 = vld [vmem:[%s5686_s20 + $0xd8] sm:$0xff]  ;;  %281 = vmatpush.msra.mxu0 %v269_v2  ;;  %v265_v5 = vld [vmem:[%s5686_s20 + $0xd0] sm:$0xff]  ;;  %v198_v0 = vlaneseq }
  0x11   : > { %v264_v6 = vld [vmem:[%s5686_s20 + $0xc8] sm:$0xff]  ;;  %v263_v7 = vld [vmem:[%s5686_s20 + $0xc0] sm:$0xff]  ;;  %v262_v8 = vld [vmem:[%s5686_s20 + $0xb8] sm:$0xff] }
  0x12   : > { %322 = vmatpush.msra.mxu2 %v268_v1  ;;  %282 = vmatpush.msra.mxu0 %v267_v3  ;;  %v261_v9 = vld [vmem:[%s5686_s20 + $0xb0] sm:$0xff]  ;;  %v260_v10 = vld [vmem:[%s5686_s20 + $0xa8] sm:$0xff]  ;;  %v259_v12 = vld [vmem:[%s5686_s20 + $0xa0] sm:$0xff]  ;;  %v5576_v48 = vpop.eup %5575  ;;  %v199_v1 = vand.u32 127, %v198_v0 }
  0x13   : > { %v276_v11 = vld [vmem:[%s5686_s20 + $0x128] sm:$0xff]  ;;  %v274_v13 = vld [vmem:[%s5686_s20 + $0x118] sm:$0xff]  ;;  %v257_v16 = vld [vmem:[%s5686_s20 + $0x90] sm:$0xff]  ;;  %v365_v49 = vmul.f32 256.0, %v5576_v48  ;;  %vm369_vm1 = vweird.f32 %v5576_v48 }
  0x14   : > { %323 = vmatpush.msra.mxu2 %v266_v4  ;;  %283 = vmatpush.msra.mxu0 %v265_v5  ;;  %v258_v14 = vld [vmem:[%s5686_s20 + $0x98] sm:$0xff]  ;;  %v272_v15 = vld [vmem:[%s5686_s20 + $0x108] sm:$0xff]  ;;  %v275_v18 = vld [vmem:[%s5686_s20 + $0x120] sm:$0xff]  ;;  %v200_v2 = vadd.s32 128, %v199_v1  ;;  %v205_v3 = vand.u32 15, %v199_v1 }
  0x15   : > { %354 = vmatpush.msra.mxu3 %v276_v11  ;;  %v256_v19 = vld [vmem:[%s5686_s20 + $0x88] sm:$0xff]  ;;  %314 = vmatpush.msra.mxu1 %v275_v18  ;;  %v273_v20 = vld [vmem:[%s5686_s20 + $0x110] sm:$0xff]  ;;  %v255_v21 = vld [vmem:[%s5686_s20 + $0x80] sm:$0xff]  ;;  %v366_v50 = vsub.f32 1.0, %v365_v49 }
  0x16   : > { %324 = vmatpush.msra.mxu2 %v264_v6  ;;  %284 = vmatpush.msra.mxu0 %v263_v7  ;;  %v254_v22 = vld [vmem:[%s5686_s20 + $0x78] sm:$0xff]  ;;  %v271_v23 = vld [vmem:[%s5686_s20 + $0x100] sm:$0xff]  ;;  %v253_v24 = vld [vmem:[%s5686_s20 + $0x70] sm:$0xff]  ;;  %v212_v4 = vand.u32 15, %v200_v2  ;;  %vm225_vm2 = vcmp.ne.s32.totalorder %v205_v3, 0  ;;  %v5634_v6 = vmov 0.0  }
  0x17   : > { %355 = vmatpush.msra.mxu3 %v274_v13  ;;  %315 = vmatpush.msra.mxu1 %v273_v20  ;;  %v252_v25 = vld [vmem:[%s5686_s20 + $0x68] sm:$0xff]  ;;  %v251_v26 = vld [vmem:[%s5686_s20 + $0x60] sm:$0xff]  ;;  %v250_v27 = vld [vmem:[%s5686_s20 + $0x58] sm:$0xff]  ;;  %v367_v51 = vmul.f32 %v5576_v48, %v366_v50  ;;  %v4173_v7 = vsel %vm225_vm2, 1.0, %v5634_v6  ;;  %vm231_vm8 = vcmp.ne.s32.totalorder %v205_v3, 15  ;;  %vm526_vm2 = vcmask 924672  }
  0x18   : > { %325 = vmatpush.msra.mxu2 %v262_v8  ;;  %285 = vmatpush.msra.mxu0 %v261_v9  ;;  %v249_v28 = vld [vmem:[%s5686_s20 + $0x50] sm:$0xff]  ;;  %v248_v29 = vld [vmem:[%s5686_s20 + $0x48] sm:$0xff]  ;;  %v247_v30 = vld [vmem:[%s5686_s20 + $0x40] sm:$0xff]  ;;  %vm226_vm3 = vcmp.ne.s32.totalorder %v212_v4, 0  ;;  %vm232_vm9 = vcmp.ne.s32.totalorder %v212_v4, 15 }
  0x19   : > { %356 = vmatpush.msra.mxu3 %v272_v15  ;;  %316 = vmatpush.msra.mxu1 %v271_v23  ;;  %v246_v31 = vld [vmem:[%s5686_s20 + $0x38] sm:$0xff]  ;;  %v245_v32 = vld [vmem:[%s5686_s20 + $0x30] sm:$0xff]  ;;  %v244_v33 = vld [vmem:[%s5686_s20 + $0x28] sm:$0xff]  ;;  %v368_v52 = vadd.f32 %v5576_v48, %v367_v51  ;;  %v4174_v9 = vsel %vm226_vm3, 1.0, %v5634_v6  ;;  %v4176_v23 = vsel %vm232_vm9, 1.0, %v5634_v6  ;;  %vm646_vm9 = vcmask 916480  }
  0x1a   : > { %326 = vmatpush.msra.mxu2 %v260_v10  ;;  %286 = vmatpush.msra.mxu0 %v259_v12  ;;  %v243_v34 = vld [vmem:[%s5686_s20 + $0x20] sm:$0xff]  ;;  %v242_v35 = vld [vmem:[%s5686_s20 + $0x18] sm:$0xff]  ;;  %v241_v36 = vld [vmem:[%s5686_s20 + $0x10] sm:$0xff]  ;;  %v4295_v11 = vpack.i.bf16 %v4174_v9, %v4173_v7 }
  0x1b   : > { %4178 = vmatmul.msk.f32.vlgmr.msra.gmra.mxu3 %vm7751_vm0, %v238_v17  ;;  %4177 = vmatmul.msk.f32.vlgmr.msra.gmra.mxu1 %vm7751_vm0, %v238_v17  ;;  %v240_v37 = vld [vmem:[%s5686_s20 + $0x8] sm:$0xff]  ;;  %v239_v39 = vld [vmem:[%s5686_s20] sm:$0xff]  ;;  %v5734_v53 = vsel %vm369_vm1, %v5576_v48, %v368_v52 }
  0x1c   : > { %327 = vmatpush.msra.mxu2 %v258_v14  ;;  %287 = vmatpush.msra.mxu0 %v257_v16  ;;  %v395_v20 = vld [vmem:[%s7742_s2] sm:$0xff] }
  0x1d   : > { %4296 = vrot.lane.b32.xlu2 %v4295_v11, %s5635_s25 }
  0x1e   : > { %328 = vmatpush.msra.mxu2 %v256_v19  ;;  %288 = vmatpush.msra.mxu0 %v255_v21  ;;  %v396_v21 = vld [vmem:[%s7742_s2 + $0x8] sm:$0xff] }
  0x20   : > { %329 = vmatpush.msra.mxu2 %v254_v22  ;;  %289 = vmatpush.msra.mxu0 %v253_v24  ;;  %v4175_v22 = vsel %vm231_vm8, 1.0, %v5634_v6  ;;  %vm626_vm8 = vcmask 1031168  }
  0x21   : > { %v4305_v24 = vpack.i.bf16 %v4176_v23, %v4175_v22 }
  0x22   : > { %330 = vmatpush.msra.mxu2 %v252_v25  ;;  %290 = vmatpush.msra.mxu0 %v251_v26 }
  0x24   : > { %331 = vmatpush.msra.mxu2 %v250_v27  ;;  %291 = vmatpush.msra.mxu0 %v249_v28 }
  0x25   : > { %4306 = vrot.lane.b32.xlu2 %v4305_v24, %s5636_s30 }
  0x26   : > { %332 = vmatpush.msra.mxu2 %v248_v29  ;;  %292 = vmatpush.msra.mxu0 %v247_v30 }
  0x28   : > { %333 = vmatpush.msra.mxu2 %v246_v31  ;;  %293 = vmatpush.msra.mxu0 %v245_v32 }
  0x2a   : > { %334 = vmatpush.msra.mxu2 %v244_v33  ;;  %294 = vmatpush.msra.mxu0 %v243_v34 }
  0x2c   : > { %335 = vmatpush.msra.mxu2 %v242_v35  ;;  %295 = vmatpush.msra.mxu0 %v241_v36 }
  0x2e   : > { %336 = vmatpush.msra.mxu2 %v240_v37  ;;  %296 = vmatpush.msra.mxu0 %v239_v39 }
  0x2f   : > { %337 = vmatmul.f32.vlgmr.msra.gmra.mxu2 %v237_v38  ;;  %297 = vmatmul.f32.vlgmr.msra.gmra.mxu0 %v237_v38 }
  0x77   : > { %v5756_v25 = vpop.permute.xlu2 %4296 }
  0x78   : > { %v4298_v27 = vunpack.i.l.bf16 %v5756_v25 }
  0x7a   : > { %v545_v29 = vmul.f32 0.0, %v4298_v27 }
  0x7f   : > { %v5762_v34 = vpop.permute.xlu2 %4306 }
  0x80   : > { %v4309_v35 = vunpack.i.h.bf16 %v5762_v34 }
  0x82   : > { %v589_v36 = vmul.f32 0.0, %v4309_v35 }
  0x84   : > { %725 = vrot.lane.b32.xlu2 %v589_v36, %s5640_s8 }
  0x98   : > { %v318_v41 = vpop.f32.mrf.mxu1 }
  0x9e   : > { %v358_v42 = vpop.f32.mrf.mxu3 }
  0xac   : > { %v298_v40 = vpop.f32.mrf.mxu0 }
  0xad   : > { %v319_v43 = vadd.f32 %v318_v41, %v298_v40 }
  0xb2   : > { %v338_v44 = vpop.f32.mrf.mxu2 }
  0xb3   : > { %v359_v45 = vadd.f32 %v358_v42, %v338_v44 }
  0xb5   : > { %v361_v46 = vadd.f32 %v359_v45, %v319_v43 }
  0xb7   : > { %362 = vadd.xlane.f32.xlu0 %v361_v46 }
 0x12a   : > { %v363_v54 = vpop.xlane.xlu0 %362 }
 0x12b   : > { %v371_v55 = vmul.f32 %v5734_v53, %v363_v54 }
 0x12d   : > { %v372_v56 = vsub.f32 %v319_v43, %v371_v55  ;;  %v373_v57 = vsub.f32 %v359_v45, %v371_v55 }
 0x12f   : > { %v374_v58 = vmul.f32 %v372_v56, %v372_v56  ;;  %v375_v59 = vmul.f32 %v373_v57, %v373_v57 }
 0x131   : > { %v376_v60 = vadd.f32 %v375_v59, %v374_v58 }
 0x133   : > { %377 = vadd.xlane.f32.xlu0 %v376_v60 }
 0x147   : > { %4286 = vrot.lane.b32.xlu0 %v4295_v11, %s5637_s5 }
 0x14f   : > { %4301 = vrot.lane.b32.xlu0 %v4305_v24, %s5638_s6 }
 0x157   : > { %636 = vrot.lane.b32.xlu0 %v545_v29, %s5639_s7 }
 0x15f   : > { %4311 = vrot.lane.b32.xlu0 %v4295_v11, %s5641_s9 }
 0x167   : > { %597 = vrot.lane.b32.xlu0 %v5634_v6, %s5635_s25 }
 0x1a6   : > { %v378_v61 = vpop.xlane.xlu0 %377 }
 0x1a7   : > { %v379_v62 = vmul.f32 %v378_v61, %v5734_v53 }
 0x1a9   : > { %v380_v63 = vadd.f32 1e-05, %v379_v62 }
 0x1ab   : > { %5577 = vrsqrt.f32 %v380_v63  ;;  %vm387_vm5 = vweird.f32 %v380_v63 }
 0x1b1   : > { %v5578_v5 = vpop.eup %5577 }
 0x1b2   : > { %v382_v8 = vmul.f32 %v5578_v5, %v380_v63  ;;  %vm388_vm4 = vweird.f32 %v5578_v5 }
 0x1b3   : > { %vm389_vm6 = vmor %vm387_vm5, %vm388_vm4  ;;  %vm568_vm4 = vcmask 121856   ;;  %vm554_vm5 = vcmask 7168  }
 0x1b4   : > { %v383_v10 = vmul.f32 %v5578_v5, %v382_v8 }
 0x1b6   : > { %v384_v12 = vmul.f32 0.5, %v383_v10  ;;  %v5793_v10 = vunpack.i.h.bf16 %v5756_v25 }
 0x1b8   : > { %v385_v13 = vsub.f32 1.5, %v384_v12  ;;  %v5807_v22 = vsel %vm540_vm13, %v4298_v27, %v5793_v10 }
 0x1b9   : > { %v5781_v51 = vpop.permute.xlu0 %4286 }
 0x1ba   : > { %v386_v14 = vmul.f32 %v5578_v5, %v385_v13 }
 0x1bc   : > { %v390_v15 = vsel %vm389_vm6, %v5578_v5, %v386_v14  ;;  %vm582_vm6 = vcmask 138240  }
 0x1bd   : > { %v391_v16 = vmul.f32 %v390_v15, %v372_v56  ;;  %v392_v17 = vmul.f32 %v390_v15, %v373_v57  ;;  %v5784_v56 = vpop.permute.xlu2 %725 }
 0x1bf   : > { %v5741_v18 = vmax.f32 %v391_v16, 0.0  ;;  %v5743_v19 = vmax.f32 %v392_v17, 0.0 }
 0x1c1   : > { %419 = vmatpush.msrb.mxu1 %v5741_v18  ;;  %442 = vmatpush.msrb.mxu3 %v5743_v19  ;;  %v4302_v52 = vpop.permute.xlu0 %4301 }
 0x1c2   : > { %4181 = vmatmul.msk.f32.vlgmr.msrb.gmra.mxu3 %vm397_vm7, %v395_v20  ;;  %4179 = vmatmul.msk.f32.vlgmr.msrb.gmra.mxu1 %vm397_vm7, %v395_v20  ;;  %v4303_v54 = vunpack.i.l.bf16 %v4302_v52  ;;  %v5817_v29 = vunpack.i.h.bf16 %v4302_v52 }
 0x1c4   : > { %v531_v55 = vmul.f32 0.0, %v4303_v54 }
 0x1c9   : > { %v5788_v1 = vpop.permute.xlu0 %636 }
 0x1ca   : > { %4182 = vmatmul.msk.f32.gmra.mxu3 %vm397_vm7, %v396_v21  ;;  %4180 = vmatmul.msk.f32.gmra.mxu1 %vm397_vm7, %v396_v21  ;;  %vm711_vm7 = vcmask 777216  }
 0x1d1   : > { %v5790_v9 = vpop.permute.xlu0 %4311 }
 0x1d2   : > { %v5796_v16 = vunpack.i.h.bf16 %v5790_v9  ;;  %v4313_v17 = vunpack.i.l.bf16 %v5790_v9 }
 0x1d4   : > { %v5823_v27 = vsel %vm510_vm14, %v4313_v17, %v5796_v16 }
 0x23f   : > { %v421_v26 = vpop.f32.mrf.mxu1 }
 0x245   : > { %v444_v28 = vpop.f32.mrf.mxu3 }
 0x246   : > { %v450_v33 = vadd.f32 %v444_v28, %v421_v26 }
 0x247   : > { %v424_v30 = vpop.f32.mrf.mxu1 }
 0x24d   : > { %v447_v31 = vpop.f32.mrf.mxu3 }
 0x24e   : > { %v453_v32 = vadd.f32 %v447_v31, %v424_v30 }
 0x250   : > { %454 = vadd.xlane.f32.xlu1 %v453_v32 }
 0x258   : > { %451 = vadd.xlane.f32.xlu1 %v450_v33 }
 0x271   : > { %4291 = vrot.lane.b32.xlu1 %v4305_v24, %s5642_s10 }
 0x279   : > { %616 = vrot.lane.b32.xlu1 %v531_v55, %s5643_s11 }
 0x2c3   : > { %v455_v37 = vpop.xlane.xlu1 %454 }
 0x2c4   : > { %v457_v40 = vmul.f32 %v455_v37, %v5734_v53  ;;  %v5837_v37 = vsel %vm526_vm2, %v4303_v54, %v5817_v29 }
 0x2c6   : > { %v5773_v45 = vsub.f32 %v424_v30, %v457_v40  ;;  %v5775_v46 = vsub.f32 %v447_v31, %v457_v40 }
 0x2c8   : > { %v464_v48 = vmul.f32 %v5773_v45, %v5773_v45  ;;  %v465_v49 = vmul.f32 %v5775_v46, %v5775_v46 }
 0x2ca   : > { %v469_v50 = vadd.f32 %v465_v49, %v464_v48 }
 0x2cb   : > { %v452_v38 = vpop.xlane.xlu1 %451 }
 0x2cc   : > { %v456_v39 = vmul.f32 %v452_v38, %v5734_v53 }
 0x2ce   : > { %v458_v41 = vsub.f32 %v421_v26, %v456_v39  ;;  %v459_v42 = vsub.f32 %v444_v28, %v456_v39 }
 0x2d0   : > { %v462_v43 = vmul.f32 %v458_v41, %v458_v41  ;;  %v463_v44 = vmul.f32 %v459_v42, %v459_v42 }
 0x2d2   : > { %v466_v47 = vadd.f32 %v463_v44, %v462_v43  ;;  %v5849_v43 = vunpack.i.l.bf16 %v5781_v51 }
 0x2d4   : > { %467 = vadd.xlane.f32.xlu2 %v466_v47 }
 0x2dc   : > { %470 = vadd.xlane.f32.xlu2 %v469_v50 }
 0x2e3   : > { %v4292_v49 = vpop.permute.xlu1 %4291 }
 0x2e4   : > { %v4294_v54 = vunpack.i.h.bf16 %v4292_v49  ;;  %v5868_v55 = vunpack.i.l.bf16 %v4292_v49 }
 0x347   : > { %v468_v57 = vpop.xlane.xlu2 %467 }
 0x348   : > { %v472_v58 = vmul.f32 %v468_v57, %v5734_v53 }
 0x34a   : > { %v474_v59 = vadd.f32 1e-05, %v472_v58 }
 0x34c   : > { %5579 = vrsqrt.f32 %v474_v59  ;;  %vm482_vm11 = vweird.f32 %v474_v59 }
 0x34f   : > { %v471_v60 = vpop.xlane.xlu2 %470 }
 0x350   : > { %v473_v61 = vmul.f32 %v471_v60, %v5734_v53 }
 0x352   : > { %v5580_v62 = vpop.eup %5579  ;;  %v475_v63 = vadd.f32 1e-05, %v473_v61  ;;  %v5881_v61 = vunpack.i.l.bf16 %v5762_v34 }
 0x353   : > { %v477_v0 = vmul.f32 %v5580_v62, %v474_v59  ;;  %vm483_vm10 = vweird.f32 %v5580_v62  ;;  %v5875_v59 = vsel %vm554_vm5, %v5868_v55, %v4294_v54 }
 0x354   : > { %5581 = vrsqrt.f32 %v475_v63  ;;  %vm484_vm12 = vmor %vm482_vm11, %vm483_vm10  ;;  %vm492_vm1 = vweird.f32 %v475_v63  ;;  %vm696_vm10 = vcmask 785408   ;;  %vm676_vm11 = vcmask 900096  }
 0x355   : > { %v478_v2 = vmul.f32 %v5580_v62, %v477_v0  ;;  %v5892_v0 = vsel %vm582_vm6, %v5881_v61, %v4309_v35 }
 0x357   : > { %v479_v3 = vmul.f32 0.5, %v478_v2 }
 0x359   : > { %v480_v4 = vsub.f32 1.5, %v479_v3 }
 0x35a   : > { %v5582_v5 = vpop.eup %5581 }
 0x35b   : > { %v481_v7 = vmul.f32 %v5580_v62, %v480_v4  ;;  %v487_v8 = vmul.f32 %v5582_v5, %v475_v63  ;;  %vm493_vm15 = vweird.f32 %v5582_v5 }
 0x35c   : > { %vm494_vm3 = vmor %vm492_vm1, %vm493_vm15  ;;  %vm921_vm15 = vcmask 130048  }
 0x35d   : > { %v485_v11 = vsel %vm484_vm12, %v5580_v62, %v481_v7  ;;  %v488_v12 = vmul.f32 %v5582_v5, %v487_v8  ;;  %vm731_vm12 = vcmask 769024  }
 0x35e   : > { %v496_v13 = vmul.f32 %v485_v11, %v458_v41  ;;  %v497_v14 = vmul.f32 %v485_v11, %v459_v42  ;;  %v4289_v42 = vunpack.i.h.bf16 %v5781_v51 }
 0x35f   : > { %v489_v15 = vmul.f32 0.5, %v488_v12 }
 0x360   : > { %v5799_v20 = vmax.f32 %v496_v13, 0.0  ;;  %v5801_v21 = vmax.f32 %v497_v14, 0.0  ;;  %v5857_v48 = vsel %vm568_vm4, %v5849_v43, %v4289_v42  ;;  %v575_v14 = vmul.f32 0.0, %v4289_v42 }
 0x361   : > { %v490_v23 = vsub.f32 1.5, %v489_v15 }
 0x362   : > { %703 = vrot.lane.b32.xlu2 %v5801_v21, %s5644_s12  ;;  %v4315_v24 = vpack.i.bf16 %v5801_v21, %v5799_v20  ;;  %v546_v26 = vmul.f32 %v5807_v22, %v5799_v20  ;;  %v547_v28 = vmul.f32 %v5793_v10, %v5801_v21  ;;  %v5830_v33 = vmul.f32 %v5823_v27, %v5799_v20 }
 0x363   : > { %v491_v25 = vmul.f32 %v5582_v5, %v490_v23  ;;  %v5834_v36 = vmul.f32 %v5796_v16, %v5801_v21  ;;  %v532_v39 = vmul.f32 %v5837_v37, %v5799_v20  ;;  %v533_v40 = vmul.f32 %v5817_v29, %v5801_v21 }
 0x364   : > { %4316 = vrot.lane.b32.xlu0 %v4315_v24, %s5641_s9  ;;  %v4325_v30 = vpack.i.bf16 %v547_v28, %v546_v26  ;;  %v574_v52 = vmul.f32 %v5857_v48, %v5801_v21  ;;  %v560_v62 = vmul.f32 %v5875_v59, %v5801_v21  ;;  %v559_v63 = vmul.f32 %v5868_v55, %v5799_v20 }
 0x365   : > { %v495_v31 = vsel %vm494_vm3, %v5582_v5, %v491_v25  ;;  %v4505_v41 = vpack.i.bf16 %v5834_v36, %v5830_v33  ;;  %v4330_v47 = vpack.i.bf16 %v533_v40, %v532_v39  ;;  %v587_v3 = vmul.f32 %v5881_v61, %v5799_v20 }
 0x366   : > { %v499_v32 = vmul.f32 %v495_v31, %v5775_v46  ;;  %4326 = vrot.lane.b32.xlu1 %v4325_v30, %s5639_s7  ;;  %v498_v46 = vmul.f32 %v495_v31, %v5773_v45  ;;  %v573_v45 = vmul.f32 %v5849_v43, %v5799_v20  ;;  %v588_v4 = vmul.f32 %v5892_v0, %v5801_v21  ;;  %v5925_v30 = vpop.permute.xlu0 %597 }
 0x367   : > { %v561_v23 = vmul.f32 0.0, %v4294_v54 }
 0x368   : > { %v5839_v38 = vmax.f32 %v499_v32, 0.0  ;;  %v5862_v51 = vmax.f32 %v498_v46, 0.0  ;;  %v4335_v5 = vpack.i.bf16 %v588_v4, %v587_v3  ;;  %v5929_v32 = vpop.permute.xlu1 %616 }
 0x36a   : > { %4321 = vrot.lane.b32.xlu2 %v4315_v24, %s5635_s25  ;;  %v4345_v44 = vpack.i.bf16 %v5799_v20, %v5839_v38  ;;  %v577_v50 = vmul.f32 %v5857_v48, %v5839_v38  ;;  %v4340_v58 = vpack.i.bf16 %v5862_v51, %v5634_v6  ;;  %v563_v60 = vmul.f32 %v5875_v59, %v5839_v38 }
 0x36b   : > { %v4350_v2 = vpack.i.bf16 %v5839_v38, %v5862_v51  ;;  %v534_v34 = vmul.f32 %v5837_v37, %v5862_v51  ;;  %v535_v35 = vmul.f32 %v5817_v29, %v5839_v38  ;;  %v548_v8 = vmul.f32 %v5807_v22, %v5862_v51 }
 0x36c   : > { %4346 = vrot.lane.b32.xlu0 %v4345_v44, %s5644_s12  ;;  %v4365_v57 = vpack.i.bf16 %v573_v45, %v577_v50  ;;  %v4375_v6 = vpack.i.bf16 %v559_v63, %v563_v60  ;;  %v549_v11 = vmul.f32 %v5793_v10, %v5839_v38  ;;  %v576_v13 = vmul.f32 %v5849_v43, %v5862_v51 }
 0x36d   : > { %v4385_v7 = vpack.i.bf16 %v535_v35, %v534_v34  ;;  %v590_v20 = vmul.f32 %v5881_v61, %v5862_v51  ;;  %v591_v21 = vmul.f32 %v5892_v0, %v5839_v38  ;;  %v562_v26 = vmul.f32 %v5868_v55, %v5862_v51 }
 0x36e   : > { %4331 = vrot.lane.b32.xlu1 %v4330_v47, %s5643_s11  ;;  %v4380_v12 = vpack.i.bf16 %v549_v11, %v548_v8  ;;  %v4360_v15 = vpack.i.bf16 %v576_v13, %v575_v14 }
 0x36f   : > { %v4390_v24 = vpack.i.bf16 %v591_v21, %v590_v20  ;;  %v4370_v28 = vpack.i.bf16 %v562_v26, %v561_v23 }
 0x372   : > { %688 = vrot.lane.b32.xlu2 %v574_v52, %s5645_s13 }
 0x374   : > { %4366 = vrot.lane.b32.xlu0 %v4365_v57, %s5645_s13 }
 0x376   : > { %4341 = vrot.lane.b32.xlu1 %v4340_v58, %s5644_s12 }
 0x37a   : > { %668 = vrot.lane.b32.xlu2 %v560_v62, %s5646_s14 }
 0x37c   : > { %4376 = vrot.lane.b32.xlu0 %v4375_v6, %s5646_s14 }
 0x37e   : > { %4351 = vrot.lane.b32.xlu1 %v4350_v2, %s5641_s9 }
 0x382   : > { %4336 = vrot.lane.b32.xlu2 %v4335_v5, %s5640_s8 }
 0x384   : > { %4386 = vrot.lane.b32.xlu0 %v4385_v7, %s5643_s11 }
 0x386   : > { %4356 = vrot.lane.b32.xlu1 %v4350_v2, %s5635_s25 }
 0x38a   : > { %4381 = vrot.lane.b32.xlu2 %v4380_v12, %s5639_s7 }
 0x38e   : > { %4361 = vrot.lane.b32.xlu1 %v4360_v15, %s5645_s13 }
 0x392   : > { %4391 = vrot.lane.b32.xlu2 %v4390_v24, %s5640_s8 }
 0x396   : > { %4371 = vrot.lane.b32.xlu1 %v4370_v28, %s5646_s14 }
 0x3bc   : > { %v704_v25 = vpop.permute.xlu2 %703 }
 0x3c4   : > { %v5927_v31 = vpop.permute.xlu2 %4321 }
 0x3cc   : > { %v689_v44 = vpop.permute.xlu2 %688 }
 0x3d4   : > { %v5939_v45 = vpop.permute.xlu2 %668 }
 0x3d6   : > { %v4317_v39 = vpop.permute.xlu0 %4316 }
 0x3d7   : > { %v4319_v40 = vunpack.i.h.bf16 %v4317_v39  ;;  %v4318_v42 = vunpack.i.l.bf16 %v4317_v39 }
 0x3d8   : > { %v5931_v46 = vpop.permute.xlu1 %4326 }
 0x3d9   : > { %v659_v47 = vsel %vm510_vm14, %v4318_v42, %v4319_v40  ;;  %v4328_v13 = vunpack.i.l.bf16 %v5931_v46 }
 0x3da   : > { %v4400_v49 = vpack.i.bf16 %v4319_v40, %v659_v47 }
 0x3db   : > { %v647_v24 = vsel %vm646_vm9, %v5788_v1, %v4328_v13 }
 0x3dc   : > { %4401 = vrot.lane.b32.xlu1 %v4400_v49, %s5636_s30  ;;  %v5952_v6 = vpop.permute.xlu2 %4336 }
 0x3de   : > { %v5935_v50 = vpop.permute.xlu0 %4346 }
 0x3df   : > { %v4349_v54 = vunpack.i.h.bf16 %v5935_v50 }
 0x3e0   : > { %v5937_v52 = vpop.permute.xlu1 %4331 }
 0x3e1   : > { %v712_v62 = vsel %vm711_vm7, %v4349_v54, %v704_v25  ;;  %v4334_v3 = vunpack.i.h.bf16 %v5937_v52  ;;  %v4333_v4 = vunpack.i.l.bf16 %v5937_v52 }
 0x3e3   : > { %v628_v7 = vsel %vm626_vm8, %v4333_v4, %v4334_v3 }
 0x3e4   : > { %v4420_v12 = vpack.i.bf16 %v4334_v3, %v628_v7  ;;  %v5965_v14 = vpop.permute.xlu2 %4381 }
 0x3e5   : > { %v4384_v21 = vunpack.i.h.bf16 %v5965_v14 }
 0x3e6   : > { %v4367_v57 = vpop.permute.xlu0 %4366 }
 0x3e7   : > { %v4369_v35 = vunpack.i.h.bf16 %v4367_v57 }
 0x3e8   : > { %v5942_v58 = vpop.permute.xlu1 %4341 }
 0x3e9   : > { %v5945_v60 = vunpack.i.l.bf16 %v5942_v58  ;;  %v697_v7 = vsel %vm696_vm10, %v4369_v35, %v689_v44 }
 0x3eb   : > { %v713_v63 = vsel %vm711_vm7, %v704_v25, %v5945_v60 }
 0x3ec   : > { %v4395_v2 = vpack.i.bf16 %v713_v63, %v712_v62 }
 0x3ee   : > { %4396 = vrot.lane.b32.xlu0 %v4395_v2, %s5636_s30  ;;  %v4377_v8 = vpop.permute.xlu0 %4376 }
 0x3ef   : > { %v4379_v15 = vunpack.i.h.bf16 %v4377_v8 }
 0x3f0   : > { %v5957_v34 = vpop.permute.xlu1 %4351 }
 0x3f1   : > { %v4354_v5 = vunpack.i.h.bf16 %v5957_v34  ;;  %v4450_v26 = vpack.i.bf16 %v4379_v15, %v4384_v21  ;;  %v4353_v39 = vunpack.i.l.bf16 %v5957_v34  ;;  %v4368_v34 = vunpack.i.l.bf16 %v4367_v57 }
 0x3f3   : > { %v4425_v11 = vpack.i.bf16 %v4369_v35, %v4354_v5  ;;  %v660_v63 = vsel %vm510_vm14, %v4353_v39, %v4354_v5  ;;  %v4378_v5 = vunpack.i.l.bf16 %v4377_v8 }
 0x3f5   : > { %4426 = vrot.lane.b32.xlu2 %v4425_v11, %s5636_s30 }
 0x3f6   : > { %4421 = vrot.lane.b32.xlu0 %v4420_v12, %s5636_s30  ;;  %v5976_v25 = vpop.permute.xlu0 %4386 }
 0x3f7   : > { %v4389_v40 = vunpack.i.h.bf16 %v5976_v25 }
 0x3f8   : > { %v5968_v20 = vpop.permute.xlu1 %4356 }
 0x3f9   : > { %v4359_v23 = vunpack.i.h.bf16 %v5968_v20  ;;  %v4455_v2 = vpack.i.bf16 %v4318_v42, %v4389_v40 }
 0x3fb   : > { %v4430_v28 = vpack.i.bf16 %v647_v24, %v4359_v23 }
 0x3fd   : > { %4451 = vrot.lane.b32.xlu2 %v4450_v26, %s5636_s30 }
 0x3fe   : > { %4431 = vrot.lane.b32.xlu0 %v4430_v28, %s5636_s30 }
 0x400   : > { %v4362_v47 = vpop.permute.xlu1 %4361 }
 0x401   : > { %v4364_v49 = vunpack.i.h.bf16 %v4362_v47  ;;  %v5982_v62 = vunpack.i.l.bf16 %v4362_v47 }
 0x403   : > { %v4445_v3 = vpack.i.bf16 %v660_v63, %v4364_v49  ;;  %v698_v11 = vsel %vm696_vm10, %v689_v44, %v5982_v62  ;;  %v699_v26 = vsel %vm696_vm10, %v4364_v49, %v4368_v34  ;;  %v700_v42 = vsel %vm696_vm10, %v4368_v34, %v5982_v62 }
 0x404   : > { %v4405_v12 = vpack.i.bf16 %v698_v11, %v697_v7  ;;  %v4344_v44 = vunpack.i.h.bf16 %v5942_v58  ;;  %v4460_v47 = vpack.i.bf16 %v700_v42, %v699_v26  ;;  %v677_v63 = vsel %vm676_vm11, %v4379_v15, %v5939_v45 }
 0x405   : > { %4456 = vrot.lane.b32.xlu2 %v4455_v2, %s5636_s30  ;;  %v4329_v7 = vunpack.i.h.bf16 %v5931_v46  ;;  %v4383_v58 = vunpack.i.l.bf16 %v5965_v14  ;;  %v4324_v46 = vunpack.i.h.bf16 %v5927_v31  ;;  %v4388_v26 = vunpack.i.l.bf16 %v5976_v25 }
 0x406   : > { %4446 = vrot.lane.b32.xlu0 %v4445_v3, %s5636_s30  ;;  %4406 = vrot.lane.b32.xlu1 %v4405_v12, %s5636_s30  ;;  %v4323_v12 = vunpack.i.l.bf16 %v5927_v31 }
 0x407   : > { %v648_v15 = vsel %vm646_vm9, %v4328_v13, %v4329_v7  ;;  %v650_v11 = vsel %vm646_vm9, %v4383_v58, %v4384_v21  ;;  %v4348_v13 = vunpack.i.l.bf16 %v5935_v50  ;;  %v630_v31 = vsel %vm626_vm8, %v4388_v26, %v4389_v40 }
 0x408   : > { %v4372_v24 = vpop.permute.xlu1 %4371  ;;  %v4415_v34 = vpack.i.bf16 %v4329_v7, %v648_v15  ;;  %v4485_v25 = vpack.i.bf16 %v630_v31, %v4353_v39  ;;  %v4339_v50 = vunpack.i.h.bf16 %v5952_v6  ;;  %v627_v39 = vsel %vm626_vm8, %v5929_v32, %v4333_v4 }
 0x409   : > { %v4374_v35 = vunpack.i.h.bf16 %v4372_v24  ;;  %v5994_v28 = vunpack.i.l.bf16 %v4372_v24  ;;  %v714_v14 = vsel %vm711_vm7, %v4344_v44, %v4348_v13  ;;  %v715_v21 = vsel %vm711_vm7, %v4348_v13, %v5945_v60 }
 0x40a   : > { %v518_v15 = vmul.f32 %v5823_v27, %v5862_v51  ;;  %v733_v9 = vsel %vm731_vm12, %v4339_v50, %v5784_v56  ;;  %v607_v36 = vsel %vm540_vm13, %v5925_v30, %v4323_v12 }
 0x40b   : > { %v679_v57 = vsel %vm676_vm11, %v4374_v35, %v4378_v5  ;;  %v678_v49 = vsel %vm676_vm11, %v5939_v45, %v5994_v28  ;;  %v680_v8 = vsel %vm676_vm11, %v4378_v5, %v5994_v28  ;;  %v4480_v24 = vpack.i.bf16 %v650_v11, %v4374_v35 }
 0x40c   : > { %v4465_v2 = vpack.i.bf16 %v679_v57, %v4344_v44  ;;  %v4410_v3 = vpack.i.bf16 %v678_v49, %v677_v63  ;;  %v4470_v45 = vpack.i.bf16 %v4349_v54, %v680_v8  ;;  %v608_v54 = vsel %vm540_vm13, %v4323_v12, %v4324_v46  ;;  %v4392_v57 = vpop.permute.xlu2 %4391 }
 0x40d   : > { %4461 = vrot.lane.b32.xlu2 %v4460_v47, %s5636_s30  ;;  %v4475_v42 = vpack.i.bf16 %v4324_v46, %v608_v54  ;;  %v4435_v5 = vpack.i.bf16 %v715_v21, %v714_v14  ;;  %v4358_v35 = vunpack.i.l.bf16 %v5968_v20  ;;  %v4338_v44 = vunpack.i.l.bf16 %v5952_v6 }
 0x40e   : > { %4466 = vrot.lane.b32.xlu0 %v4465_v2, %s5636_s30  ;;  %4411 = vrot.lane.b32.xlu1 %v4410_v3, %s5636_s30  ;;  %v649_v47 = vsel %vm646_vm9, %v5788_v1, %v4383_v58  ;;  %v519_v63 = vmul.f32 %v5796_v16, %v5839_v38  ;;  %v4394_v7 = vunpack.i.h.bf16 %v4392_v57  ;;  %v4393_v58 = vunpack.i.l.bf16 %v4392_v57 }
 0x40f   : > { %v610_v40 = vsel %vm540_vm13, %v4358_v35, %v4359_v23  ;;  %v4500_v49 = vpack.i.bf16 %v4338_v44, %v649_v47  ;;  %v732_v6 = vsel %vm731_vm12, %v4338_v44, %v4339_v50  ;;  %v515_v38 = vmul.f32 0.0, %v4313_v17 }
 0x410   : > { %v4490_v2 = vpack.i.bf16 %v627_v39, %v519_v63  ;;  %v4440_v3 = vpack.i.bf16 %v610_v40, %v732_v6  ;;  %v735_v52 = vsel %vm731_vm12, %v4394_v7, %v5784_v56  ;;  %v734_v4 = vsel %vm731_vm12, %v4393_v58, %v4394_v7 }
 0x411   : > { %v4520_v20 = vpack.i.bf16 %v735_v52, %v515_v38  ;;  %v4495_v23 = vpack.i.bf16 %v734_v4, %v4393_v58  ;;  %v629_v8 = vsel %vm626_vm8, %v5929_v32, %v4388_v26  ;;  %v609_v33 = vsel %vm540_vm13, %v5925_v30, %v4358_v35 }
 0x412   : > { %v4510_v17 = vpack.i.bf16 %v518_v15, %v629_v8 }
 0x415   : > { %4471 = vrot.lane.b32.xlu2 %v4470_v45, %s5636_s30 }
 0x416   : > { %4416 = vrot.lane.b32.xlu1 %v4415_v34, %s5636_s30  ;;  %4481 = vrot.lane.b32.xlu0 %v4480_v24, %s5636_s30 }
 0x41d   : > { %4476 = vrot.lane.b32.xlu2 %v4475_v42, %s5636_s30 }
 0x41e   : > { %4436 = vrot.lane.b32.xlu1 %v4435_v5, %s5636_s30  ;;  %4486 = vrot.lane.b32.xlu0 %v4485_v25, %s5636_s30 }
 0x425   : > { %4501 = vrot.lane.b32.xlu2 %v4500_v49, %s5636_s30 }
 0x426   : > { %4491 = vrot.lane.b32.xlu0 %v4490_v2, %s5636_s30  ;;  %4441 = vrot.lane.b32.xlu1 %v4440_v3, %s5636_s30 }
 0x42d   : > { %4506 = vrot.lane.b32.xlu2 %v4505_v41, %s5636_s30  ;;  %v4515_v41 = vpack.i.bf16 %v607_v36, %v609_v33 }
 0x42e   : > { %4521 = vrot.lane.b32.xlu0 %v4520_v20, %s5636_s30  ;;  %4496 = vrot.lane.b32.xlu1 %v4495_v23, %s5636_s30 }
 0x435   : > { %841 = vrot.lane.b32.xlu2 %v733_v9, %s5636_s30 }
 0x436   : > { %4511 = vrot.lane.b32.xlu1 %v4510_v17, %s5636_s30 }
 0x43e   : > { %4516 = vrot.lane.b32.xlu1 %v4515_v41, %s5636_s30 }
 0x44e   : > { %v6081_v24 = vpop.permute.xlu1 %4401 }
 0x44f   : > { %v6071_v45 = vpop.permute.xlu2 %4426 }
 0x450   : > { %v4429_v7 = vunpack.i.h.bf16 %v6071_v45 }
 0x457   : > { %v6073_v51 = vpop.permute.xlu2 %4451 }
 0x458   : > { %v4454_v15 = vunpack.i.h.bf16 %v6073_v51 }
 0x45f   : > { %v6079_v34 = vpop.permute.xlu2 %4456 }
 0x460   : > { %v6075_v11 = vpop.permute.xlu0 %4396  ;;  %v4459_v36 = vunpack.i.h.bf16 %v6079_v34 }
 0x461   : > { %v4398_v57 = vunpack.i.l.bf16 %v6075_v11 }
 0x467   : > { %v6085_v13 = vpop.permute.xlu2 %4461 }
 0x468   : > { %v6077_v46 = vpop.permute.xlu0 %4421  ;;  %v7750_v6 = vunpack.i.l.bf16 %v6085_v13 }
 0x46f   : > { %v6091_v14 = vpop.permute.xlu2 %4471 }
 0x470   : > { %v6083_v26 = vpop.permute.xlu0 %4431  ;;  %v4474_v44 = vunpack.i.h.bf16 %v6091_v14 }
 0x472   : > { %v877_v3 = vsel %vm582_vm6, %v4474_v44, %v4398_v57 }
 0x477   : > { %v6097_v42 = vpop.permute.xlu2 %4476 }
 0x478   : > { %v6087_v12 = vpop.permute.xlu0 %4446  ;;  %v6089_v54 = vpop.permute.xlu1 %4406 }
 0x479   : > { %v4448_v63 = vunpack.i.l.bf16 %v6087_v12  ;;  %v7748_v2 = vunpack.i.l.bf16 %v6089_v54  ;;  %v7747_v41 = vunpack.i.h.bf16 %v6087_v12 }
 0x47b   : > { %v875_v52 = vsel %vm582_vm6, %v4448_v63, %v7750_v6  ;;  %v873_v8 = vsel %vm582_vm6, %v4429_v7, %v7748_v2 }
 0x47f   : > { %v4502_v47 = vpop.permute.xlu2 %4501 }
 0x480   : > { %v6093_v21 = vpop.permute.xlu0 %4466  ;;  %v6095_v31 = vpop.permute.xlu1 %4411 }
 0x481   : > { %v4468_v39 = vunpack.i.l.bf16 %v6093_v21  ;;  %v7746_v20 = vunpack.i.h.bf16 %v6093_v21  ;;  %v7745_v23 = vunpack.i.l.bf16 %v6095_v31 }
 0x483   : > { %v869_v44 = vsel %vm582_vm6, %v4454_v15, %v7745_v23 }
 0x487   : > { %v6133_v9 = vpop.permute.xlu2 %4506 }
 0x488   : > { %v6099_v5 = vpop.permute.xlu1 %4416  ;;  %v6101_v25 = vpop.permute.xlu0 %4481 }
 0x489   : > { %v4483_v58 = vunpack.i.l.bf16 %v6101_v25  ;;  %v4484_v63 = vunpack.i.h.bf16 %v6101_v25  ;;  %v4418_v7 = vunpack.i.l.bf16 %v6099_v5  ;;  %v736_v25 = vld [vmem:[%s7743_s3] sm:$0xff] }
 0x48b   : > { %v871_v33 = vsel %vm582_vm6, %v4483_v58, %v7746_v20  ;;  %v4434_v20 = vunpack.i.h.bf16 %v6083_v26 }
 0x48f   : > { %v842_v6 = vpop.permute.xlu2 %841 }
 0x490   : > { %v6103_v35 = vpop.permute.xlu1 %4436  ;;  %v6105_v50 = vpop.permute.xlu0 %4486 }
 0x491   : > { %v4438_v40 = vunpack.i.l.bf16 %v6103_v35  ;;  %v4488_v17 = vunpack.i.l.bf16 %v6105_v50 }
 0x493   : > { %v879_v49 = vsel %vm582_vm6, %v4468_v39, %v4438_v40  ;;  %v7749_v39 = vunpack.i.l.bf16 %v6081_v24 }
 0x494   : > { %925 = vmatpush.msra.mxu1 %v879_v49  ;;  %v867_v49 = vsel %vm582_vm6, %v4488_v17, %v7747_v41  ;;  %v4439_v17 = vunpack.i.h.bf16 %v6103_v35  ;;  %v4504_v41 = vunpack.i.h.bf16 %v4502_v47  ;;  %v861_v35 = vsel %vm582_vm6, %v4434_v20, %v4418_v7 }
 0x496   : > { %926 = vmatpush.msra.mxu1 %v877_v3  ;;  %v4503_v3 = vunpack.i.l.bf16 %v4502_v47 }
 0x498   : > { %927 = vmatpush.msra.mxu1 %v875_v52  ;;  %v6123_v4 = vpop.permute.xlu0 %4491  ;;  %v6125_v38 = vpop.permute.xlu1 %4441 }
 0x499   : > { %v4443_v15 = vunpack.i.l.bf16 %v6125_v38 }
 0x49a   : > { %928 = vmatpush.msra.mxu1 %v873_v8  ;;  %v865_v8 = vsel %vm582_vm6, %v4459_v36, %v7749_v39  ;;  %v4399_v39 = vunpack.i.h.bf16 %v6075_v11 }
 0x49b   : > { %v881_v47 = vsel %vm582_vm6, %v4504_v41, %v4443_v15 }
 0x49c   : > { %929 = vmatpush.msra.mxu1 %v871_v33  ;;  %v878_v41 = vsel %vm582_vm6, %v4398_v57, %v4399_v39  ;;  %v4473_v57 = vunpack.i.l.bf16 %v6091_v14  ;;  %v4414_v39 = vunpack.i.h.bf16 %v6095_v31  ;;  %v4428_v14 = vunpack.i.l.bf16 %v6071_v45 }
 0x49e   : > { %930 = vmatpush.msra.mxu1 %v869_v44 }
 0x4a0   : > { %v6150_v58 = vpop.permute.xlu0 %4521  ;;  %931 = vmatpush.msra.mxu1 %v867_v49  ;;  %v4497_v52 = vpop.permute.xlu1 %4496  ;;  %v863_v49 = vsel %vm582_vm6, %v4503_v3, %v4484_v63  ;;  %v737_v3 = vld [vmem:[%s7743_s3 + $0x8] sm:$0xff] }
 0x4a1   : > { %v4524_v33 = vunpack.i.h.bf16 %v6150_v58  ;;  %v4499_v44 = vunpack.i.h.bf16 %v4497_v52  ;;  %v4498_v23 = vunpack.i.l.bf16 %v4497_v52  ;;  %v882_v52 = vsel %vm582_vm6, %v4443_v15, %v842_v6 }
 0x4a2   : > { %932 = vmatpush.msra.mxu1 %v865_v8  ;;  %v4409_v8 = vunpack.i.h.bf16 %v6089_v54  ;;  %v4494_v6 = vunpack.i.h.bf16 %v6123_v4  ;;  %v7753_v15 = vunpack.i.l.bf16 %v6085_v13 }
 0x4a3   : > { %v883_v2 = vsel %vm582_vm6, %v4498_v23, %v4499_v44  ;;  %v884_v36 = vsel %vm582_vm6, %v4499_v44, %v4524_v33  ;;  %v4464_v23 = vunpack.i.h.bf16 %v6085_v13  ;;  %v4489_v33 = vunpack.i.h.bf16 %v6105_v50 }
 0x4a4   : > { %933 = vmatpush.msra.mxu1 %v863_v49  ;;  %959 = vmatpush.msra.mxu3 %v883_v2  ;;  %v880_v2 = vsel %vm582_vm6, %v4438_v40, %v4439_v17  ;;  %v4423_v17 = vunpack.i.l.bf16 %v6077_v46  ;;  %v7754_v50 = vunpack.i.l.bf16 %v6089_v54  ;;  %v7755_v13 = vunpack.i.h.bf16 %v6093_v21 }
 0x4a5   : > { %999 = vmatpush.msrb.mxu0 %v884_v36  ;;  %v876_v44 = vsel %vm582_vm6, %v7753_v15, %v4464_v23  ;;  %v7756_v23 = vunpack.i.l.bf16 %v6095_v31  ;;  %v4453_v31 = vunpack.i.l.bf16 %v6073_v51  ;;  %v4419_v15 = vunpack.i.h.bf16 %v6099_v5 }
 0x4a6   : > { %934 = vmatpush.msra.mxu1 %v861_v35  ;;  %960 = vmatpush.msra.mxu3 %v881_v47  ;;  %v874_v49 = vsel %vm582_vm6, %v7754_v50, %v4409_v8  ;;  %v857_v36 = vsel %vm582_vm6, %v4494_v6, %v4423_v17  ;;  %v872_v35 = vsel %vm582_vm6, %v7755_v13, %v4473_v57  ;;  %v4404_v47 = vunpack.i.h.bf16 %v6081_v24 }
 0x4a7   : > { %1000 = vmatpush.msrb.mxu0 %v882_v52  ;;  %4183 = vmatmul.msk.f32.vlgmr.msra.gmra.mxu3 %vm921_vm15, %v737_v3  ;;  %v870_v54 = vsel %vm582_vm6, %v7756_v23, %v4414_v39  ;;  %v4444_v52 = vunpack.i.h.bf16 %v6125_v38  ;;  %v4478_v6 = vunpack.i.l.bf16 %v6097_v42  ;;  %v7758_v38 = vunpack.i.l.bf16 %v6081_v24 }
 0x4a8   : > { %965 = vmatpush.msrb.mxu3 %v880_v2  ;;  %v6176_v20 = vpop.permute.xlu1 %4511  ;;  %4184 = vmatmul.msk.f32.vlgmr.msrb.gmra.mxu0 %vm921_vm15, %v737_v3  ;;  %v4508_v51 = vunpack.i.l.bf16 %v6133_v9  ;;  %v4458_v24 = vunpack.i.l.bf16 %v6079_v34  ;;  %v4424_v39 = vunpack.i.h.bf16 %v6077_v46  ;;  %v4433_v46 = vunpack.i.l.bf16 %v6083_v26 }
 0x4a9   : > { %v4513_v40 = vunpack.i.l.bf16 %v6176_v20  ;;  %v4479_v34 = vunpack.i.h.bf16 %v6097_v42 }
 0x4aa   : > { %966 = vmatpush.msrb.mxu3 %v878_v41  ;;  %v7757_v41 = vunpack.i.h.bf16 %v6087_v12  ;;  %v6218_v12 = vunpack.i.l.bf16 %v6150_v58  ;;  %v862_v58 = vsel %vm582_vm6, %v4418_v7, %v4419_v15  ;;  %v860_v50 = vsel %vm582_vm6, %v4489_v33, %v4458_v24 }
 0x4ab   : > { %v859_v11 = vsel %vm582_vm6, %v4513_v40, %v4489_v33  ;;  %v4514_v40 = vunpack.i.h.bf16 %v6176_v20  ;;  %v864_v20 = vsel %vm582_vm6, %v4484_v63, %v4453_v31  ;;  %v858_v5 = vsel %vm582_vm6, %v4423_v17, %v4424_v39 }
 0x4ac   : > { %967 = vmatpush.msrb.mxu3 %v876_v44  ;;  %935 = vmatpush.msra.mxu1 %v859_v11  ;;  %v868_v21 = vsel %vm582_vm6, %v7757_v41, %v4428_v14  ;;  %v866_v44 = vsel %vm582_vm6, %v7758_v38, %v4404_v47  ;;  %v849_v63 = vsel %vm582_vm6, %v6218_v12, %v4508_v51 }
 0x4ad   : > { %v851_v57 = vsel %vm582_vm6, %v6218_v12, %v4514_v40  ;;  %v856_v7 = vsel %vm582_vm6, %v4444_v52, %v4433_v46  ;;  %v854_v13 = vsel %vm582_vm6, %v4478_v6, %v4479_v34 }
 0x4ae   : > { %968 = vmatpush.msrb.mxu3 %v874_v49  ;;  %936 = vmatpush.msra.mxu1 %v857_v36  ;;  %v4509_v49 = vunpack.i.h.bf16 %v6133_v9  ;;  %v4493_v36 = vunpack.i.l.bf16 %v6123_v4 }
 0x4b0   : > { %969 = vmatpush.msrb.mxu3 %v872_v35  ;;  %v4517_v3 = vpop.permute.xlu1 %4516  ;;  %v852_v33 = vsel %vm582_vm6, %v4514_v40, %v4493_v36  ;;  %v850_v26 = vsel %vm582_vm6, %v4508_v51, %v4509_v49 }
 0x4b1   : > { %v4519_v2 = vunpack.i.h.bf16 %v4517_v3  ;;  %v4518_v8 = vunpack.i.l.bf16 %v4517_v3 }
 0x4b2   : > { %970 = vmatpush.msrb.mxu3 %v870_v54 }
 0x4b3   : > { %v855_v45 = vsel %vm582_vm6, %v4518_v8, %v4444_v52  ;;  %v853_v11 = vsel %vm582_vm6, %v4519_v2, %v4478_v6 }
 0x4b4   : > { %971 = vmatpush.msrb.mxu3 %v868_v21  ;;  %937 = vmatpush.msra.mxu1 %v855_v45 }
 0x4b6   : > { %972 = vmatpush.msrb.mxu3 %v866_v44  ;;  %938 = vmatpush.msra.mxu1 %v853_v11 }
 0x4b8   : > { %973 = vmatpush.msrb.mxu3 %v864_v20  ;;  %939 = vmatpush.msra.mxu1 %v851_v57 }
 0x4ba   : > { %974 = vmatpush.msrb.mxu3 %v862_v58  ;;  %940 = vmatpush.msra.mxu1 %v849_v63  ;;  %v4185_v58 = vld [vmem:[%s7742_s2 + $0x18] sm:$0xff] }
 0x4bb   : > { %941 = vmatmul.f32.vlgmr.msra.gmra.mxu1 %v736_v25 }
 0x4bc   : > { %975 = vmatpush.msrb.mxu3 %v860_v50 }
 0x4be   : > { %976 = vmatpush.msrb.mxu3 %v858_v5 }
 0x4c0   : > { %977 = vmatpush.msrb.mxu3 %v856_v7 }
 0x4c2   : > { %978 = vmatpush.msrb.mxu3 %v854_v13 }
 0x4c4   : > { %979 = vmatpush.msrb.mxu3 %v852_v33 }
 0x4c6   : > { %980 = vmatpush.msrb.mxu3 %v850_v26 }
 0x4c7   : > { %981 = vmatmul.f32.vlgmr.msrb.gmra.mxu3 %v736_v25  ;;  %v4186_v25 = vld [vmem:[%s7742_s2 + $0x20] sm:$0xff] }
 0x525   : > { %v1002_v35 = vpop.f32.mrf.mxu0 }
 0x52a   : > { %v962_v42 = vpop.f32.mrf.mxu3 }
 0x538   : > { %v942_v17 = vpop.f32.mrf.mxu1 }
 0x539   : > { %v963_v14 = vadd.f32 %v962_v42, %v942_v17 }
 0x54a   : > { %v982_v47 = vpop.f32.mrf.mxu3 }
 0x54b   : > { %v1003_v3 = vadd.f32 %v1002_v35, %v982_v47 }
 0x54d   : > { %v1005_v23 = vadd.f32 %v1003_v3, %v963_v14 }
 0x54f   : > { %1006 = vadd.xlane.f32.xlu1 %v1005_v23 }
 0x5c2   : > { %v1007_v9 = vpop.xlane.xlu1 %1006 }
 0x5c3   : > { %v1008_v4 = vmul.f32 %v1007_v9, %v5734_v53 }
 0x5c5   : > { %v1009_v54 = vsub.f32 %v963_v14, %v1008_v4  ;;  %v1010_v52 = vsub.f32 %v1003_v3, %v1008_v4 }
 0x5c7   : > { %v1011_v2 = vmul.f32 %v1009_v54, %v1009_v54  ;;  %v1012_v8 = vmul.f32 %v1010_v52, %v1010_v52 }
 0x5c9   : > { %v1013_v41 = vadd.f32 %v1012_v8, %v1011_v2 }
 0x5cb   : > { %1014 = vadd.xlane.f32.xlu0 %v1013_v41 }
 0x63e   : > { %v1015_v21 = vpop.xlane.xlu0 %1014 }
 0x63f   : > { %v1016_v6 = vmul.f32 %v1015_v21, %v5734_v53 }
 0x641   : > { %v1017_v40 = vadd.f32 1e-05, %v1016_v6 }
 0x643   : > { %5583 = vrsqrt.f32 %v1017_v40  ;;  %vm1024_vm2 = vweird.f32 %v1017_v40 }
 0x649   : > { %v5584_v45 = vpop.eup %5583 }
 0x64a   : > { %v1019_v31 = vmul.f32 %v5584_v45, %v1017_v40  ;;  %vm1025_vm1 = vweird.f32 %v5584_v45 }
 0x64b   : > { %vm1026_vm3 = vmor %vm1024_vm2, %vm1025_vm1 }
 0x64c   : > { %v1020_v15 = vmul.f32 %v5584_v45, %v1019_v31 }
 0x64e   : > { %v1021_v38 = vmul.f32 0.5, %v1020_v15 }
 0x650   : > { %v1022_v44 = vsub.f32 1.5, %v1021_v38 }
 0x652   : > { %v1023_v11 = vmul.f32 %v5584_v45, %v1022_v44 }
 0x654   : > { %v1027_v20 = vsel %vm1026_vm3, %v5584_v45, %v1023_v11 }
 0x655   : > { %v6249_v51 = vmul.f32 %v1027_v20, %v1009_v54  ;;  %v6251_v57 = vmul.f32 %v1027_v20, %v1010_v52 }
 0x657   : > { %v1030_v24 = vmax.f32 %v6249_v51, 0.0  ;;  %v1031_v39 = vmax.f32 %v6251_v57, 0.0  ;;  %v4196_v51 = vld [vmem:[%s7742_s2 + $0x38] sm:$0xff] }
 0x659   : > { %1055 = vmatpush.msrb.mxu2 %v1030_v24  ;;  %1078 = vmatpush.msra.mxu0 %v1031_v39 }
 0x65b   : > { %1056 = vmatpush.msrb.mxu2 %v5741_v18  ;;  %1079 = vmatpush.msra.mxu0 %v5743_v19 }
 0x65c   : > { %4187 = vmatmul.msk.f32.vlgmr.msrb.gmra.mxu2 %vm921_vm15, %v4185_v58  ;;  %4189 = vmatmul.msk.f32.vlgmr.msra.gmra.mxu0 %vm921_vm15, %v4185_v58 }
 0x664   : > { %4188 = vmatmul.msk.f32.gmra.mxu2 %vm921_vm15, %v4186_v25  ;;  %4190 = vmatmul.msk.f32.gmra.mxu0 %vm921_vm15, %v4186_v25 }
 0x6d9   : > { %v1081_v63 = vpop.f32.mrf.mxu0 }
 0x6df   : > { %v1058_v50 = vpop.f32.mrf.mxu2 }
 0x6e0   : > { %v1087_v46 = vadd.f32 %v1081_v63, %v1058_v50 }
 0x6e1   : > { %v1084_v34 = vpop.f32.mrf.mxu0 }
 0x6e2   : > { %1088 = vadd.xlane.f32.xlu1 %v1087_v46 }
 0x6e7   : > { %v1061_v5 = vpop.f32.mrf.mxu2 }
 0x6e8   : > { %v1090_v7 = vadd.f32 %v1084_v34, %v1061_v5 }
 0x6ea   : > { %1091 = vadd.xlane.f32.xlu2 %v1090_v7 }
 0x755   : > { %v1089_v49 = vpop.xlane.xlu1 %1088 }
 0x756   : > { %v1093_v36 = vmul.f32 %v1089_v49, %v5734_v53 }
 0x758   : > { %v1095_v13 = vsub.f32 %v1058_v50, %v1093_v36  ;;  %v1096_v33 = vsub.f32 %v1081_v63, %v1093_v36 }
 0x75a   : > { %v1099_v26 = vmul.f32 %v1095_v13, %v1095_v13  ;;  %v1100_v42 = vmul.f32 %v1096_v33, %v1096_v33 }
 0x75c   : > { %v1103_v17 = vadd.f32 %v1100_v42, %v1099_v26 }
 0x75d   : > { %v1092_v35 = vpop.xlane.xlu2 %1091 }
 0x75e   : > { %v1094_v47 = vmul.f32 %v1092_v35, %v5734_v53  ;;  %1104 = vadd.xlane.f32.xlu2 %v1103_v17 }
 0x760   : > { %v1097_v14 = vsub.f32 %v1061_v5, %v1094_v47  ;;  %v1098_v3 = vsub.f32 %v1084_v34, %v1094_v47 }
 0x762   : > { %v1101_v23 = vmul.f32 %v1097_v14, %v1097_v14  ;;  %v1102_v9 = vmul.f32 %v1098_v3, %v1098_v3 }
 0x764   : > { %v1106_v4 = vadd.f32 %v1102_v9, %v1101_v23 }
 0x766   : > { %1107 = vadd.xlane.f32.xlu0 %v1106_v4 }
 0x7d1   : > { %v1105_v54 = vpop.xlane.xlu2 %1104 }
 0x7d2   : > { %v1109_v52 = vmul.f32 %v1105_v54, %v5734_v53 }
 0x7d4   : > { %v1111_v2 = vadd.f32 1e-05, %v1109_v52 }
 0x7d6   : > { %5585 = vrsqrt.f32 %v1111_v2  ;;  %vm1119_vm5 = vweird.f32 %v1111_v2 }
 0x7d9   : > { %v1108_v8 = vpop.xlane.xlu0 %1107 }
 0x7da   : > { %v1110_v41 = vmul.f32 %v1108_v8, %v5734_v53 }
 0x7dc   : > { %v5586_v21 = vpop.eup %5585  ;;  %v1112_v6 = vadd.f32 1e-05, %v1110_v41 }
 0x7dd   : > { %v1114_v40 = vmul.f32 %v5586_v21, %v1111_v2  ;;  %vm1120_vm4 = vweird.f32 %v5586_v21 }
 0x7de   : > { %5587 = vrsqrt.f32 %v1112_v6  ;;  %vm1121_vm1 = vmor %vm1119_vm5, %vm1120_vm4  ;;  %vm1129_vm3 = vweird.f32 %v1112_v6 }
 0x7df   : > { %v1115_v45 = vmul.f32 %v5586_v21, %v1114_v40 }
 0x7e1   : > { %v1116_v31 = vmul.f32 0.5, %v1115_v45 }
 0x7e3   : > { %v1117_v15 = vsub.f32 1.5, %v1116_v31 }
 0x7e4   : > { %v5588_v38 = vpop.eup %5587 }
 0x7e5   : > { %v1118_v44 = vmul.f32 %v5586_v21, %v1117_v15  ;;  %v1124_v11 = vmul.f32 %v5588_v38, %v1112_v6  ;;  %vm1130_vm2 = vweird.f32 %v5588_v38 }
 0x7e6   : > { %vm1131_vm4 = vmor %vm1129_vm3, %vm1130_vm2 }
 0x7e7   : > { %v1122_v20 = vsel %vm1121_vm1, %v5586_v21, %v1118_v44  ;;  %v1125_v58 = vmul.f32 %v5588_v38, %v1124_v11 }
 0x7e8   : > { %v1133_v25 = vmul.f32 %v1122_v20, %v1095_v13  ;;  %v1134_v63 = vmul.f32 %v1122_v20, %v1096_v33 }
 0x7e9   : > { %v1126_v50 = vmul.f32 0.5, %v1125_v58 }
 0x7ea   : > { %v6275_v46 = vmax.f32 %v1133_v25, 0.0  ;;  %v6277_v34 = vmax.f32 %v1134_v63, 0.0 }
 0x7eb   : > { %v1127_v5 = vsub.f32 1.5, %v1126_v50 }
 0x7ec   : > { %v4530_v7 = vpack.i.bf16 %v6277_v34, %v6275_v46  ;;  %v1153_v49 = vmul.f32 %v5868_v55, %v6275_v46  ;;  %v1154_v36 = vmul.f32 %v6277_v34, %v5875_v59  ;;  %v1157_v42 = vmul.f32 %v5849_v43, %v6275_v46 }
 0x7ed   : > { %v1128_v26 = vmul.f32 %v5588_v38, %v1127_v5  ;;  %v1158_v17 = vmul.f32 %v6277_v34, %v5857_v48  ;;  %v1145_v23 = vmul.f32 %v6275_v46, %v5837_v37  ;;  %v1146_v9 = vmul.f32 %v5817_v29, %v6277_v34 }
 0x7ee   : > { %4531 = vrot.lane.b32.xlu1 %v4530_v7, %s5641_s9  ;;  %4526 = vrot.lane.b32.xlu0 %v4530_v7, %s5644_s12  ;;  %v4545_v13 = vpack.i.bf16 %v1154_v36, %v1153_v49  ;;  %v1161_v15 = vmul.f32 %v5881_v61, %v6275_v46 }
 0x7ef   : > { %v1132_v33 = vsel %vm1131_vm4, %v5588_v38, %v1128_v26  ;;  %v4540_v4 = vpack.i.bf16 %v1158_v17, %v1157_v42  ;;  %v4555_v2 = vpack.i.bf16 %v1146_v9, %v1145_v23  ;;  %v1162_v38 = vmul.f32 %v6277_v34, %v5892_v0 }
 0x7f0   : > { %4546 = vrot.lane.b32.xlu2 %v4545_v13, %s5646_s14  ;;  %v1135_v35 = vmul.f32 %v1132_v33, %v1097_v14  ;;  %v1136_v47 = vmul.f32 %v1132_v33, %v1098_v3  ;;  %v1149_v14 = vmul.f32 %v6275_v46, %v5807_v22  ;;  %v1150_v3 = vmul.f32 %v5793_v10, %v6277_v34 }
 0x7f1   : > { %v4560_v58 = vpack.i.bf16 %v1162_v38, %v1161_v15 }
 0x7f2   : > { %v6296_v54 = vmax.f32 %v1135_v35, 0.0  ;;  %v6298_v52 = vmax.f32 %v1136_v47, 0.0  ;;  %v4550_v6 = vpack.i.bf16 %v1150_v3, %v1149_v14 }
 0x7f4   : > { %v1159_v8 = vmul.f32 %v5849_v43, %v6296_v54  ;;  %v1160_v41 = vmul.f32 %v6298_v52, %v5857_v48  ;;  %v4565_v21 = vpack.i.bf16 %v6298_v52, %v6296_v54  ;;  %v1155_v45 = vmul.f32 %v5868_v55, %v6296_v54 }
 0x7f5   : > { %v1156_v31 = vmul.f32 %v6298_v52, %v5875_v59  ;;  %v1151_v44 = vmul.f32 %v6296_v54, %v5807_v22  ;;  %v1152_v11 = vmul.f32 %v5793_v10, %v6298_v52  ;;  %v1147_v63 = vmul.f32 %v6296_v54, %v5837_v37 }
 0x7f6   : > { %4536 = vrot.lane.b32.xlu1 %v4530_v7, %s5635_s25  ;;  %4541 = vrot.lane.b32.xlu0 %v4540_v4, %s5645_s13  ;;  %v4580_v40 = vpack.i.bf16 %v1160_v41, %v1159_v8  ;;  %v1148_v50 = vmul.f32 %v5817_v29, %v6298_v52  ;;  %v1163_v5 = vmul.f32 %v5881_v61, %v6296_v54 }
 0x7f7   : > { %v4585_v20 = vpack.i.bf16 %v1156_v31, %v1155_v45  ;;  %v4590_v25 = vpack.i.bf16 %v1152_v11, %v1151_v44  ;;  %v1164_v7 = vmul.f32 %v6298_v52, %v5892_v0 }
 0x7f8   : > { %4556 = vrot.lane.b32.xlu2 %v4555_v2, %s5643_s11  ;;  %v4595_v49 = vpack.i.bf16 %v1148_v50, %v1147_v63 }
 0x7f9   : > { %v4600_v36 = vpack.i.bf16 %v1164_v7, %v1163_v5 }
 0x7fe   : > { %4566 = vrot.lane.b32.xlu1 %v4565_v21, %s5644_s12  ;;  %4551 = vrot.lane.b32.xlu0 %v4550_v6, %s5639_s7 }
 0x800   : > { %4581 = vrot.lane.b32.xlu2 %v4580_v40, %s5645_s13 }
 0x806   : > { %4586 = vrot.lane.b32.xlu1 %v4585_v20, %s5646_s14  ;;  %4561 = vrot.lane.b32.xlu0 %v4560_v58, %s5640_s8 }
 0x808   : > { %4591 = vrot.lane.b32.xlu2 %v4590_v25, %s5639_s7 }
 0x80e   : > { %4596 = vrot.lane.b32.xlu1 %v4595_v49, %s5643_s11  ;;  %4571 = vrot.lane.b32.xlu0 %v4565_v21, %s5641_s9 }
 0x810   : > { %4601 = vrot.lane.b32.xlu2 %v4600_v36, %s5640_s8 }
 0x816   : > { %4576 = vrot.lane.b32.xlu0 %v4565_v21, %s5635_s25 }
 0x84a   : > { %v6361_v3 = vpop.permute.xlu2 %4546 }
 0x84b   : > { %v4549_v40 = vunpack.i.h.bf16 %v6361_v3  ;;  %v4548_v45 = vunpack.i.l.bf16 %v6361_v3 }
 0x84d   : > { %v1235_v38 = vsel %vm676_vm11, %v4548_v45, %v4549_v40 }
 0x84e   : > { %v4620_v11 = vpack.i.bf16 %v1235_v38, %v4548_v45 }
 0x852   : > { %v6370_v44 = vpop.permute.xlu2 %4556 }
 0x853   : > { %v4558_v38 = vunpack.i.l.bf16 %v6370_v44 }
 0x860   : > { %v6343_v26 = vpop.permute.xlu1 %4531  ;;  %v6345_v13 = vpop.permute.xlu0 %4526 }
 0x861   : > { %v4534_v33 = vunpack.i.h.bf16 %v6343_v26  ;;  %v4533_v42 = vunpack.i.l.bf16 %v6343_v26  ;;  %v4529_v17 = vunpack.i.h.bf16 %v6345_v13  ;;  %v4528_v35 = vunpack.i.l.bf16 %v6345_v13 }
 0x863   : > { %v1221_v47 = vsel %vm510_vm14, %v4533_v42, %v4534_v33  ;;  %v1263_v23 = vsel %vm711_vm7, %v4528_v35, %v4529_v17 }
 0x864   : > { %v4610_v9 = vpack.i.bf16 %v1221_v47, %v4533_v42  ;;  %v4605_v4 = vpack.i.bf16 %v1263_v23, %v4528_v35  ;;  %v4582_v42 = vpop.permute.xlu2 %4581 }
 0x866   : > { %4611 = vrot.lane.b32.xlu1 %v4610_v9, %s5636_s30  ;;  %4606 = vrot.lane.b32.xlu2 %v4605_v4, %s5636_s30 }
 0x868   : > { %v6359_v2 = vpop.permute.xlu1 %4536  ;;  %v4542_v14 = vpop.permute.xlu0 %4541 }
 0x869   : > { %v4544_v8 = vunpack.i.h.bf16 %v4542_v14  ;;  %v4543_v41 = vunpack.i.l.bf16 %v4542_v14 }
 0x86b   : > { %v1251_v21 = vsel %vm696_vm10, %v4543_v41, %v4544_v8 }
 0x86c   : > { %v4615_v6 = vpack.i.bf16 %v1251_v21, %v4543_v41 }
 0x86e   : > { %4616 = vrot.lane.b32.xlu1 %v4615_v6, %s5636_s30  ;;  %v1252_v6 = vsel %vm696_vm10, %v4544_v8, %v5982_v62  ;;  %v1193_v8 = vsel %vm626_vm8, %v5929_v32, %v4558_v38 }
 0x870   : > { %v4567_v31 = vpop.permute.xlu1 %4566  ;;  %v4552_v15 = vpop.permute.xlu0 %4551 }
 0x871   : > { %v4569_v20 = vunpack.i.h.bf16 %v4567_v31  ;;  %v4568_v58 = vunpack.i.l.bf16 %v4567_v31  ;;  %v4554_v35 = vunpack.i.h.bf16 %v4552_v15  ;;  %v4553_v47 = vunpack.i.l.bf16 %v4552_v15 }
 0x872   : > { %v4559_v15 = vunpack.i.h.bf16 %v6370_v44 }
 0x873   : > { %v1265_v5 = vsel %vm711_vm7, %v4568_v58, %v4569_v20  ;;  %v1266_v7 = vsel %vm711_vm7, %v4569_v20, %v5945_v60  ;;  %v1209_v14 = vsel %vm646_vm9, %v5788_v1, %v4553_v47  ;;  %v1210_v41 = vsel %vm646_vm9, %v4553_v47, %v4554_v35 }
 0x874   : > { %v4625_v36 = vpack.i.bf16 %v1265_v5, %v4568_v58  ;;  %v4630_v31 = vpack.i.bf16 %v1210_v41, %v1209_v14  ;;  %v4584_v41 = vunpack.i.h.bf16 %v4582_v42 }
 0x876   : > { %4621 = vrot.lane.b32.xlu1 %v4620_v11, %s5636_s30  ;;  %v4592_v11 = vpop.permute.xlu2 %4591 }
 0x878   : > { %v4587_v25 = vpop.permute.xlu1 %4586  ;;  %v6373_v63 = vpop.permute.xlu0 %4561 }
 0x879   : > { %v4588_v50 = vunpack.i.l.bf16 %v4587_v25 }
 0x87b   : > { %v4655_v49 = vpack.i.bf16 %v4588_v50, %v1266_v7  ;;  %v4594_v7 = vunpack.i.h.bf16 %v4592_v11 }
 0x87d   : > { %4656 = vrot.lane.b32.xlu2 %v4655_v49, %s5636_s30  ;;  %v1194_v49 = vsel %vm626_vm8, %v4558_v38, %v4559_v15 }
 0x87e   : > { %4626 = vrot.lane.b32.xlu1 %v4625_v36, %s5636_s30 }
 0x880   : > { %v6380_v23 = vpop.permute.xlu0 %4571 }
 0x881   : > { %v4574_v9 = vunpack.i.h.bf16 %v6380_v23  ;;  %v4573_v4 = vunpack.i.l.bf16 %v6380_v23 }
 0x883   : > { %v1222_v21 = vsel %vm510_vm14, %v4573_v4, %v4574_v9 }
 0x884   : > { %v4645_v45 = vpack.i.bf16 %v1252_v6, %v1222_v21  ;;  %v4583_v21 = vunpack.i.l.bf16 %v4582_v42  ;;  %v4635_v6 = vpack.i.bf16 %v1194_v49, %v1193_v8  ;;  %v1254_v42 = vsel %vm696_vm10, %v4584_v41, %v5982_v62 }
 0x885   : > { %v4675_v8 = vpack.i.bf16 %v4573_v4, %v1254_v42  ;;  %v1264_v4 = vsel %vm711_vm7, %v4529_v17, %v5945_v60  ;;  %v1236_v17 = vsel %vm676_vm11, %v4549_v40, %v5994_v28 }
 0x886   : > { %4646 = vrot.lane.b32.xlu0 %v4645_v45, %s5636_s30  ;;  %4631 = vrot.lane.b32.xlu1 %v4630_v31, %s5636_s30  ;;  %v4539_v45 = vunpack.i.h.bf16 %v6359_v2  ;;  %v4538_v31 = vunpack.i.l.bf16 %v6359_v2  ;;  %v1253_v38 = vsel %vm696_vm10, %v4583_v21, %v4584_v41  ;;  %v4602_v41 = vpop.permute.xlu2 %4601 }
 0x887   : > { %v4665_v49 = vpack.i.bf16 %v1253_v38, %v4583_v21  ;;  %v4603_v3 = vunpack.i.l.bf16 %v4602_v41 }
 0x888   : > { %v6396_v20 = vpop.permute.xlu0 %4576 }
 0x889   : > { %v4579_v58 = vunpack.i.h.bf16 %v6396_v20  ;;  %v4578_v5 = vunpack.i.l.bf16 %v6396_v20 }
 0x88b   : > { %v1180_v44 = vsel %vm540_vm13, %v4578_v5, %v4579_v58  ;;  %v1179_v36 = vsel %vm540_vm13, %v5925_v30, %v4578_v5  ;;  %v1177_v5 = vsel %vm540_vm13, %v5925_v30, %v4538_v31 }
 0x88c   : > { %v4650_v47 = vpack.i.bf16 %v4554_v35, %v1180_v44  ;;  %v4660_v14 = vpack.i.bf16 %v1179_v36, %v4594_v7  ;;  %v1178_v35 = vsel %vm540_vm13, %v4538_v31, %v4539_v45  ;;  %v4589_v44 = vunpack.i.h.bf16 %v4587_v25  ;;  %v4597_v31 = vpop.permute.xlu1 %4596 }
 0x88d   : > { %v4640_v2 = vpack.i.bf16 %v1178_v35, %v1177_v5  ;;  %v4593_v36 = vunpack.i.l.bf16 %v4592_v11  ;;  %v4598_v38 = vunpack.i.l.bf16 %v4597_v31  ;;  %v4604_v35 = vunpack.i.h.bf16 %v4602_v41 }
 0x88e   : > { %4651 = vrot.lane.b32.xlu0 %v4650_v47, %s5636_s30  ;;  %4661 = vrot.lane.b32.xlu2 %v4660_v14, %s5636_s30  ;;  %v4563_v47 = vunpack.i.l.bf16 %v6373_v63  ;;  %v1238_v14 = vsel %vm676_vm11, %v4589_v44, %v5994_v28 }
 0x88f   : > { %4636 = vrot.lane.b32.xlu1 %v4635_v6, %s5636_s30  ;;  %v1237_v6 = vsel %vm676_vm11, %v4588_v50, %v4589_v44  ;;  %v1211_v25 = vsel %vm646_vm9, %v5788_v1, %v4593_v36  ;;  %v1195_v50 = vsel %vm626_vm8, %v5929_v32, %v4598_v38  ;;  %v1212_v42 = vsel %vm646_vm9, %v4593_v36, %v4594_v7 }
 0x890   : > { %v4680_v11 = vpack.i.bf16 %v1211_v25, %v1238_v14  ;;  %v4670_v21 = vpack.i.bf16 %v1264_v4, %v1237_v6  ;;  %v4700_v5 = vpack.i.bf16 %v4563_v47, %v4559_v15  ;;  %v1282_v13 = vsel %vm731_vm12, %v4604_v35, %v5784_v56 }
 0x891   : > { %v1144_v15 = vmul.f32 %v5796_v16, %v6298_v52  ;;  %v4599_v44 = vunpack.i.h.bf16 %v4597_v31  ;;  %v4564_v52 = vunpack.i.h.bf16 %v6373_v63  ;;  %v1281_v23 = vsel %vm731_vm12, %v4603_v3, %v4604_v35 }
 0x892   : > { %v1143_v14 = vmul.f32 %v6296_v54, %v5823_v27  ;;  %v1141_v6 = vmul.f32 %v6275_v46, %v5823_v27  ;;  %v4720_v63 = vpack.i.bf16 %v4539_v45, %v4579_v58 }
 0x893   : > { %v1196_v7 = vsel %vm626_vm8, %v4598_v38, %v4599_v44  ;;  %v4695_v36 = vpack.i.bf16 %v4603_v3, %v4599_v44  ;;  %v1280_v26 = vsel %vm731_vm12, %v4564_v52, %v5784_v56 }
 0x894   : > { %v4710_v40 = vpack.i.bf16 %v4534_v33, %v1196_v7  ;;  %v4715_v31 = vpack.i.bf16 %v1143_v14, %v1281_v23  ;;  %v1142_v33 = vmul.f32 %v5796_v16, %v6277_v34 }
 0x896   : > { %4676 = vrot.lane.b32.xlu2 %v4675_v8, %s5636_s30  ;;  %4666 = vrot.lane.b32.xlu0 %v4665_v49, %s5636_s30  ;;  %v4690_v8 = vpack.i.bf16 %v1195_v50, %v4574_v9  ;;  %v4685_v49 = vpack.i.bf16 %v1236_v17, %v1212_v42  ;;  %v1279_v9 = vsel %vm731_vm12, %v4563_v47, %v4564_v52 }
 0x897   : > { %4641 = vrot.lane.b32.xlu1 %v4640_v2, %s5636_s30  ;;  %v4725_v2 = vpack.i.bf16 %v1282_v13, %v1144_v15  ;;  %v4705_v41 = vpack.i.bf16 %v1141_v6, %v1279_v9  ;;  %v4730_v47 = vpack.i.bf16 %v1280_v26, %v1142_v33 }
 0x89e   : > { %4681 = vrot.lane.b32.xlu2 %v4680_v11, %s5636_s30  ;;  %4671 = vrot.lane.b32.xlu0 %v4670_v21, %s5636_s30 }
 0x89f   : > { %4701 = vrot.lane.b32.xlu1 %v4700_v5, %s5636_s30 }
 0x8a6   : > { %4691 = vrot.lane.b32.xlu2 %v4690_v8, %s5636_s30  ;;  %4686 = vrot.lane.b32.xlu0 %v4685_v49, %s5636_s30 }
 0x8a7   : > { %4726 = vrot.lane.b32.xlu1 %v4725_v2, %s5636_s30 }
 0x8ae   : > { %4696 = vrot.lane.b32.xlu2 %v4695_v36, %s5636_s30  ;;  %4711 = vrot.lane.b32.xlu0 %v4710_v40, %s5636_s30 }
 0x8b6   : > { %4716 = vrot.lane.b32.xlu0 %v4715_v31, %s5636_s30  ;;  %4706 = vrot.lane.b32.xlu2 %v4705_v41, %s5636_s30 }
 0x8be   : > { %4721 = vrot.lane.b32.xlu0 %v4720_v63, %s5636_s30  ;;  %4731 = vrot.lane.b32.xlu2 %v4730_v47, %s5636_s30 }
 0x8c0   : > { %v4607_v54 = vpop.permute.xlu2 %4606 }
 0x8c1   : > { %v4609_v38 = vunpack.i.h.bf16 %v4607_v54  ;;  %v4608_v34 = vunpack.i.l.bf16 %v4607_v54 }
 0x8c3   : > { %v1422_v42 = vsel %vm582_vm6, %v4608_v34, %v4609_v38 }
 0x8d7   : > { %v4657_v4 = vpop.permute.xlu2 %4656 }
 0x8d8   : > { %v6473_v46 = vpop.permute.xlu1 %4611  ;;  %v4658_v35 = vunpack.i.l.bf16 %v4657_v4  ;;  %v4659_v14 = vunpack.i.h.bf16 %v4657_v4 }
 0x8d9   : > { %v4614_v34 = vunpack.i.h.bf16 %v6473_v46 }
 0x8e0   : > { %v4617_v25 = vpop.permute.xlu1 %4616 }
 0x8e1   : > { %v4619_v2 = vunpack.i.h.bf16 %v4617_v25  ;;  %v4618_v7 = vunpack.i.l.bf16 %v4617_v25 }
 0x8e3   : > { %v1418_v9 = vsel %vm582_vm6, %v4618_v7, %v4619_v2 }
 0x8e8   : > { %v6475_v11 = vpop.permute.xlu1 %4621  ;;  %v6477_v21 = vpop.permute.xlu2 %4661 }
 0x8e9   : > { %v4624_v31 = vunpack.i.h.bf16 %v6475_v11  ;;  %v4623_v41 = vunpack.i.l.bf16 %v6475_v11 }
 0x8eb   : > { %v1414_v11 = vsel %vm582_vm6, %v4623_v41, %v4624_v31 }
 0x8f0   : > { %v4627_v5 = vpop.permute.xlu1 %4626  ;;  %v4677_v13 = vpop.permute.xlu2 %4676 }
 0x8f1   : > { %v4629_v20 = vunpack.i.h.bf16 %v4627_v5  ;;  %v4628_v58 = vunpack.i.l.bf16 %v4627_v5  ;;  %v4678_v63 = vunpack.i.l.bf16 %v4677_v13  ;;  %v4679_v4 = vunpack.i.h.bf16 %v4677_v13 }
 0x8f3   : > { %v1424_v45 = vsel %vm582_vm6, %v4628_v58, %v4629_v20  ;;  %v1425_v50 = vsel %vm582_vm6, %v4629_v20, %v4658_v35  ;;  %v4613_v35 = vunpack.i.l.bf16 %v6473_v46 }
 0x8f4   : > { %1469 = vmatpush.msra.mxu2 %v1424_v45  ;;  %1509 = vmatpush.msrb.mxu0 %v1425_v50 }
 0x8f5   : > { %v1410_v7 = vsel %vm582_vm6, %v4613_v35, %v4614_v34 }
 0x8f6   : > { %1470 = vmatpush.msra.mxu2 %v1422_v42 }
 0x8f8   : > { %v4647_v17 = vpop.permute.xlu0 %4646  ;;  %v6484_v8 = vpop.permute.xlu1 %4631 }
 0x8f9   : > { %v4682_v49 = vpop.permute.xlu2 %4681  ;;  %v4649_v47 = vunpack.i.h.bf16 %v4647_v17  ;;  %v4648_v54 = vunpack.i.l.bf16 %v4647_v17  ;;  %v4634_v46 = vunpack.i.h.bf16 %v6484_v8  ;;  %v4633_v17 = vunpack.i.l.bf16 %v6484_v8 }
 0x8fa   : > { %v4683_v50 = vunpack.i.l.bf16 %v4682_v49  ;;  %v4684_v13 = vunpack.i.h.bf16 %v4682_v49 }
 0x8fb   : > { %v1419_v42 = vsel %vm582_vm6, %v4619_v2, %v4649_v47  ;;  %v1406_v8 = vsel %vm582_vm6, %v4633_v17, %v4634_v46 }
 0x900   : > { %v6482_v15 = vpop.permute.xlu0 %4651 }
 0x901   : > { %v6486_v40 = vpop.permute.xlu2 %4691  ;;  %v6488_v52 = vpop.permute.xlu1 %4636  ;;  %v4654_v35 = vunpack.i.h.bf16 %v6482_v15 }
 0x902   : > { %v4638_v47 = vunpack.i.l.bf16 %v6488_v52 }
 0x903   : > { %v1407_v17 = vsel %vm582_vm6, %v4634_v46, %v4654_v35 }
 0x908   : > { %v4667_v44 = vpop.permute.xlu0 %4666 }
 0x909   : > { %v4669_v3 = vunpack.i.h.bf16 %v4667_v44  ;;  %v4668_v36 = vunpack.i.l.bf16 %v4667_v44  ;;  %v6498_v20 = vpop.permute.xlu2 %4696  ;;  %v6500_v58 = vpop.permute.xlu1 %4641 }
 0x90b   : > { %v1420_v23 = vsel %vm582_vm6, %v4668_v36, %v4669_v3  ;;  %v1421_v45 = vsel %vm582_vm6, %v4669_v3, %v4678_v63  ;;  %v4693_v36 = vunpack.i.l.bf16 %v6486_v40  ;;  %v4639_v63 = vunpack.i.h.bf16 %v6488_v52 }
 0x90c   : > { %1471 = vmatpush.msra.mxu2 %v1420_v23  ;;  %v4664_v52 = vunpack.i.h.bf16 %v6477_v21 }
 0x90d   : > { %v1413_v49 = vsel %vm582_vm6, %v4648_v54, %v4693_v36 }
 0x90e   : > { %1472 = vmatpush.msra.mxu2 %v1418_v9 }
 0x910   : > { %v4672_v6 = vpop.permute.xlu0 %4671 }
 0x911   : > { %v4674_v26 = vunpack.i.h.bf16 %v4672_v6  ;;  %v4673_v33 = vunpack.i.l.bf16 %v4672_v6  ;;  %v4702_v6 = vpop.permute.xlu1 %4701  ;;  %v6515_v41 = vpop.permute.xlu2 %4706 }
 0x912   : > { %v4708_v36 = vunpack.i.l.bf16 %v6515_v41 }
 0x913   : > { %v1416_v25 = vsel %vm582_vm6, %v4659_v14, %v4673_v33  ;;  %v1423_v5 = vsel %vm582_vm6, %v4609_v38, %v4674_v26  ;;  %v1412_v38 = vsel %vm582_vm6, %v4679_v4, %v4648_v54  ;;  %v1417_v9 = vsel %vm582_vm6, %v4673_v33, %v4683_v50 }
 0x914   : > { %1473 = vmatpush.msra.mxu2 %v1416_v25  ;;  %1510 = vmatpush.msrb.mxu0 %v1423_v5  ;;  %v4694_v26 = vunpack.i.h.bf16 %v6486_v40  ;;  %v4663_v5 = vunpack.i.l.bf16 %v6477_v21  ;;  %v4653_v54 = vunpack.i.l.bf16 %v6482_v15  ;;  %v4643_v40 = vunpack.i.l.bf16 %v6500_v58 }
 0x915   : > { %v1402_v50 = vsel %vm582_vm6, %v4638_v47, %v4639_v63  ;;  %v4699_v15 = vunpack.i.h.bf16 %v6498_v20  ;;  %v4192_v47 = vld [vmem:[%s7743_s3 + $0x18] sm:$0xff] }
 0x916   : > { %1474 = vmatpush.msra.mxu2 %v1414_v11  ;;  %1511 = vmatpush.msrb.mxu0 %v1421_v45  ;;  %v4644_v45 = vunpack.i.h.bf16 %v6500_v58  ;;  %v4703_v58 = vunpack.i.l.bf16 %v4702_v6 }
 0x918   : > { %v4687_v44 = vpop.permute.xlu0 %4686  ;;  %1475 = vmatpush.msra.mxu2 %v1412_v38  ;;  %1512 = vmatpush.msrb.mxu0 %v1419_v42  ;;  %v4698_v42 = vunpack.i.l.bf16 %v6498_v20  ;;  %v1398_v21 = vsel %vm582_vm6, %v4643_v40, %v4644_v45 }
 0x919   : > { %v4689_v3 = vunpack.i.h.bf16 %v4687_v44  ;;  %v4688_v23 = vunpack.i.l.bf16 %v4687_v44  ;;  %v4709_v44 = vunpack.i.h.bf16 %v6515_v41  ;;  %v4191_v41 = vld [vmem:[%s7743_s3 + $0x10] sm:$0xff] }
 0x91a   : > { %1476 = vmatpush.msra.mxu2 %v1410_v7  ;;  %1513 = vmatpush.msrb.mxu0 %v1417_v9 }
 0x91b   : > { %v1408_v2 = vsel %vm582_vm6, %v4684_v13, %v4688_v23  ;;  %v1415_v14 = vsel %vm582_vm6, %v4624_v31, %v4689_v3  ;;  %v1409_v38 = vsel %vm582_vm6, %v4688_v23, %v4663_v5  ;;  %v4704_v13 = vunpack.i.h.bf16 %v4702_v6  ;;  %v4727_v3 = vpop.permute.xlu1 %4726  ;;  %v4732_v23 = vpop.permute.xlu2 %4731 }
 0x91c   : > { %1477 = vmatpush.msra.mxu2 %v1408_v2  ;;  %1514 = vmatpush.msrb.mxu0 %v1415_v14  ;;  %v1403_v6 = vsel %vm582_vm6, %v4639_v63, %v4703_v58  ;;  %v4733_v40 = vunpack.i.l.bf16 %v4732_v23 }
 0x91e   : > { %1478 = vmatpush.msra.mxu2 %v1406_v8  ;;  %1515 = vmatpush.msrb.mxu0 %v1413_v49  ;;  %v4729_v8 = vunpack.i.h.bf16 %v4727_v3  ;;  %v4734_v49 = vunpack.i.h.bf16 %v4732_v23 }
 0x920   : > { %v4712_v33 = vpop.permute.xlu0 %4711 }
 0x921   : > { %v4714_v25 = vunpack.i.h.bf16 %v4712_v33  ;;  %v4713_v31 = vunpack.i.l.bf16 %v4712_v33  ;;  %v1426_v33 = vsel %vm582_vm6, %v4704_v13, %v4708_v36 }
 0x923   : > { %v1404_v4 = vsel %vm582_vm6, %v4694_v26, %v4713_v31  ;;  %v1411_v11 = vsel %vm582_vm6, %v4614_v34, %v4714_v25  ;;  %v1400_v34 = vsel %vm582_vm6, %v4664_v52, %v4653_v54  ;;  %v1405_v20 = vsel %vm582_vm6, %v4713_v31, %v4698_v42 }
 0x924   : > { %1479 = vmatpush.msra.mxu2 %v1404_v4  ;;  %1516 = vmatpush.msrb.mxu0 %v1411_v11  ;;  %v1394_v26 = vsel %vm582_vm6, %v6218_v12, %v4709_v44  ;;  %v1427_v31 = vsel %vm582_vm6, %v4708_v36, %v4734_v49  ;;  %v4728_v11 = vunpack.i.l.bf16 %v4727_v3 }
 0x926   : > { %1480 = vmatpush.msra.mxu2 %v1402_v50  ;;  %1517 = vmatpush.msrb.mxu0 %v1409_v38  ;;  %v1395_v38 = vsel %vm582_vm6, %v4709_v44, %v4733_v40 }
 0x928   : > { %v4717_v7 = vpop.permute.xlu0 %4716  ;;  %1481 = vmatpush.msra.mxu2 %v1400_v34  ;;  %1518 = vmatpush.msrb.mxu0 %v1407_v17 }
 0x929   : > { %v4719_v9 = vunpack.i.h.bf16 %v4717_v7  ;;  %v4718_v2 = vunpack.i.l.bf16 %v4717_v7 }
 0x92a   : > { %1482 = vmatpush.msra.mxu2 %v1398_v21  ;;  %1519 = vmatpush.msrb.mxu0 %v1405_v20 }
 0x92b   : > { %v1396_v46 = vsel %vm582_vm6, %v6218_v12, %v4719_v9  ;;  %v1428_v14 = vsel %vm582_vm6, %v4699_v15, %v4718_v2  ;;  %v1429_v25 = vsel %vm582_vm6, %v4718_v2, %v4729_v8  ;;  %v1397_v50 = vsel %vm582_vm6, %v4719_v9, %v4728_v11 }
 0x92c   : > { %1483 = vmatpush.msra.mxu2 %v1396_v46  ;;  %1503 = vmatpush.msrb.mxu1 %v1428_v14 }
 0x92d   : > { %1520 = vmatpush.msrb.mxu0 %v1403_v6 }
 0x92e   : > { %1484 = vmatpush.msra.mxu2 %v1394_v26  ;;  %1504 = vmatpush.msrb.mxu1 %v1426_v33 }
 0x92f   : > { %1485 = vmatmul.f32.vlgmr.msra.gmra.mxu2 %v4191_v41  ;;  %4193 = vmatmul.msk.f32.vlgmr.msrb.gmra.mxu1 %vm921_vm15, %v4192_v47 }
 0x930   : > { %1543 = vmatpush.msra.mxu1 %v1429_v25  ;;  %v4722_v63 = vpop.permute.xlu0 %4721 }
 0x931   : > { %v4724_v5 = vunpack.i.h.bf16 %v4722_v63  ;;  %v4723_v35 = vunpack.i.l.bf16 %v4722_v63 }
 0x932   : > { %1544 = vmatpush.msra.mxu1 %v1427_v31  ;;  %v4195_v31 = vld [vmem:[%s7742_s2 + $0x30] sm:$0xff] }
 0x933   : > { %v1401_v4 = vsel %vm582_vm6, %v4653_v54, %v4723_v35  ;;  %v1399_v52 = vsel %vm582_vm6, %v4644_v45, %v4724_v5 }
 0x934   : > { %1521 = vmatpush.msrb.mxu0 %v1401_v4 }
 0x936   : > { %1522 = vmatpush.msrb.mxu0 %v1399_v52 }
 0x937   : > { %4194 = vmatmul.msk.f32.vlgmr.msra.gmra.mxu1 %vm921_vm15, %v4192_v47 }
 0x938   : > { %1523 = vmatpush.msrb.mxu0 %v1397_v50 }
 0x93a   : > { %1524 = vmatpush.msrb.mxu0 %v1395_v38 }
 0x93b   : > { %1525 = vmatmul.f32.vlgmr.msrb.gmra.mxu0 %v4191_v41 }
 0x9ac   : > { %v1506_v15 = vpop.f32.mrf.mxu1 }
 0x9b2   : > { %v1486_v42 = vpop.f32.mrf.mxu2 }
 0x9b3   : > { %v1507_v54 = vadd.f32 %v1506_v15, %v1486_v42 }
 0x9b4   : > { %v1546_v34 = vpop.f32.mrf.mxu1 }
 0x9b8   : > { %v1526_v17 = vpop.f32.mrf.mxu0 }
 0x9b9   : > { %v1547_v13 = vadd.f32 %v1546_v34, %v1526_v17 }
 0x9bb   : > { %v1549_v58 = vadd.f32 %v1547_v13, %v1507_v54 }
 0x9bd   : > { %1550 = vadd.xlane.f32.xlu0 %v1549_v58 }
 0xa30   : > { %v1551_v7 = vpop.xlane.xlu0 %1550 }
 0xa31   : > { %v1552_v45 = vmul.f32 %v1551_v7, %v5734_v53 }
 0xa33   : > { %v1553_v21 = vsub.f32 %v1507_v54, %v1552_v45  ;;  %v1554_v36 = vsub.f32 %v1547_v13, %v1552_v45 }
 0xa35   : > { %v1555_v3 = vmul.f32 %v1553_v21, %v1553_v21  ;;  %v1556_v23 = vmul.f32 %v1554_v36, %v1554_v36 }
 0xa37   : > { %v1557_v9 = vadd.f32 %v1556_v23, %v1555_v3 }
 0xa39   : > { %1558 = vadd.xlane.f32.xlu1 %v1557_v9 }
 0xaac   : > { %v1559_v44 = vpop.xlane.xlu1 %1558 }
 0xaad   : > { %v1560_v2 = vmul.f32 %v1559_v44, %v5734_v53 }
 0xaaf   : > { %v1561_v20 = vadd.f32 1e-05, %v1560_v2 }
 0xab1   : > { %5589 = vrsqrt.f32 %v1561_v20  ;;  %vm1568_vm1 = vweird.f32 %v1561_v20 }
 0xab7   : > { %v5590_v46 = vpop.eup %5589 }
 0xab8   : > { %v1563_v14 = vmul.f32 %v5590_v46, %v1561_v20  ;;  %vm1569_vm5 = vweird.f32 %v5590_v46 }
 0xab9   : > { %vm1570_vm2 = vmor %vm1568_vm1, %vm1569_vm5 }
 0xaba   : > { %v1564_v8 = vmul.f32 %v5590_v46, %v1563_v14 }
 0xabc   : > { %v1565_v49 = vmul.f32 0.5, %v1564_v8 }
 0xabe   : > { %v1566_v6 = vsub.f32 1.5, %v1565_v49 }
 0xac0   : > { %v1567_v41 = vmul.f32 %v5590_v46, %v1566_v6 }
 0xac2   : > { %v1571_v26 = vsel %vm1570_vm2, %v5590_v46, %v1567_v41 }
 0xac3   : > { %v1572_v33 = vmul.f32 %v1571_v26, %v1553_v21  ;;  %v1573_v47 = vmul.f32 %v1571_v26, %v1554_v36 }
 0xac5   : > { %v1574_v25 = vmax.f32 %v1572_v33, 0.0  ;;  %v1575_v63 = vmax.f32 %v1573_v47, 0.0 }
 0xac7   : > { %1598 = vmatpush.msrb.mxu1 %v1574_v25  ;;  %1621 = vmatpush.msra.mxu3 %v1575_v63 }
 0xac9   : > { %1599 = vmatpush.msrb.mxu1 %v1030_v24  ;;  %1622 = vmatpush.msra.mxu3 %v1031_v39 }
 0xacb   : > { %1600 = vmatpush.msrb.mxu1 %v5741_v18  ;;  %1623 = vmatpush.msra.mxu3 %v5743_v19 }
 0xacc   : > { %4199 = vmatmul.msk.f32.vlgmr.msra.gmra.mxu3 %vm7751_vm0, %v4195_v31  ;;  %4197 = vmatmul.msk.f32.vlgmr.msrb.gmra.mxu1 %vm7751_vm0, %v4195_v31 }
 0xad4   : > { %4200 = vmatmul.msk.f32.gmra.mxu3 %vm7751_vm0, %v4196_v51  ;;  %4198 = vmatmul.msk.f32.gmra.mxu1 %vm7751_vm0, %v4196_v51 }
 0xb49   : > { %v1602_v57 = vpop.f32.mrf.mxu1 }
 0xb4f   : > { %v1625_v24 = vpop.f32.mrf.mxu3 }
 0xb50   : > { %v1631_v39 = vadd.f32 %v1625_v24, %v1602_v57 }
 0xb51   : > { %v1605_v5 = vpop.f32.mrf.mxu1 }
 0xb52   : > { %1632 = vadd.xlane.f32.xlu0 %v1631_v39 }
 0xb57   : > { %v1628_v18 = vpop.f32.mrf.mxu3 }
 0xb58   : > { %v1634_v35 = vadd.f32 %v1628_v18, %v1605_v5 }
 0xb5a   : > { %1635 = vadd.xlane.f32.xlu2 %v1634_v35  ;;  %v4201_v35 = vld [vmem:[%s7742_s2 + $0x48] sm:$0xff] }
 0xbc5   : > { %v1633_v19 = vpop.xlane.xlu0 %1632 }
 0xbc6   : > { %v1637_v4 = vmul.f32 %v1633_v19, %v5734_v53  ;;  %v4202_v19 = vld [vmem:[%s7742_s2 + $0x50] sm:$0xff] }
 0xbc8   : > { %v1639_v11 = vsub.f32 %v1602_v57, %v1637_v4  ;;  %v1640_v40 = vsub.f32 %v1625_v24, %v1637_v4 }
 0xbca   : > { %v1643_v52 = vmul.f32 %v1639_v11, %v1639_v11  ;;  %v1644_v50 = vmul.f32 %v1640_v40, %v1640_v40 }
 0xbcc   : > { %v1647_v38 = vadd.f32 %v1644_v50, %v1643_v52 }
 0xbcd   : > { %v1636_v15 = vpop.xlane.xlu2 %1635 }
 0xbce   : > { %v1638_v42 = vmul.f32 %v1636_v15, %v5734_v53  ;;  %1648 = vadd.xlane.f32.xlu2 %v1647_v38 }
 0xbd0   : > { %v1641_v34 = vsub.f32 %v1605_v5, %v1638_v42  ;;  %v1642_v17 = vsub.f32 %v1628_v18, %v1638_v42 }
 0xbd2   : > { %v1645_v54 = vmul.f32 %v1641_v34, %v1641_v34  ;;  %v1646_v13 = vmul.f32 %v1642_v17, %v1642_v17 }
 0xbd4   : > { %v1650_v58 = vadd.f32 %v1646_v13, %v1645_v54 }
 0xbd6   : > { %1651 = vadd.xlane.f32.xlu1 %v1650_v58 }
 0xc41   : > { %v1649_v7 = vpop.xlane.xlu2 %1648 }
 0xc42   : > { %v1653_v45 = vmul.f32 %v1649_v7, %v5734_v53 }
 0xc44   : > { %v1655_v21 = vadd.f32 1e-05, %v1653_v45 }
 0xc46   : > { %5591 = vrsqrt.f32 %v1655_v21  ;;  %vm1663_vm4 = vweird.f32 %v1655_v21 }
 0xc49   : > { %v1652_v36 = vpop.xlane.xlu1 %1651 }
 0xc4a   : > { %v1654_v3 = vmul.f32 %v1652_v36, %v5734_v53 }
 0xc4c   : > { %v5592_v23 = vpop.eup %5591  ;;  %v1656_v9 = vadd.f32 1e-05, %v1654_v3 }
 0xc4d   : > { %v1658_v44 = vmul.f32 %v5592_v23, %v1655_v21  ;;  %vm1664_vm3 = vweird.f32 %v5592_v23 }
 0xc4e   : > { %5593 = vrsqrt.f32 %v1656_v9  ;;  %vm1665_vm1 = vmor %vm1663_vm4, %vm1664_vm3  ;;  %vm1673_vm2 = vweird.f32 %v1656_v9 }
 0xc4f   : > { %v1659_v2 = vmul.f32 %v5592_v23, %v1658_v44 }
 0xc51   : > { %v1660_v20 = vmul.f32 0.5, %v1659_v2 }
 0xc53   : > { %v1661_v14 = vsub.f32 1.5, %v1660_v20 }
 0xc54   : > { %v5594_v46 = vpop.eup %5593 }
 0xc55   : > { %v1668_v8 = vmul.f32 %v5594_v46, %v1656_v9  ;;  %v1662_v41 = vmul.f32 %v5592_v23, %v1661_v14  ;;  %vm1674_vm5 = vweird.f32 %v5594_v46 }
 0xc56   : > { %vm1675_vm0 = vmor %vm1673_vm2, %vm1674_vm5 }
 0xc57   : > { %v1669_v49 = vmul.f32 %v5594_v46, %v1668_v8  ;;  %v1666_v47 = vsel %vm1665_vm1, %v5592_v23, %v1662_v41 }
 0xc58   : > { %v1677_v51 = vmul.f32 %v1666_v47, %v1639_v11  ;;  %v1678_v57 = vmul.f32 %v1666_v47, %v1640_v40 }
 0xc59   : > { %v1670_v6 = vmul.f32 0.5, %v1669_v49 }
 0xc5a   : > { %v6587_v5 = vmax.f32 %v1677_v51, 0.0  ;;  %v6589_v18 = vmax.f32 %v1678_v57, 0.0 }
 0xc5b   : > { %v1671_v26 = vsub.f32 1.5, %v1670_v6 }
 0xc5d   : > { %v1672_v33 = vmul.f32 %v5594_v46, %v1671_v26 }
 0xc5f   : > { %v1676_v25 = vsel %vm1675_vm0, %v5594_v46, %v1672_v33 }
 0xc60   : > { %v1679_v63 = vmul.f32 %v1676_v25, %v1641_v34  ;;  %v1680_v31 = vmul.f32 %v1676_v25, %v1642_v17 }
 0xc62   : > { %v6581_v24 = vmax.f32 %v1679_v63, 0.0  ;;  %v6583_v39 = vmax.f32 %v1680_v31, 0.0 }
 0xc64   : > { %1708 = vmatpush.msrb.mxu2 %v6581_v24  ;;  %1731 = vmatpush.msra.mxu1 %v6583_v39 }
 0xc66   : > { %1709 = vmatpush.msrb.mxu2 %v6587_v5  ;;  %1732 = vmatpush.msra.mxu1 %v6589_v18 }
 0xc67   : > { %4203 = vmatmul.msk.f32.vlgmr.msrb.gmra.mxu2 %vm921_vm15, %v4201_v35  ;;  %4205 = vmatmul.msk.f32.vlgmr.msra.gmra.mxu1 %vm921_vm15, %v4201_v35 }
 0xc6f   : > { %4204 = vmatmul.msk.f32.gmra.mxu2 %vm921_vm15, %v4202_v19  ;;  %4206 = vmatmul.msk.f32.gmra.mxu1 %vm921_vm15, %v4202_v19 }
 0xce4   : > { %v1734_v4 = vpop.f32.mrf.mxu1 }
 0xcea   : > { %v1711_v11 = vpop.f32.mrf.mxu2 }
 0xceb   : > { %v1740_v40 = vadd.f32 %v1734_v4, %v1711_v11 }
 0xcec   : > { %v1737_v52 = vpop.f32.mrf.mxu1 }
 0xced   : > { %1741 = vadd.xlane.f32.xlu1 %v1740_v40 }
 0xcf2   : > { %v1714_v50 = vpop.f32.mrf.mxu2 }
 0xcf3   : > { %v1743_v38 = vadd.f32 %v1737_v52, %v1714_v50 }
 0xcf5   : > { %1744 = vadd.xlane.f32.xlu0 %v1743_v38 }
 0xd60   : > { %v1742_v15 = vpop.xlane.xlu1 %1741 }
 0xd61   : > { %v1746_v42 = vmul.f32 %v1742_v15, %v5734_v53 }
 0xd63   : > { %v1748_v34 = vsub.f32 %v1711_v11, %v1746_v42  ;;  %v1749_v17 = vsub.f32 %v1734_v4, %v1746_v42 }
 0xd65   : > { %v1752_v54 = vmul.f32 %v1748_v34, %v1748_v34  ;;  %v1753_v13 = vmul.f32 %v1749_v17, %v1749_v17 }
 0xd67   : > { %v1756_v58 = vadd.f32 %v1753_v13, %v1752_v54 }
 0xd68   : > { %v1745_v7 = vpop.xlane.xlu0 %1744 }
 0xd69   : > { %v1747_v45 = vmul.f32 %v1745_v7, %v5734_v53  ;;  %1757 = vadd.xlane.f32.xlu0 %v1756_v58 }
 0xd6b   : > { %v1750_v21 = vsub.f32 %v1714_v50, %v1747_v45  ;;  %v1751_v36 = vsub.f32 %v1737_v52, %v1747_v45 }
 0xd6d   : > { %v1754_v3 = vmul.f32 %v1750_v21, %v1750_v21  ;;  %v1755_v23 = vmul.f32 %v1751_v36, %v1751_v36 }
 0xd6f   : > { %v1759_v9 = vadd.f32 %v1755_v23, %v1754_v3 }
 0xd71   : > { %1760 = vadd.xlane.f32.xlu2 %v1759_v9 }
 0xddc   : > { %v1758_v44 = vpop.xlane.xlu0 %1757 }
 0xddd   : > { %v1762_v2 = vmul.f32 %v1758_v44, %v5734_v53 }
 0xddf   : > { %v1764_v20 = vadd.f32 1e-05, %v1762_v2 }
 0xde1   : > { %5595 = vrsqrt.f32 %v1764_v20  ;;  %vm1772_vm3 = vweird.f32 %v1764_v20 }
 0xde4   : > { %v1761_v46 = vpop.xlane.xlu2 %1760 }
 0xde5   : > { %v1763_v14 = vmul.f32 %v1761_v46, %v5734_v53 }
 0xde7   : > { %v5596_v8 = vpop.eup %5595  ;;  %v1765_v49 = vadd.f32 1e-05, %v1763_v14 }
 0xde8   : > { %v1767_v6 = vmul.f32 %v5596_v8, %v1764_v20  ;;  %vm1773_vm0 = vweird.f32 %v5596_v8 }
 0xde9   : > { %5597 = vrsqrt.f32 %v1765_v49  ;;  %vm1774_vm4 = vmor %vm1772_vm3, %vm1773_vm0  ;;  %vm1782_vm1 = vweird.f32 %v1765_v49 }
 0xdea   : > { %v1768_v41 = vmul.f32 %v5596_v8, %v1767_v6 }
 0xdec   : > { %v1769_v26 = vmul.f32 0.5, %v1768_v41 }
 0xdee   : > { %v1770_v33 = vsub.f32 1.5, %v1769_v26 }
 0xdef   : > { %v5598_v47 = vpop.eup %5597 }
 0xdf0   : > { %v1771_v25 = vmul.f32 %v5596_v8, %v1770_v33  ;;  %v1777_v63 = vmul.f32 %v5598_v47, %v1765_v49  ;;  %vm1783_vm5 = vweird.f32 %v5598_v47 }
 0xdf1   : > { %vm1784_vm2 = vmor %vm1782_vm1, %vm1783_vm5  ;;  %vm7759_vm5 = vcmask 195584  }
 0xdf2   : > { %v1775_v31 = vsel %vm1774_vm4, %v5596_v8, %v1771_v25  ;;  %v1778_v51 = vmul.f32 %v5598_v47, %v1777_v63  ;;  %vm7760_vm1 = vmmov %vm7759_vm5 }
 0xdf3   : > { %v1786_v57 = vmul.f32 %v1775_v31, %v1748_v34  ;;  %v1787_v35 = vmul.f32 %v1775_v31, %v1749_v17 }
 0xdf4   : > { %v1779_v19 = vmul.f32 0.5, %v1778_v51 }
 0xdf5   : > { %v1790_v4 = vmax.f32 %v1786_v57, 0.0  ;;  %v1791_v11 = vmax.f32 %v1787_v35, 0.0 }
 0xdf6   : > { %v1780_v40 = vsub.f32 1.5, %v1779_v19 }
 0xdf7   : > { %v4740_v52 = vpack.i.bf16 %v1791_v11, %v1790_v4  ;;  %v1810_v50 = vmul.f32 %v5849_v43, %v1790_v4  ;;  %v1811_v38 = vmul.f32 %v1791_v11, %v5857_v48  ;;  %v1806_v13 = vmul.f32 %v5868_v55, %v1790_v4 }
 0xdf8   : > { %v1781_v15 = vmul.f32 %v5598_v47, %v1780_v40  ;;  %v1807_v58 = vmul.f32 %v1791_v11, %v5875_v59  ;;  %v6615_v7 = vmul.f32 %v1790_v4, %v5823_v27  ;;  %v6618_v45 = vmul.f32 %v5796_v16, %v1791_v11 }
 0xdf9   : > { %4741 = vrot.lane.b32.xlu0 %v4740_v52, %s5641_s9  ;;  %4736 = vrot.lane.b32.xlu2 %v4740_v52, %s5644_s12  ;;  %v4750_v42 = vpack.i.bf16 %v1811_v38, %v1810_v50  ;;  %v1802_v3 = vmul.f32 %v1790_v4, %v5807_v22  ;;  %v1803_v23 = vmul.f32 %v5793_v10, %v1791_v11 }
 0xdfa   : > { %v1785_v34 = vsel %vm1784_vm2, %v5598_v47, %v1781_v15  ;;  %v4755_v44 = vpack.i.bf16 %v1807_v58, %v1806_v13  ;;  %v1798_v20 = vmul.f32 %v1790_v4, %v5837_v37  ;;  %v1799_v46 = vmul.f32 %v5817_v29, %v1791_v11  ;;  %vm7761_vm2 = vmmov %vm7760_vm1 }
 0xdfb   : > { %v1788_v17 = vmul.f32 %v1785_v34, %v1750_v21  ;;  %v1789_v54 = vmul.f32 %v1785_v34, %v1751_v36  ;;  %4751 = vrot.lane.b32.xlu1 %v4750_v42, %s5645_s13  ;;  %v4935_v21 = vpack.i.bf16 %v6618_v45, %v6615_v7  ;;  %v4760_v2 = vpack.i.bf16 %v1803_v23, %v1802_v3 }
 0xdfc   : > { %v1814_v41 = vmul.f32 %v5881_v61, %v1790_v4  ;;  %v1815_v26 = vmul.f32 %v1791_v11, %v5892_v0  ;;  %v4765_v25 = vpack.i.bf16 %v1799_v46, %v1798_v20 }
 0xdfd   : > { %v1792_v36 = vmax.f32 %v1788_v17, 0.0  ;;  %v1793_v9 = vmax.f32 %v1789_v54, 0.0 }
 0xdfe   : > { %v4770_v63 = vpack.i.bf16 %v1815_v26, %v1814_v41 }
 0xdff   : > { %v1812_v14 = vmul.f32 %v5849_v43, %v1792_v36  ;;  %v1813_v8 = vmul.f32 %v1793_v9, %v5857_v48  ;;  %v6632_v49 = vmul.f32 %v1792_v36, %v5823_v27  ;;  %v6635_v6 = vmul.f32 %v5796_v16, %v1793_v9 }
 0xe00   : > { %v1808_v31 = vmul.f32 %v5868_v55, %v1792_v36  ;;  %v1809_v51 = vmul.f32 %v1793_v9, %v5875_v59  ;;  %v1804_v57 = vmul.f32 %v1792_v36, %v5807_v22  ;;  %v1805_v35 = vmul.f32 %v5793_v10, %v1793_v9 }
 0xe01   : > { %4746 = vrot.lane.b32.xlu0 %v4740_v52, %s5635_s25  ;;  %4756 = vrot.lane.b32.xlu2 %v4755_v44, %s5646_s14  ;;  %v4910_v33 = vpack.i.bf16 %v6635_v6, %v6632_v49  ;;  %v4790_v47 = vpack.i.bf16 %v1813_v8, %v1812_v14  ;;  %v4775_v11 = vpack.i.bf16 %v1793_v9, %v1792_v36 }
 0xe02   : > { %v4795_v19 = vpack.i.bf16 %v1809_v51, %v1808_v31  ;;  %v4800_v4 = vpack.i.bf16 %v1805_v35, %v1804_v57  ;;  %v1800_v40 = vmul.f32 %v1792_v36, %v5837_v37  ;;  %v1801_v52 = vmul.f32 %v5817_v29, %v1793_v9 }
 0xe03   : > { %4761 = vrot.lane.b32.xlu1 %v4760_v2, %s5639_s7  ;;  %v1816_v50 = vmul.f32 %v5881_v61, %v1792_v36  ;;  %v1817_v38 = vmul.f32 %v1793_v9, %v5892_v0 }
 0xe04   : > { %v4805_v15 = vpack.i.bf16 %v1801_v52, %v1800_v40 }
 0xe05   : > { %v4810_v42 = vpack.i.bf16 %v1817_v38, %v1816_v50 }
 0xe09   : > { %4791 = vrot.lane.b32.xlu0 %v4790_v47, %s5645_s13  ;;  %4766 = vrot.lane.b32.xlu2 %v4765_v25, %s5643_s11 }
 0xe0b   : > { %4771 = vrot.lane.b32.xlu1 %v4770_v63, %s5640_s8 }
 0xe11   : > { %4796 = vrot.lane.b32.xlu0 %v4795_v19, %s5646_s14  ;;  %4801 = vrot.lane.b32.xlu2 %v4800_v4, %s5639_s7 }
 0xe13   : > { %4776 = vrot.lane.b32.xlu1 %v4775_v11, %s5644_s12 }
 0xe19   : > { %4806 = vrot.lane.b32.xlu0 %v4805_v15, %s5643_s11  ;;  %4811 = vrot.lane.b32.xlu2 %v4810_v42, %s5640_s8 }
 0xe1b   : > { %4781 = vrot.lane.b32.xlu1 %v4775_v11, %s5641_s9 }
 0xe23   : > { %4786 = vrot.lane.b32.xlu1 %v4775_v11, %s5635_s25 }
 0xe53   : > { %v6659_v34 = vpop.permute.xlu2 %4736 }
 0xe54   : > { %v4739_v17 = vunpack.i.h.bf16 %v6659_v34  ;;  %v4738_v54 = vunpack.i.l.bf16 %v6659_v34 }
 0xe56   : > { %v1916_v13 = vsel %vm711_vm7, %v4738_v54, %v4739_v17  ;;  %v1917_v58 = vsel %vm711_vm7, %v4739_v17, %v5945_v60 }
 0xe57   : > { %v4815_v3 = vpack.i.bf16 %v1917_v58, %v1916_v13 }
 0xe59   : > { %4816 = vrot.lane.b32.xlu1 %v4815_v3, %s5636_s30 }
 0xe5b   : > { %v6680_v47 = vpop.permute.xlu2 %4756 }
 0xe5c   : > { %v4759_v63 = vunpack.i.h.bf16 %v6680_v47  ;;  %v4758_v31 = vunpack.i.l.bf16 %v6680_v47 }
 0xe5e   : > { %v1888_v57 = vsel %vm676_vm11, %v4758_v31, %v4759_v63  ;;  %v1889_v35 = vsel %vm676_vm11, %v4759_v63, %v5994_v28 }
 0xe5f   : > { %v4830_v19 = vpack.i.bf16 %v1889_v35, %v1888_v57 }
 0xe63   : > { %v6696_v38 = vpop.permute.xlu2 %4766 }
 0xe64   : > { %v4769_v58 = vunpack.i.h.bf16 %v6696_v38  ;;  %v4768_v3 = vunpack.i.l.bf16 %v6696_v38 }
 0xe6b   : > { %v4742_v23 = vpop.permute.xlu0 %4741 }
 0xe6c   : > { %v4744_v36 = vunpack.i.h.bf16 %v4742_v23  ;;  %v4743_v9 = vunpack.i.l.bf16 %v4742_v23 }
 0xe6d   : > { %v6669_v44 = vpop.permute.xlu1 %4751 }
 0xe6e   : > { %v1874_v2 = vsel %vm510_vm14, %v4743_v9, %v4744_v36  ;;  %v4754_v46 = vunpack.i.h.bf16 %v6669_v44  ;;  %v4753_v14 = vunpack.i.l.bf16 %v6669_v44 }
 0xe6f   : > { %v4820_v20 = vpack.i.bf16 %v4744_v36, %v1874_v2  ;;  %v1847_v36 = vsel %vm626_vm8, %v4768_v3, %v4769_v58 }
 0xe70   : > { %v1904_v41 = vsel %vm696_vm10, %v4753_v14, %v4754_v46  ;;  %v1905_v26 = vsel %vm696_vm10, %v4754_v46, %v5982_v62 }
 0xe71   : > { %4821 = vrot.lane.b32.xlu1 %v4820_v20, %s5636_s30  ;;  %v4825_v25 = vpack.i.bf16 %v1905_v26, %v1904_v41  ;;  %v4890_v41 = vpack.i.bf16 %v4769_v58, %v1847_v36 }
 0xe73   : > { %v6693_v40 = vpop.permute.xlu0 %4746 }
 0xe74   : > { %v4748_v63 = vunpack.i.l.bf16 %v6693_v40 }
 0xe75   : > { %v4762_v8 = vpop.permute.xlu1 %4761 }
 0xe76   : > { %v4764_v4 = vunpack.i.h.bf16 %v4762_v8  ;;  %v4763_v11 = vunpack.i.l.bf16 %v4762_v8  ;;  %v1830_v38 = vsel %vm540_vm13, %v5925_v30, %v4748_v63 }
 0xe78   : > { %v1863_v52 = vsel %vm646_vm9, %v4763_v11, %v4764_v4  ;;  %v1862_v34 = vsel %vm646_vm9, %v5788_v1, %v4763_v11 }
 0xe79   : > { %4826 = vrot.lane.b32.xlu1 %v4825_v25, %s5636_s30  ;;  %v4835_v17 = vpack.i.bf16 %v4764_v4, %v1863_v52  ;;  %v4749_v25 = vunpack.i.h.bf16 %v6693_v40 }
 0xe7b   : > { %v4792_v20 = vpop.permute.xlu0 %4791  ;;  %v1831_v52 = vsel %vm540_vm13, %v4748_v63, %v4749_v25 }
 0xe7c   : > { %v4793_v4 = vunpack.i.l.bf16 %v4792_v20 }
 0xe7d   : > { %v6685_v51 = vpop.permute.xlu1 %4771 }
 0xe7e   : > { %v4774_v58 = vunpack.i.h.bf16 %v6685_v51 }
 0xe80   : > { %v1933_v40 = vsel %vm731_vm12, %v4774_v58, %v5784_v56 }
 0xe81   : > { %4831 = vrot.lane.b32.xlu1 %v4830_v19, %s5636_s30  ;;  %v4794_v19 = vunpack.i.h.bf16 %v4792_v20 }
 0xe85   : > { %v4777_v50 = vpop.permute.xlu1 %4776 }
 0xe86   : > { %v4779_v15 = vunpack.i.h.bf16 %v4777_v50  ;;  %v4778_v42 = vunpack.i.l.bf16 %v4777_v50  ;;  %v1906_v50 = vsel %vm696_vm10, %v4793_v4, %v4794_v19 }
 0xe87   : > { %v4865_v36 = vpack.i.bf16 %v1906_v50, %v4793_v4  ;;  %v1907_v4 = vsel %vm696_vm10, %v4794_v19, %v5982_v62 }
 0xe88   : > { %v1918_v13 = vsel %vm711_vm7, %v4778_v42, %v4779_v15 }
 0xe89   : > { %v4845_v23 = vpack.i.bf16 %v1918_v13, %v4778_v42  ;;  %4836 = vrot.lane.b32.xlu1 %v4835_v17, %s5636_s30  ;;  %v4905_v42 = vpack.i.bf16 %v4749_v25, %v1831_v52  ;;  %v4797_v17 = vpop.permute.xlu0 %4796 }
 0xe8a   : > { %v4799_v20 = vunpack.i.h.bf16 %v4797_v17 }
 0xe8b   : > { %4846 = vrot.lane.b32.xlu0 %v4845_v23, %s5636_s30  ;;  %v4773_v23 = vunpack.i.l.bf16 %v6685_v51 }
 0xe8d   : > { %v4782_v2 = vpop.permute.xlu1 %4781 }
 0xe8e   : > { %v4784_v46 = vunpack.i.h.bf16 %v4782_v2  ;;  %v4783_v8 = vunpack.i.l.bf16 %v4782_v2  ;;  %v4802_v2 = vpop.permute.xlu2 %4801 }
 0xe90   : > { %v4840_v26 = vpack.i.bf16 %v4743_v9, %v4784_v46  ;;  %v1875_v57 = vsel %vm510_vm14, %v4783_v8, %v4784_v46  ;;  %v1919_v9 = vsel %vm711_vm7, %v4779_v15, %v5945_v60  ;;  %v4798_v46 = vunpack.i.l.bf16 %v4797_v17 }
 0xe91   : > { %4891 = vrot.lane.b32.xlu1 %v4890_v41, %s5636_s30  ;;  %v4855_v35 = vpack.i.bf16 %v1875_v57, %v4783_v8  ;;  %v4850_v13 = vpack.i.bf16 %v4738_v54, %v1919_v9  ;;  %v1932_v15 = vsel %vm731_vm12, %v4773_v23, %v4774_v58  ;;  %v4804_v54 = vunpack.i.h.bf16 %v4802_v2 }
 0xe92   : > { %4841 = vrot.lane.b32.xlu2 %v4840_v26, %s5636_s30  ;;  %v1890_v8 = vsel %vm676_vm11, %v4798_v46, %v4799_v20  ;;  %v4915_v41 = vpack.i.bf16 %v1932_v15, %v4773_v23  ;;  %v4870_v9 = vpack.i.bf16 %v4753_v14, %v1907_v4  ;;  %v1891_v17 = vsel %vm676_vm11, %v4799_v20, %v5994_v28  ;;  %v4807_v23 = vpop.permute.xlu0 %4806 }
 0xe93   : > { %4856 = vrot.lane.b32.xlu0 %v4855_v35, %s5636_s30  ;;  %v4860_v26 = vpack.i.bf16 %v1862_v34, %v4804_v54  ;;  %v4875_v25 = vpack.i.bf16 %v1890_v8, %v4798_v46  ;;  %v4809_v14 = vunpack.i.h.bf16 %v4807_v23  ;;  %v4808_v46 = vunpack.i.l.bf16 %v4807_v23 }
 0xe95   : > { %v4787_v51 = vpop.permute.xlu1 %4786  ;;  %v1848_v20 = vsel %vm626_vm8, %v5929_v32, %v4808_v46  ;;  %v1849_v15 = vsel %vm626_vm8, %v4808_v46, %v4809_v14 }
 0xe96   : > { %v4789_v57 = vunpack.i.h.bf16 %v4787_v51  ;;  %v4788_v35 = vunpack.i.l.bf16 %v4787_v51  ;;  %v4812_v34 = vpop.permute.xlu2 %4811 }
 0xe97   : > { %v4813_v8 = vunpack.i.l.bf16 %v4812_v34 }
 0xe98   : > { %v1832_v11 = vsel %vm540_vm13, %v5925_v30, %v4788_v35  ;;  %v1833_v52 = vsel %vm540_vm13, %v4788_v35, %v4789_v57 }
 0xe99   : > { %4906 = vrot.lane.b32.xlu1 %v4905_v42, %s5636_s30  ;;  %v4895_v50 = vpack.i.bf16 %v1833_v52, %v1832_v11  ;;  %v4803_v42 = vunpack.i.l.bf16 %v4802_v2  ;;  %v1846_v2 = vsel %vm626_vm8, %v5929_v32, %v4768_v3  ;;  %v4900_v3 = vpack.i.bf16 %v1830_v38, %v4789_v57 }
 0xe9a   : > { %4851 = vrot.lane.b32.xlu2 %v4850_v13, %s5636_s30  ;;  %v4885_v47 = vpack.i.bf16 %v1846_v2, %v4809_v14 }
 0xe9b   : > { %4866 = vrot.lane.b32.xlu0 %v4865_v36, %s5636_s30  ;;  %v1864_v19 = vsel %vm646_vm9, %v5788_v1, %v4803_v42  ;;  %v1865_v13 = vsel %vm646_vm9, %v4803_v42, %v4804_v54  ;;  %v4880_v36 = vpack.i.bf16 %v4758_v31, %v1891_v17  ;;  %v4925_v31 = vpack.i.bf16 %v1849_v15, %v1848_v20 }
 0xe9c   : > { %v4920_v44 = vpack.i.bf16 %v1865_v13, %v1864_v19  ;;  %v4814_v54 = vunpack.i.h.bf16 %v4812_v34 }
 0xe9e   : > { %v1935_v63 = vsel %vm731_vm12, %v4814_v54, %v5784_v56 }
 0xea1   : > { %4916 = vrot.lane.b32.xlu1 %v4915_v41, %s5636_s30  ;;  %v1934_v41 = vsel %vm731_vm12, %v4813_v8, %v4814_v54 }
 0xea2   : > { %4861 = vrot.lane.b32.xlu2 %v4860_v26, %s5636_s30  ;;  %v4930_v51 = vpack.i.bf16 %v1934_v41, %v4813_v8  ;;  %v4940_v26 = vpack.i.bf16 %v1933_v40, %v1935_v63 }
 0xea3   : > { %4876 = vrot.lane.b32.xlu0 %v4875_v25, %s5636_s30 }
 0xeaa   : > { %4871 = vrot.lane.b32.xlu2 %v4870_v9, %s5636_s30 }
 0xeab   : > { %4896 = vrot.lane.b32.xlu0 %v4895_v50, %s5636_s30 }
 0xeb2   : > { %4881 = vrot.lane.b32.xlu2 %v4880_v36, %s5636_s30 }
 0xeb3   : > { %4921 = vrot.lane.b32.xlu0 %v4920_v44, %s5636_s30 }
 0xeba   : > { %4886 = vrot.lane.b32.xlu2 %v4885_v47, %s5636_s30 }
 0xebb   : > { %4926 = vrot.lane.b32.xlu0 %v4925_v31, %s5636_s30 }
 0xec2   : > { %4901 = vrot.lane.b32.xlu2 %v4900_v3, %s5636_s30 }
 0xec3   : > { %4931 = vrot.lane.b32.xlu0 %v4930_v51, %s5636_s30 }
 0xeca   : > { %4911 = vrot.lane.b32.xlu2 %v4910_v33, %s5636_s30 }
 0xecb   : > { %4936 = vrot.lane.b32.xlu0 %v4935_v21, %s5636_s30  ;;  %v4817_v57 = vpop.permute.xlu1 %4816 }
 0xecc   : > { %v4819_v33 = vunpack.i.h.bf16 %v4817_v57  ;;  %v4818_v7 = vunpack.i.l.bf16 %v4817_v57 }
 0xece   : > { %v2076_v17 = vsel %vm582_vm6, %v4818_v7, %v4819_v33 }
 0xed2   : > { %4941 = vrot.lane.b32.xlu2 %v4940_v26, %s5636_s30 }
 0xee3   : > { %v6781_v49 = vpop.permute.xlu1 %4821 }
 0xeeb   : > { %v4827_v50 = vpop.permute.xlu1 %4826 }
 0xeec   : > { %v6779_v25 = vpop.permute.xlu2 %4841  ;;  %v4829_v36 = vunpack.i.h.bf16 %v4827_v50  ;;  %v4828_v44 = vunpack.i.l.bf16 %v4827_v50 }
 0xeee   : > { %v2072_v8 = vsel %vm582_vm6, %v4828_v44, %v4829_v36 }
 0xef3   : > { %v4832_v23 = vpop.permute.xlu1 %4831 }
 0xef4   : > { %v4852_v35 = vpop.permute.xlu2 %4851  ;;  %v4834_v38 = vunpack.i.h.bf16 %v4832_v23  ;;  %v4833_v3 = vunpack.i.l.bf16 %v4832_v23 }
 0xef5   : > { %v4854_v21 = vunpack.i.h.bf16 %v4852_v35  ;;  %v4853_v4 = vunpack.i.l.bf16 %v4852_v35 }
 0xef6   : > { %v2068_v50 = vsel %vm582_vm6, %v4833_v3, %v4834_v38 }
 0xef7   : > { %v2075_v42 = vsel %vm582_vm6, %v4854_v21, %v4818_v7 }
 0xefb   : > { %v4837_v41 = vpop.permute.xlu1 %4836 }
 0xefc   : > { %v6783_v6 = vpop.permute.xlu2 %4861  ;;  %v4839_v36 = vunpack.i.h.bf16 %v4837_v41 }
 0xefd   : > { %v4847_v45 = vpop.permute.xlu0 %4846 }
 0xefe   : > { %v4849_v58 = vunpack.i.h.bf16 %v4847_v45  ;;  %v4848_v11 = vunpack.i.l.bf16 %v4847_v45 }
 0xf00   : > { %v2077_v52 = vsel %vm582_vm6, %v4848_v11, %v4849_v58  ;;  %v2078_v9 = vsel %vm582_vm6, %v4849_v58, %v4853_v4  ;;  %v4824_v4 = vunpack.i.h.bf16 %v6781_v49  ;;  %v4823_v58 = vunpack.i.l.bf16 %v6781_v49 }
 0xf01   : > { %2122 = vmatpush.msrb.mxu3 %v2077_v52  ;;  %2162 = vmatpush.msra.mxu2 %v2078_v9  ;;  %v4844_v11 = vunpack.i.h.bf16 %v6779_v25  ;;  %v4843_v52 = vunpack.i.l.bf16 %v6779_v25 }
 0xf02   : > { %v2064_v23 = vsel %vm582_vm6, %v4823_v58, %v4824_v4 }
 0xf03   : > { %2123 = vmatpush.msrb.mxu3 %v2075_v42  ;;  %2163 = vmatpush.msra.mxu2 %v2076_v17  ;;  %v4892_v49 = vpop.permute.xlu1 %4891 }
 0xf04   : > { %v4872_v19 = vpop.permute.xlu2 %4871  ;;  %v4894_v38 = vunpack.i.h.bf16 %v4892_v49 }
 0xf05   : > { %v4857_v13 = vpop.permute.xlu0 %4856  ;;  %v4874_v46 = vunpack.i.h.bf16 %v4872_v19  ;;  %v4873_v2 = vunpack.i.l.bf16 %v4872_v19 }
 0xf06   : > { %v4859_v35 = vunpack.i.h.bf16 %v4857_v13  ;;  %v4858_v33 = vunpack.i.l.bf16 %v4857_v13  ;;  %v2063_v13 = vsel %vm582_vm6, %v4844_v11, %v4823_v58 }
 0xf07   : > { %v2071_v54 = vsel %vm582_vm6, %v4874_v46, %v4828_v44  ;;  %v4838_v44 = vunpack.i.l.bf16 %v4837_v41  ;;  %v4864_v46 = vunpack.i.h.bf16 %v6783_v6 }
 0xf08   : > { %v2065_v42 = vsel %vm582_vm6, %v4858_v33, %v4859_v35  ;;  %v2066_v17 = vsel %vm582_vm6, %v4859_v35, %v4843_v52 }
 0xf0c   : > { %v4882_v20 = vpop.permute.xlu2 %4881 }
 0xf0d   : > { %v4867_v14 = vpop.permute.xlu0 %4866  ;;  %v4884_v40 = vunpack.i.h.bf16 %v4882_v20  ;;  %v4883_v63 = vunpack.i.l.bf16 %v4882_v20 }
 0xf0e   : > { %v4869_v15 = vunpack.i.h.bf16 %v4867_v14  ;;  %v4868_v34 = vunpack.i.l.bf16 %v4867_v14 }
 0xf0f   : > { %v2067_v9 = vsel %vm582_vm6, %v4884_v40, %v4833_v3  ;;  %v4893_v3 = vunpack.i.l.bf16 %v4892_v49 }
 0xf10   : > { %v2073_v47 = vsel %vm582_vm6, %v4868_v34, %v4869_v15  ;;  %v2074_v31 = vsel %vm582_vm6, %v4869_v15, %v4873_v2  ;;  %v4863_v2 = vunpack.i.l.bf16 %v6783_v6  ;;  %v4907_v34 = vpop.permute.xlu1 %4906 }
 0xf11   : > { %2124 = vmatpush.msrb.mxu3 %v2073_v47  ;;  %2164 = vmatpush.msra.mxu2 %v2074_v31  ;;  %v4909_v4 = vunpack.i.h.bf16 %v4907_v34  ;;  %v4908_v58 = vunpack.i.l.bf16 %v4907_v34 }
 0xf13   : > { %2125 = vmatpush.msrb.mxu3 %v2071_v54  ;;  %2165 = vmatpush.msra.mxu2 %v2072_v8  ;;  %v2059_v54 = vsel %vm582_vm6, %v4864_v46, %v4838_v44  ;;  %v2060_v8 = vsel %vm582_vm6, %v4838_v44, %v4839_v36 }
 0xf14   : > { %v4887_v7 = vpop.permute.xlu2 %4886 }
 0xf15   : > { %v4877_v51 = vpop.permute.xlu0 %4876  ;;  %v4889_v6 = vunpack.i.h.bf16 %v4887_v7  ;;  %v4888_v40 = vunpack.i.l.bf16 %v4887_v7 }
 0xf16   : > { %v4879_v26 = vunpack.i.h.bf16 %v4877_v51  ;;  %v4878_v57 = vunpack.i.l.bf16 %v4877_v51 }
 0xf18   : > { %v2069_v45 = vsel %vm582_vm6, %v4878_v57, %v4879_v26  ;;  %v2070_v21 = vsel %vm582_vm6, %v4879_v26, %v4883_v63  ;;  %v4917_v11 = vpop.permute.xlu1 %4916 }
 0xf19   : > { %2126 = vmatpush.msrb.mxu3 %v2069_v45  ;;  %2166 = vmatpush.msra.mxu2 %v2070_v21  ;;  %v4918_v36 = vunpack.i.l.bf16 %v4917_v11 }
 0xf1b   : > { %2127 = vmatpush.msrb.mxu3 %v2067_v9  ;;  %2167 = vmatpush.msra.mxu2 %v2068_v50  ;;  %v2055_v9 = vsel %vm582_vm6, %v4889_v6, %v4893_v3  ;;  %v2056_v50 = vsel %vm582_vm6, %v4893_v3, %v4894_v38  ;;  %v4207_v6 = vld [vmem:[%s7743_s3 + $0x20] sm:$0xff] }
 0xf1c   : > { %v4902_v25 = vpop.permute.xlu2 %4901 }
 0xf1d   : > { %v4897_v19 = vpop.permute.xlu0 %4896  ;;  %2128 = vmatpush.msrb.mxu3 %v2065_v42  ;;  %2168 = vmatpush.msra.mxu2 %v2066_v17  ;;  %v4903_v57 = vunpack.i.l.bf16 %v4902_v25  ;;  %v4904_v52 = vunpack.i.h.bf16 %v4902_v25 }
 0xf1e   : > { %v4899_v35 = vunpack.i.h.bf16 %v4897_v19  ;;  %v4898_v33 = vunpack.i.l.bf16 %v4897_v19  ;;  %v4919_v19 = vunpack.i.h.bf16 %v4917_v11 }
 0xf1f   : > { %2129 = vmatpush.msrb.mxu3 %v2063_v13  ;;  %2169 = vmatpush.msra.mxu2 %v2064_v23  ;;  %v2052_v23 = vsel %vm582_vm6, %v4908_v58, %v4909_v4  ;;  %v2051_v46 = vsel %vm582_vm6, %v4904_v52, %v4908_v58 }
 0xf20   : > { %v2053_v42 = vsel %vm582_vm6, %v4898_v33, %v4899_v35  ;;  %v2054_v17 = vsel %vm582_vm6, %v4899_v35, %v4903_v57 }
 0xf24   : > { %v4912_v41 = vpop.permute.xlu2 %4911 }
 0xf25   : > { %v4922_v14 = vpop.permute.xlu0 %4921  ;;  %v4913_v7 = vunpack.i.l.bf16 %v4912_v41  ;;  %v4914_v49 = vunpack.i.h.bf16 %v4912_v41 }
 0xf26   : > { %v4924_v20 = vunpack.i.h.bf16 %v4922_v14  ;;  %v4923_v15 = vunpack.i.l.bf16 %v4922_v14 }
 0xf28   : > { %v2061_v47 = vsel %vm582_vm6, %v4923_v15, %v4924_v20  ;;  %v2062_v31 = vsel %vm582_vm6, %v4924_v20, %v4863_v2  ;;  %v2049_v2 = vsel %vm582_vm6, %v6218_v12, %v4913_v7 }
 0xf29   : > { %2130 = vmatpush.msrb.mxu3 %v2061_v47  ;;  %2170 = vmatpush.msra.mxu2 %v2062_v31  ;;  %v2050_v47 = vsel %vm582_vm6, %v4913_v7, %v4914_v49  ;;  %v2079_v31 = vsel %vm582_vm6, %v4918_v36, %v4919_v19 }
 0xf2b   : > { %2131 = vmatpush.msrb.mxu3 %v2059_v54  ;;  %2171 = vmatpush.msra.mxu2 %v2060_v8  ;;  %v4208_v54 = vld [vmem:[%s7743_s3 + $0x28] sm:$0xff] }
 0xf2c   : > { %v4942_v25 = vpop.permute.xlu2 %4941 }
 0xf2d   : > { %v4927_v51 = vpop.permute.xlu0 %4926  ;;  %v4944_v15 = vunpack.i.h.bf16 %v4942_v25  ;;  %v4943_v34 = vunpack.i.l.bf16 %v4942_v25 }
 0xf2e   : > { %v4929_v63 = vunpack.i.h.bf16 %v4927_v51  ;;  %v4928_v26 = vunpack.i.l.bf16 %v4927_v51 }
 0xf2f   : > { %v2080_v38 = vsel %vm582_vm6, %v4919_v19, %v4944_v15 }
 0xf30   : > { %v2057_v45 = vsel %vm582_vm6, %v4928_v26, %v4929_v63  ;;  %v2058_v21 = vsel %vm582_vm6, %v4929_v63, %v4888_v40 }
 0xf31   : > { %2132 = vmatpush.msrb.mxu3 %v2057_v45  ;;  %2172 = vmatpush.msra.mxu2 %v2058_v21 }
 0xf33   : > { %2133 = vmatpush.msrb.mxu3 %v2055_v9  ;;  %2173 = vmatpush.msra.mxu2 %v2056_v50 }
 0xf35   : > { %v4932_v13 = vpop.permute.xlu0 %4931  ;;  %2134 = vmatpush.msrb.mxu3 %v2053_v42  ;;  %2174 = vmatpush.msra.mxu2 %v2054_v17 }
 0xf36   : > { %v4934_v44 = vunpack.i.h.bf16 %v4932_v13  ;;  %v4933_v14 = vunpack.i.l.bf16 %v4932_v13 }
 0xf37   : > { %2135 = vmatpush.msrb.mxu3 %v2051_v46  ;;  %2175 = vmatpush.msra.mxu2 %v2052_v23 }
 0xf38   : > { %v2081_v20 = vsel %vm582_vm6, %v4933_v14, %v4934_v44  ;;  %v2082_v8 = vsel %vm582_vm6, %v4934_v44, %v4943_v34 }
 0xf39   : > { %2136 = vmatpush.msrb.mxu3 %v2049_v2  ;;  %2156 = vmatpush.msra.mxu0 %v2081_v20 }
 0xf3a   : > { %2176 = vmatpush.msra.mxu2 %v2050_v47  ;;  %v4211_v47 = vld [vmem:[%s7742_s2 + $0x60] sm:$0xff] }
 0xf3b   : > { %2157 = vmatpush.msra.mxu0 %v2079_v31  ;;  %v4212_v31 = vld [vmem:[%s7742_s2 + $0x68] sm:$0xff] }
 0xf3c   : > { %4209 = vmatmul.msk.f32.vlgmr.msra.gmra.mxu0 %vm921_vm15, %v4208_v54 }
 0xf3d   : > { %2196 = vmatpush.msrb.mxu0 %v2082_v8  ;;  %v4937_v41 = vpop.permute.xlu0 %4936 }
 0xf3e   : > { %v4939_v3 = vunpack.i.h.bf16 %v4937_v41  ;;  %v4938_v51 = vunpack.i.l.bf16 %v4937_v41 }
 0xf3f   : > { %2197 = vmatpush.msrb.mxu0 %v2080_v38 }
 0xf40   : > { %v2047_v40 = vsel %vm582_vm6, %v6218_v12, %v4938_v51  ;;  %v2048_v63 = vsel %vm582_vm6, %v4938_v51, %v4939_v3 }
 0xf41   : > { %2137 = vmatpush.msrb.mxu3 %v2047_v40  ;;  %2177 = vmatpush.msra.mxu2 %v2048_v63 }
 0xf42   : > { %2138 = vmatmul.f32.vlgmr.msrb.gmra.mxu3 %v4207_v6  ;;  %2178 = vmatmul.f32.vlgmr.msra.gmra.mxu2 %v4207_v6 }
 0xf44   : > { %4210 = vmatmul.msk.f32.vlgmr.msrb.gmra.mxu0 %vm921_vm15, %v4208_v54 }
 0xfb9   : > { %v2159_v26 = vpop.f32.mrf.mxu0 }
 0xfc1   : > { %v2199_v57 = vpop.f32.mrf.mxu0 }
 0xfc5   : > { %v2139_v35 = vpop.f32.mrf.mxu3  ;;  %v2179_v33 = vpop.f32.mrf.mxu2 }
 0xfc6   : > { %v2160_v45 = vadd.f32 %v2159_v26, %v2139_v35  ;;  %v2200_v21 = vadd.f32 %v2199_v57, %v2179_v33 }
 0xfc8   : > { %v2202_v4 = vadd.f32 %v2200_v21, %v2160_v45 }
 0xfca   : > { %2203 = vadd.xlane.f32.xlu1 %v2202_v4 }
0x103d   : > { %v2204_v58 = vpop.xlane.xlu1 %2203 }
0x103e   : > { %v2205_v11 = vmul.f32 %v2204_v58, %v5734_v53 }
0x1040   : > { %v2206_v52 = vsub.f32 %v2160_v45, %v2205_v11  ;;  %v2207_v9 = vsub.f32 %v2200_v21, %v2205_v11 }
0x1042   : > { %v2208_v50 = vmul.f32 %v2206_v52, %v2206_v52  ;;  %v2209_v7 = vmul.f32 %v2207_v9, %v2207_v9 }
0x1044   : > { %v2210_v42 = vadd.f32 %v2209_v7, %v2208_v50 }
0x1046   : > { %2211 = vadd.xlane.f32.xlu0 %v2210_v42 }
0x10b9   : > { %v2212_v17 = vpop.xlane.xlu0 %2211 }
0x10ba   : > { %v2213_v19 = vmul.f32 %v2212_v17, %v5734_v53 }
0x10bc   : > { %v2214_v49 = vadd.f32 1e-05, %v2213_v19 }
0x10be   : > { %5599 = vrsqrt.f32 %v2214_v49  ;;  %vm2221_vm3 = vweird.f32 %v2214_v49 }
0x10c4   : > { %v5600_v13 = vpop.eup %5599 }
0x10c5   : > { %v2216_v23 = vmul.f32 %v5600_v13, %v2214_v49  ;;  %vm2222_vm0 = vweird.f32 %v5600_v13 }
0x10c6   : > { %vm2223_vm4 = vmor %vm2221_vm3, %vm2222_vm0 }
0x10c7   : > { %v2217_v36 = vmul.f32 %v5600_v13, %v2216_v23  ;;  %vm7762_vm0 = vmmov %vm7760_vm1 }
0x10c9   : > { %v2218_v25 = vmul.f32 0.5, %v2217_v36 }
0x10cb   : > { %v2219_v44 = vsub.f32 1.5, %v2218_v25 }
0x10cd   : > { %v2220_v14 = vmul.f32 %v5600_v13, %v2219_v44 }
0x10cf   : > { %v2224_v46 = vsel %vm2223_vm4, %v5600_v13, %v2220_v14 }
0x10d0   : > { %v6839_v2 = vmul.f32 %v2224_v46, %v2206_v52  ;;  %v6841_v20 = vmul.f32 %v2224_v46, %v2207_v9 }
0x10d2   : > { %v2227_v15 = vmax.f32 %v6839_v2, 0.0  ;;  %v2228_v34 = vmax.f32 %v6841_v20, 0.0  ;;  %v4222_v2 = vld [vmem:[%s7742_s2 + $0x80] sm:$0xff] }
0x10d4   : > { %2251 = vmatpush.msrb.mxu1 %v2227_v15  ;;  %2274 = vmatpush.msra.mxu0 %v2228_v34 }
0x10d6   : > { %2252 = vmatpush.msrb.mxu1 %v6581_v24  ;;  %2275 = vmatpush.msra.mxu0 %v6583_v39 }
0x10d8   : > { %2253 = vmatpush.msrb.mxu1 %v6587_v5  ;;  %2276 = vmatpush.msra.mxu0 %v6589_v18 }
0x10d9   : > { %4213 = vmatmul.msk.f32.vlgmr.msrb.gmra.mxu1 %vm7759_vm5, %v4211_v47  ;;  %4215 = vmatmul.msk.f32.vlgmr.msra.gmra.mxu0 %vm7760_vm1, %v4211_v47 }
0x10e1   : > { %4214 = vmatmul.msk.f32.gmra.mxu1 %vm7761_vm2, %v4212_v31  ;;  %4216 = vmatmul.msk.f32.gmra.mxu0 %vm7762_vm0, %v4212_v31 }
0x1156   : > { %v2255_v54 = vpop.f32.mrf.mxu1  ;;  %v2278_v8 = vpop.f32.mrf.mxu0 }
0x1157   : > { %v2284_v41 = vadd.f32 %v2278_v8, %v2255_v54 }
0x1159   : > { %2285 = vadd.xlane.f32.xlu1 %v2284_v41 }
0x115e   : > { %v2258_v38 = vpop.f32.mrf.mxu1  ;;  %v2281_v3 = vpop.f32.mrf.mxu0 }
0x115f   : > { %v2287_v51 = vadd.f32 %v2281_v3, %v2258_v38 }
0x1161   : > { %2288 = vadd.xlane.f32.xlu2 %v2287_v51 }
0x11cc   : > { %v2286_v6 = vpop.xlane.xlu1 %2285 }
0x11cd   : > { %v2290_v40 = vmul.f32 %v2286_v6, %v5734_v53 }
0x11cf   : > { %v2292_v63 = vsub.f32 %v2255_v54, %v2290_v40  ;;  %v2293_v26 = vsub.f32 %v2278_v8, %v2290_v40 }
0x11d1   : > { %v2296_v57 = vmul.f32 %v2292_v63, %v2292_v63  ;;  %v2297_v35 = vmul.f32 %v2293_v26, %v2293_v26 }
0x11d3   : > { %v2300_v33 = vadd.f32 %v2297_v35, %v2296_v57 }
0x11d4   : > { %v2289_v45 = vpop.xlane.xlu2 %2288 }
0x11d5   : > { %v2291_v21 = vmul.f32 %v2289_v45, %v5734_v53  ;;  %2301 = vadd.xlane.f32.xlu2 %v2300_v33 }
0x11d7   : > { %v2294_v4 = vsub.f32 %v2258_v38, %v2291_v21  ;;  %v2295_v58 = vsub.f32 %v2281_v3, %v2291_v21 }
0x11d9   : > { %v2298_v11 = vmul.f32 %v2294_v4, %v2294_v4  ;;  %v2299_v52 = vmul.f32 %v2295_v58, %v2295_v58 }
0x11db   : > { %v2303_v9 = vadd.f32 %v2299_v52, %v2298_v11 }
0x11dd   : > { %2304 = vadd.xlane.f32.xlu0 %v2303_v9 }
0x1248   : > { %v2302_v50 = vpop.xlane.xlu2 %2301 }
0x1249   : > { %v2306_v7 = vmul.f32 %v2302_v50, %v5734_v53 }
0x124b   : > { %v2308_v42 = vadd.f32 1e-05, %v2306_v7 }
0x124d   : > { %5601 = vrsqrt.f32 %v2308_v42  ;;  %vm2316_vm4 = vweird.f32 %v2308_v42 }
0x1250   : > { %v2305_v17 = vpop.xlane.xlu0 %2304 }
0x1251   : > { %v2307_v19 = vmul.f32 %v2305_v17, %v5734_v53 }
0x1253   : > { %v5602_v49 = vpop.eup %5601  ;;  %v2309_v13 = vadd.f32 1e-05, %v2307_v19 }
0x1254   : > { %v2311_v23 = vmul.f32 %v5602_v49, %v2308_v42  ;;  %vm2317_vm3 = vweird.f32 %v5602_v49 }
0x1255   : > { %5603 = vrsqrt.f32 %v2309_v13  ;;  %vm2318_vm5 = vmor %vm2316_vm4, %vm2317_vm3  ;;  %vm2326_vm2 = vweird.f32 %v2309_v13 }
0x1256   : > { %v2312_v36 = vmul.f32 %v5602_v49, %v2311_v23 }
0x1258   : > { %v2313_v25 = vmul.f32 0.5, %v2312_v36 }
0x125a   : > { %v2314_v44 = vsub.f32 1.5, %v2313_v25 }
0x125b   : > { %v5604_v14 = vpop.eup %5603 }
0x125c   : > { %v2315_v46 = vmul.f32 %v5602_v49, %v2314_v44  ;;  %v2321_v47 = vmul.f32 %v5604_v14, %v2309_v13  ;;  %vm2327_vm1 = vweird.f32 %v5604_v14 }
0x125d   : > { %vm2328_vm0 = vmor %vm2326_vm2, %vm2327_vm1  ;;  %vm7752_vm1 = vcmask 261120  }
0x125e   : > { %v2319_v31 = vsel %vm2318_vm5, %v5602_v49, %v2315_v46  ;;  %v2322_v54 = vmul.f32 %v5604_v14, %v2321_v47 }
0x125f   : > { %v2330_v8 = vmul.f32 %v2319_v31, %v2292_v63  ;;  %v2331_v41 = vmul.f32 %v2319_v31, %v2293_v26 }
0x1260   : > { %v2323_v38 = vmul.f32 0.5, %v2322_v54 }
0x1261   : > { %v2334_v3 = vmax.f32 %v2330_v8, 0.0  ;;  %v2335_v51 = vmax.f32 %v2331_v41, 0.0 }
0x1262   : > { %v2324_v6 = vsub.f32 1.5, %v2323_v38 }
0x1263   : > { %v4950_v40 = vpack.i.bf16 %v2335_v51, %v2334_v3  ;;  %v2350_v57 = vmul.f32 %v5868_v55, %v2334_v3  ;;  %v2351_v35 = vmul.f32 %v2335_v51, %v5875_v59  ;;  %v2358_v11 = vmul.f32 %v5881_v61, %v2334_v3 }
0x1264   : > { %v2325_v33 = vmul.f32 %v5604_v14, %v2324_v6  ;;  %v2359_v52 = vmul.f32 %v2335_v51, %v5892_v0  ;;  %v6875_v9 = vmul.f32 %v2334_v3, %v5823_v27  ;;  %v6878_v50 = vmul.f32 %v5796_v16, %v2335_v51 }
0x1265   : > { %4951 = vrot.lane.b32.xlu1 %v4950_v40, %s5641_s9  ;;  %4946 = vrot.lane.b32.xlu0 %v4950_v40, %s5644_s12  ;;  %v4965_v45 = vpack.i.bf16 %v2351_v35, %v2350_v57  ;;  %v2346_v7 = vmul.f32 %v2334_v3, %v5807_v22  ;;  %v2347_v42 = vmul.f32 %v5793_v10, %v2335_v51 }
0x1266   : > { %v2329_v63 = vsel %vm2328_vm0, %v5604_v14, %v2325_v33  ;;  %v4970_v19 = vpack.i.bf16 %v2359_v52, %v2358_v11  ;;  %v2354_v13 = vmul.f32 %v5849_v43, %v2334_v3  ;;  %v2355_v23 = vmul.f32 %v2335_v51, %v5857_v48 }
0x1267   : > { %v2332_v26 = vmul.f32 %v2329_v63, %v2294_v4  ;;  %v2333_v21 = vmul.f32 %v2329_v63, %v2295_v58  ;;  %4966 = vrot.lane.b32.xlu2 %v4965_v45, %s5646_s14  ;;  %v5150_v4 = vpack.i.bf16 %v6878_v50, %v6875_v9  ;;  %v4975_v49 = vpack.i.bf16 %v2347_v42, %v2346_v7 }
0x1268   : > { %v2342_v36 = vmul.f32 %v2334_v3, %v5837_v37  ;;  %v2343_v25 = vmul.f32 %v5817_v29, %v2335_v51  ;;  %v4960_v47 = vpack.i.bf16 %v2355_v23, %v2354_v13 }
0x1269   : > { %v2336_v58 = vmax.f32 %v2332_v26, 0.0  ;;  %v2337_v17 = vmax.f32 %v2333_v21, 0.0 }
0x126a   : > { %v4980_v31 = vpack.i.bf16 %v2343_v25, %v2342_v36 }
0x126b   : > { %v6892_v44 = vmul.f32 %v2336_v58, %v5823_v27  ;;  %v6895_v14 = vmul.f32 %v5796_v16, %v2337_v17  ;;  %v4995_v54 = vpack.i.bf16 %v2337_v17, %v2336_v58  ;;  %v2356_v8 = vmul.f32 %v5849_v43, %v2336_v58 }
0x126c   : > { %v2357_v41 = vmul.f32 %v2337_v17, %v5857_v48  ;;  %v2348_v3 = vmul.f32 %v2336_v58, %v5807_v22  ;;  %v2349_v51 = vmul.f32 %v5793_v10, %v2337_v17  ;;  %v2352_v6 = vmul.f32 %v5868_v55, %v2336_v58 }
0x126d   : > { %4956 = vrot.lane.b32.xlu0 %v4950_v40, %s5635_s25  ;;  %4971 = vrot.lane.b32.xlu1 %v4970_v19, %s5640_s8  ;;  %v5145_v46 = vpack.i.bf16 %v6895_v14, %v6892_v44  ;;  %v2353_v40 = vmul.f32 %v2337_v17, %v5875_v59  ;;  %v2360_v57 = vmul.f32 %v5881_v61, %v2336_v58 }
0x126e   : > { %v5000_v38 = vpack.i.bf16 %v2357_v41, %v2356_v8  ;;  %v2361_v35 = vmul.f32 %v2337_v17, %v5892_v0  ;;  %v5015_v33 = vpack.i.bf16 %v2349_v51, %v2348_v3  ;;  %v2344_v26 = vmul.f32 %v2336_v58, %v5837_v37 }
0x126f   : > { %4976 = vrot.lane.b32.xlu2 %v4975_v49, %s5639_s7  ;;  %v5005_v45 = vpack.i.bf16 %v2353_v40, %v2352_v6  ;;  %v2345_v21 = vmul.f32 %v5817_v29, %v2337_v17 }
0x1270   : > { %v5010_v63 = vpack.i.bf16 %v2361_v35, %v2360_v57 }
0x1271   : > { %v5020_v11 = vpack.i.bf16 %v2345_v21, %v2344_v26 }
0x1275   : > { %4961 = vrot.lane.b32.xlu0 %v4960_v47, %s5645_s13  ;;  %4981 = vrot.lane.b32.xlu1 %v4980_v31, %s5643_s11 }
0x1277   : > { %4996 = vrot.lane.b32.xlu2 %v4995_v54, %s5635_s25 }
0x127d   : > { %4991 = vrot.lane.b32.xlu0 %v4995_v54, %s5641_s9  ;;  %4986 = vrot.lane.b32.xlu1 %v4995_v54, %s5644_s12 }
0x127f   : > { %5001 = vrot.lane.b32.xlu2 %v5000_v38, %s5645_s13 }
0x1285   : > { %5016 = vrot.lane.b32.xlu0 %v5015_v33, %s5639_s7  ;;  %5006 = vrot.lane.b32.xlu1 %v5005_v45, %s5646_s14 }
0x1287   : > { %5011 = vrot.lane.b32.xlu2 %v5010_v63, %s5640_s8 }
0x128d   : > { %5021 = vrot.lane.b32.xlu0 %v5020_v11, %s5643_s11 }
0x12c1   : > { %v6919_v52 = vpop.permute.xlu2 %4966 }
0x12c9   : > { %v4977_v7 = vpop.permute.xlu2 %4976 }
0x12ca   : > { %v4979_v42 = vunpack.i.h.bf16 %v4977_v7  ;;  %v4978_v19 = vunpack.i.l.bf16 %v4977_v7 }
0x12cc   : > { %v2407_v49 = vsel %vm646_vm9, %v4978_v19, %v4979_v42  ;;  %v2406_v40 = vsel %vm646_vm9, %v5788_v1, %v4978_v19 }
0x12cd   : > { %v5050_v13 = vpack.i.bf16 %v4979_v42, %v2407_v49 }
0x12cf   : > { %5051 = vrot.lane.b32.xlu2 %v5050_v13, %s5636_s30  ;;  %v4969_v13 = vunpack.i.h.bf16 %v6919_v52 }
0x12d7   : > { %v4952_v23 = vpop.permute.xlu1 %4951  ;;  %v4947_v36 = vpop.permute.xlu0 %4946 }
0x12d8   : > { %v4949_v25 = vunpack.i.h.bf16 %v4947_v36  ;;  %v4948_v47 = vunpack.i.l.bf16 %v4947_v36  ;;  %v4954_v54 = vunpack.i.h.bf16 %v4952_v23  ;;  %v4953_v8 = vunpack.i.l.bf16 %v4952_v23 }
0x12da   : > { %v2461_v58 = vsel %vm711_vm7, %v4949_v25, %v5945_v60  ;;  %v2460_v17 = vsel %vm711_vm7, %v4948_v47, %v4949_v25  ;;  %v2418_v3 = vsel %vm510_vm14, %v4953_v8, %v4954_v54  ;;  %v4968_v25 = vunpack.i.l.bf16 %v6919_v52 }
0x12db   : > { %v5025_v31 = vpack.i.bf16 %v2461_v58, %v2460_v17  ;;  %v5030_v35 = vpack.i.bf16 %v4954_v54, %v2418_v3  ;;  %v6947_v58 = vpop.permute.xlu2 %4996  ;;  %v2433_v17 = vsel %vm676_vm11, %v4969_v13, %v5994_v28 }
0x12dc   : > { %v2432_v3 = vsel %vm676_vm11, %v4968_v25, %v4969_v13 }
0x12dd   : > { %5026 = vrot.lane.b32.xlu0 %v5025_v31, %s5636_s30  ;;  %v5040_v52 = vpack.i.bf16 %v2433_v17, %v2432_v3 }
0x12df   : > { %v6927_v41 = vpop.permute.xlu0 %4956  ;;  %v6929_v38 = vpop.permute.xlu1 %4971 }
0x12e0   : > { %v4974_v51 = vunpack.i.h.bf16 %v6929_v38  ;;  %v4973_v6 = vunpack.i.l.bf16 %v6929_v38 }
0x12e2   : > { %v2476_v57 = vsel %vm731_vm12, %v4973_v6, %v4974_v51 }
0x12e3   : > { %v5045_v33 = vpack.i.bf16 %v2406_v40, %v2476_v57 }
0x12e5   : > { %5031 = vrot.lane.b32.xlu0 %v5030_v35, %s5636_s30  ;;  %5046 = vrot.lane.b32.xlu1 %v5045_v33, %s5636_s30 }
0x12e7   : > { %v4962_v45 = vpop.permute.xlu0 %4961  ;;  %v4982_v63 = vpop.permute.xlu1 %4981 }
0x12e8   : > { %v4964_v26 = vunpack.i.h.bf16 %v4962_v45  ;;  %v4963_v21 = vunpack.i.l.bf16 %v4962_v45  ;;  %v4984_v11 = vunpack.i.h.bf16 %v4982_v63  ;;  %v4983_v7 = vunpack.i.l.bf16 %v4982_v63 }
0x12ea   : > { %v2449_v42 = vsel %vm696_vm10, %v4964_v26, %v5982_v62  ;;  %v2448_v19 = vsel %vm696_vm10, %v4963_v21, %v4964_v26  ;;  %v2391_v49 = vsel %vm626_vm8, %v4983_v7, %v4984_v11 }
0x12eb   : > { %v5035_v23 = vpack.i.bf16 %v2449_v42, %v2448_v19  ;;  %v5055_v36 = vpack.i.bf16 %v4984_v11, %v2391_v49  ;;  %v5002_v11 = vpop.permute.xlu2 %5001 }
0x12ec   : > { %v5004_v17 = vunpack.i.h.bf16 %v5002_v11 }
0x12ed   : > { %5036 = vrot.lane.b32.xlu0 %v5035_v23, %s5636_s30  ;;  %5056 = vrot.lane.b32.xlu2 %v5055_v36, %s5636_s30 }
0x12ef   : > { %v4992_v31 = vpop.permute.xlu0 %4991  ;;  %v4987_v54 = vpop.permute.xlu1 %4986 }
0x12f0   : > { %v4994_v40 = vunpack.i.h.bf16 %v4992_v31  ;;  %v4989_v57 = vunpack.i.h.bf16 %v4987_v54  ;;  %v4988_v35 = vunpack.i.l.bf16 %v4987_v54  ;;  %v4993_v26 = vunpack.i.l.bf16 %v4992_v31 }
0x12f2   : > { %v5060_v33 = vpack.i.bf16 %v4953_v8, %v4994_v40  ;;  %v2462_v45 = vsel %vm711_vm7, %v4988_v35, %v4989_v57  ;;  %v2419_v19 = vsel %vm510_vm14, %v4993_v26, %v4994_v40  ;;  %v2463_v13 = vsel %vm711_vm7, %v4989_v57, %v5945_v60 }
0x12f3   : > { %v5065_v63 = vpack.i.bf16 %v2462_v45, %v4988_v35  ;;  %v5075_v23 = vpack.i.bf16 %v2419_v19, %v4993_v26  ;;  %v5070_v36 = vpack.i.bf16 %v4948_v47, %v2463_v13  ;;  %v5012_v35 = vpop.permute.xlu2 %5011  ;;  %v2390_v40 = vsel %vm626_vm8, %v5929_v32, %v4983_v7 }
0x12f4   : > { %v2451_v45 = vsel %vm696_vm10, %v5004_v17, %v5982_v62  ;;  %v5014_v26 = vunpack.i.h.bf16 %v5012_v35  ;;  %v4998_v7 = vunpack.i.l.bf16 %v6947_v58 }
0x12f5   : > { %5041 = vrot.lane.b32.xlu0 %v5040_v52, %s5636_s30  ;;  %5066 = vrot.lane.b32.xlu1 %v5065_v63, %s5636_s30  ;;  %v5003_v63 = vunpack.i.l.bf16 %v5002_v11  ;;  %v5095_v19 = vpack.i.bf16 %v4963_v21, %v2451_v45 }
0x12f6   : > { %5061 = vrot.lane.b32.xlu2 %v5060_v33, %s5636_s30  ;;  %v2376_v21 = vsel %vm540_vm13, %v5925_v30, %v4998_v7 }
0x12f7   : > { %v5017_v42 = vpop.permute.xlu0 %5016  ;;  %v5007_v33 = vpop.permute.xlu1 %5006 }
0x12f8   : > { %v5019_v49 = vunpack.i.h.bf16 %v5017_v42  ;;  %v5009_v13 = vunpack.i.h.bf16 %v5007_v33 }
0x12fa   : > { %v5080_v8 = vpack.i.bf16 %v4973_v6, %v5019_v49 }
0x12fd   : > { %5081 = vrot.lane.b32.xlu0 %v5080_v8, %s5636_s30  ;;  %5076 = vrot.lane.b32.xlu1 %v5075_v23, %s5636_s30  ;;  %v2450_v8 = vsel %vm696_vm10, %v5003_v63, %v5004_v17  ;;  %v2479_v23 = vsel %vm731_vm12, %v5014_v26, %v5784_v56 }
0x12fe   : > { %5071 = vrot.lane.b32.xlu2 %v5070_v36, %s5636_s30  ;;  %v2435_v36 = vsel %vm676_vm11, %v5009_v13, %v5994_v28  ;;  %v5090_v11 = vpack.i.bf16 %v2450_v8, %v5003_v63 }
0x12ff   : > { %v5022_v31 = vpop.permute.xlu0 %5021 }
0x1300   : > { %v5024_v54 = vunpack.i.h.bf16 %v5022_v31  ;;  %v5023_v3 = vunpack.i.l.bf16 %v5022_v31  ;;  %v5135_v31 = vpack.i.bf16 %v2376_v21, %v2479_v23 }
0x1302   : > { %v2392_v6 = vsel %vm626_vm8, %v5929_v32, %v5023_v3  ;;  %v2393_v47 = vsel %vm626_vm8, %v5023_v3, %v5024_v54  ;;  %v5085_v57 = vpack.i.bf16 %v2390_v40, %v5024_v54  ;;  %v4959_v54 = vunpack.i.h.bf16 %v6927_v41 }
0x1303   : > { %v5130_v52 = vpack.i.bf16 %v2393_v47, %v2392_v6  ;;  %v4958_v3 = vunpack.i.l.bf16 %v6927_v41  ;;  %v5105_v40 = vpack.i.bf16 %v4968_v25, %v2435_v36  ;;  %v5008_v6 = vunpack.i.l.bf16 %v5007_v33 }
0x1304   : > { %v5018_v47 = vunpack.i.l.bf16 %v5017_v42  ;;  %v5013_v25 = vunpack.i.l.bf16 %v5012_v35  ;;  %v4999_v35 = vunpack.i.h.bf16 %v6947_v58 }
0x1305   : > { %5131 = vrot.lane.b32.xlu0 %v5130_v52, %s5636_s30  ;;  %5086 = vrot.lane.b32.xlu1 %v5085_v57, %s5636_s30  ;;  %v2375_v17 = vsel %vm540_vm13, %v4958_v3, %v4959_v54  ;;  %v2434_v57 = vsel %vm676_vm11, %v5008_v6, %v5009_v13 }
0x1306   : > { %5096 = vrot.lane.b32.xlu2 %v5095_v19, %s5636_s30  ;;  %v2408_v45 = vsel %vm646_vm9, %v5788_v1, %v5018_v47  ;;  %v2409_v52 = vsel %vm646_vm9, %v5018_v47, %v5019_v49  ;;  %v5140_v63 = vpack.i.bf16 %v4959_v54, %v2375_v17  ;;  %v5100_v41 = vpack.i.bf16 %v2434_v57, %v5008_v6 }
0x1307   : > { %v5120_v33 = vpack.i.bf16 %v2409_v52, %v2408_v45  ;;  %v2478_v42 = vsel %vm731_vm12, %v5013_v25, %v5014_v26  ;;  %v2374_v19 = vsel %vm540_vm13, %v5925_v30, %v4958_v3  ;;  %v2477_v49 = vsel %vm731_vm12, %v4974_v51, %v5784_v56 }
0x1308   : > { %v5110_v13 = vpack.i.bf16 %v2478_v42, %v5013_v25  ;;  %v5125_v8 = vpack.i.bf16 %v2374_v19, %v2477_v49  ;;  %v2377_v23 = vsel %vm540_vm13, %v4998_v7, %v4999_v35 }
0x1309   : > { %v5115_v36 = vpack.i.bf16 %v4999_v35, %v2377_v23 }
0x130d   : > { %5136 = vrot.lane.b32.xlu0 %v5135_v31, %s5636_s30  ;;  %5091 = vrot.lane.b32.xlu1 %v5090_v11, %s5636_s30 }
0x130e   : > { %5106 = vrot.lane.b32.xlu2 %v5105_v40, %s5636_s30 }
0x1315   : > { %5141 = vrot.lane.b32.xlu0 %v5140_v63, %s5636_s30  ;;  %5101 = vrot.lane.b32.xlu1 %v5100_v41, %s5636_s30 }
0x1316   : > { %5121 = vrot.lane.b32.xlu2 %v5120_v33, %s5636_s30 }
0x131d   : > { %5111 = vrot.lane.b32.xlu1 %v5110_v13, %s5636_s30 }
0x131e   : > { %5126 = vrot.lane.b32.xlu2 %v5125_v8, %s5636_s30 }
0x1325   : > { %5116 = vrot.lane.b32.xlu1 %v5115_v36, %s5636_s30 }
0x1326   : > { %5151 = vrot.lane.b32.xlu2 %v5150_v4, %s5636_s30 }
0x1329   : > { %v7015_v38 = vpop.permute.xlu2 %5051 }
0x132d   : > { %5146 = vrot.lane.b32.xlu1 %v5145_v46, %s5636_s30 }
0x1347   : > { %v7017_v58 = vpop.permute.xlu2 %5056 }
0x134f   : > { %v5027_v51 = vpop.permute.xlu0 %5026 }
0x1350   : > { %v7021_v7 = vpop.permute.xlu2 %5061  ;;  %v5029_v9 = vunpack.i.h.bf16 %v5027_v51  ;;  %v5028_v50 = vunpack.i.l.bf16 %v5027_v51 }
0x1352   : > { %v2620_v47 = vsel %vm582_vm6, %v5028_v50, %v5029_v9 }
0x1357   : > { %v7019_v26 = vpop.permute.xlu0 %5031  ;;  %v7023_v21 = vpop.permute.xlu1 %5046 }
0x1358   : > { %v5072_v31 = vpop.permute.xlu2 %5071 }
0x1359   : > { %v5074_v54 = vunpack.i.h.bf16 %v5072_v31  ;;  %v5073_v3 = vunpack.i.l.bf16 %v5072_v31 }
0x135b   : > { %v2619_v6 = vsel %vm582_vm6, %v5074_v54, %v5028_v50 }
0x135f   : > { %v5037_v11 = vpop.permute.xlu0 %5036 }
0x1360   : > { %v5097_v45 = vpop.permute.xlu2 %5096  ;;  %v5039_v25 = vunpack.i.h.bf16 %v5037_v11  ;;  %v5038_v33 = vunpack.i.l.bf16 %v5037_v11 }
0x1361   : > { %v5099_v19 = vunpack.i.h.bf16 %v5097_v45  ;;  %v5098_v49 = vunpack.i.l.bf16 %v5097_v45  ;;  %v5033_v45 = vunpack.i.l.bf16 %v7019_v26 }
0x1362   : > { %v2616_v31 = vsel %vm582_vm6, %v5038_v33, %v5039_v25  ;;  %v5063_v25 = vunpack.i.l.bf16 %v7021_v7 }
0x1363   : > { %v2615_v51 = vsel %vm582_vm6, %v5099_v19, %v5038_v33 }
0x1367   : > { %v5067_v4 = vpop.permute.xlu1 %5066  ;;  %v5042_v17 = vpop.permute.xlu0 %5041 }
0x1368   : > { %v5069_v44 = vunpack.i.h.bf16 %v5067_v4  ;;  %v5068_v14 = vunpack.i.l.bf16 %v5067_v4  ;;  %v5107_v41 = vpop.permute.xlu2 %5106  ;;  %v5044_v9 = vunpack.i.h.bf16 %v5042_v17  ;;  %v5043_v50 = vunpack.i.l.bf16 %v5042_v17 }
0x1369   : > { %v5109_v54 = vunpack.i.h.bf16 %v5107_v41  ;;  %v5034_v17 = vunpack.i.h.bf16 %v7019_v26 }
0x136a   : > { %v2621_v46 = vsel %vm582_vm6, %v5068_v14, %v5069_v44  ;;  %v2622_v40 = vsel %vm582_vm6, %v5069_v44, %v5073_v3  ;;  %v5108_v3 = vunpack.i.l.bf16 %v5107_v41  ;;  %v2612_v33 = vsel %vm582_vm6, %v5043_v50, %v5044_v9 }
0x136b   : > { %2666 = vmatpush.msra.mxu1 %v2621_v46  ;;  %2706 = vmatpush.msrb.mxu0 %v2622_v40  ;;  %v2611_v41 = vsel %vm582_vm6, %v5109_v54, %v5043_v50  ;;  %v2608_v50 = vsel %vm582_vm6, %v5033_v45, %v5034_v17  ;;  %v5053_v54 = vunpack.i.l.bf16 %v7015_v38  ;;  %v5059_v17 = vunpack.i.h.bf16 %v7017_v58 }
0x136d   : > { %2667 = vmatpush.msra.mxu1 %v2619_v6  ;;  %2707 = vmatpush.msrb.mxu0 %v2620_v47 }
0x136f   : > { %v5077_v57 = vpop.permute.xlu1 %5076  ;;  %v7029_v52 = vpop.permute.xlu0 %5081 }
0x1370   : > { %v5122_v11 = vpop.permute.xlu2 %5121  ;;  %v5079_v46 = vunpack.i.h.bf16 %v5077_v57  ;;  %v5078_v40 = vunpack.i.l.bf16 %v5077_v57  ;;  %v5064_v57 = vunpack.i.h.bf16 %v7021_v7 }
0x1371   : > { %v5124_v19 = vunpack.i.h.bf16 %v5122_v11 }
0x1372   : > { %v2607_v26 = vsel %vm582_vm6, %v5064_v57, %v5033_v45 }
0x1377   : > { %v7031_v63 = vpop.permute.xlu1 %5086  ;;  %v7033_v8 = vpop.permute.xlu0 %5131 }
0x1378   : > { %v5127_v7 = vpop.permute.xlu2 %5126  ;;  %v5088_v45 = vunpack.i.l.bf16 %v7031_v63 }
0x137f   : > { %v5092_v42 = vpop.permute.xlu1 %5091 }
0x1380   : > { %v5094_v13 = vunpack.i.h.bf16 %v5092_v42  ;;  %v5093_v35 = vunpack.i.l.bf16 %v5092_v42  ;;  %v7042_v42 = vpop.permute.xlu0 %5136 }
0x1382   : > { %v2617_v23 = vsel %vm582_vm6, %v5093_v35, %v5094_v13  ;;  %v2618_v36 = vsel %vm582_vm6, %v5094_v13, %v5098_v49  ;;  %v5123_v49 = vunpack.i.l.bf16 %v5122_v11  ;;  %v5083_v13 = vunpack.i.l.bf16 %v7029_v52 }
0x1383   : > { %2668 = vmatpush.msra.mxu1 %v2617_v23  ;;  %2708 = vmatpush.msrb.mxu0 %v2618_v36  ;;  %v2609_v35 = vsel %vm582_vm6, %v5078_v40, %v5079_v46  ;;  %v2610_v23 = vsel %vm582_vm6, %v5079_v46, %v5063_v25  ;;  %v5049_v36 = vunpack.i.h.bf16 %v7023_v21  ;;  %v5133_v46 = vunpack.i.l.bf16 %v7033_v8 }
0x1384   : > { %v2606_v40 = vsel %vm582_vm6, %v5124_v19, %v5083_v13 }
0x1385   : > { %2669 = vmatpush.msra.mxu1 %v2615_v51  ;;  %2709 = vmatpush.msrb.mxu0 %v2616_v31  ;;  %v5084_v31 = vunpack.i.h.bf16 %v7029_v52 }
0x1387   : > { %v5102_v4 = vpop.permute.xlu1 %5101 }
0x1388   : > { %v5104_v44 = vunpack.i.h.bf16 %v5102_v4  ;;  %v5103_v14 = vunpack.i.l.bf16 %v5102_v4  ;;  %v5054_v4 = vunpack.i.h.bf16 %v7015_v38  ;;  %v5138_v38 = vunpack.i.l.bf16 %v7042_v42 }
0x138a   : > { %v2613_v6 = vsel %vm582_vm6, %v5103_v14, %v5104_v44  ;;  %v2614_v47 = vsel %vm582_vm6, %v5104_v44, %v5108_v3  ;;  %v5048_v3 = vunpack.i.l.bf16 %v7023_v21  ;;  %v2605_v44 = vsel %vm582_vm6, %v5123_v49, %v5124_v19 }
0x138b   : > { %2670 = vmatpush.msra.mxu1 %v2613_v6  ;;  %2710 = vmatpush.msrb.mxu0 %v2614_v47  ;;  %v5134_v14 = vunpack.i.h.bf16 %v7033_v8  ;;  %v5128_v6 = vunpack.i.l.bf16 %v5127_v7  ;;  %v5089_v47 = vunpack.i.h.bf16 %v7031_v63  ;;  %v2603_v21 = vsel %vm582_vm6, %v5049_v36, %v5053_v54  ;;  %v4218_v8 = vld [vmem:[%s7743_s3 + $0x38] sm:$0xff] }
0x138c   : > { %v2623_v25 = vsel %vm582_vm6, %v5084_v31, %v5048_v3  ;;  %v2604_v63 = vsel %vm582_vm6, %v5053_v54, %v5054_v4 }
0x138d   : > { %2671 = vmatpush.msra.mxu1 %v2611_v41  ;;  %2711 = vmatpush.msrb.mxu0 %v2612_v33  ;;  %v5058_v41 = vunpack.i.l.bf16 %v7017_v58  ;;  %v5142_v33 = vpop.permute.xlu0 %5141  ;;  %v2601_v19 = vsel %vm582_vm6, %v5133_v46, %v5134_v14  ;;  %v2602_v13 = vsel %vm582_vm6, %v5134_v14, %v5088_v45 }
0x138e   : > { %v5143_v36 = vunpack.i.l.bf16 %v5142_v33  ;;  %v5144_v31 = vunpack.i.h.bf16 %v5142_v33 }
0x138f   : > { %v5112_v51 = vpop.permute.xlu1 %5111  ;;  %2672 = vmatpush.msra.mxu1 %v2609_v35  ;;  %2712 = vmatpush.msrb.mxu0 %v2610_v23  ;;  %v2624_v35 = vsel %vm582_vm6, %v5048_v3, %v5128_v6  ;;  %v2599_v58 = vsel %vm582_vm6, %v5089_v47, %v5058_v41  ;;  %v5139_v23 = vunpack.i.h.bf16 %v7042_v42  ;;  %v5152_v42 = vpop.permute.xlu2 %5151  ;;  %v4217_v47 = vld [vmem:[%s7743_s3 + $0x30] sm:$0xff] }
0x1390   : > { %v5114_v9 = vunpack.i.h.bf16 %v5112_v51  ;;  %v5113_v11 = vunpack.i.l.bf16 %v5112_v51  ;;  %v2596_v3 = vsel %vm582_vm6, %v5143_v36, %v5144_v31  ;;  %v5154_v14 = vunpack.i.h.bf16 %v5152_v42 }
0x1391   : > { %2673 = vmatpush.msra.mxu1 %v2607_v26  ;;  %2713 = vmatpush.msrb.mxu0 %v2608_v50  ;;  %v5153_v46 = vunpack.i.l.bf16 %v5152_v42 }
0x1392   : > { %v2625_v52 = vsel %vm582_vm6, %v5113_v11, %v5114_v9  ;;  %v2626_v57 = vsel %vm582_vm6, %v5114_v9, %v5138_v38  ;;  %v2600_v9 = vsel %vm582_vm6, %v5058_v41, %v5059_v17  ;;  %v5129_v11 = vunpack.i.h.bf16 %v5127_v7 }
0x1393   : > { %2674 = vmatpush.msra.mxu1 %v2605_v44  ;;  %2700 = vmatpush.msra.mxu3 %v2625_v52  ;;  %v2591_v45 = vsel %vm582_vm6, %v6218_v12, %v5153_v46  ;;  %v2592_v38 = vsel %vm582_vm6, %v5153_v46, %v5154_v14 }
0x1394   : > { %2714 = vmatpush.msrb.mxu0 %v2606_v40  ;;  %v2595_v54 = vsel %vm582_vm6, %v5129_v11, %v5143_v36 }
0x1395   : > { %2675 = vmatpush.msra.mxu1 %v2603_v21  ;;  %2701 = vmatpush.msra.mxu3 %v2623_v25 }
0x1396   : > { %2715 = vmatpush.msrb.mxu0 %v2604_v63  ;;  %4219 = vmatmul.msk.f32.vlgmr.msra.gmra.mxu3 %vm921_vm15, %v4218_v8 }
0x1397   : > { %2740 = vmatpush.msrb.mxu3 %v2626_v57  ;;  %v5117_v49 = vpop.permute.xlu1 %5116  ;;  %2676 = vmatpush.msra.mxu1 %v2601_v19 }
0x1398   : > { %v5119_v51 = vunpack.i.h.bf16 %v5117_v49  ;;  %v5118_v26 = vunpack.i.l.bf16 %v5117_v49  ;;  %2716 = vmatpush.msrb.mxu0 %v2602_v13 }
0x1399   : > { %2741 = vmatpush.msrb.mxu3 %v2624_v35  ;;  %2677 = vmatpush.msra.mxu1 %v2599_v58 }
0x139a   : > { %2717 = vmatpush.msrb.mxu0 %v2600_v9  ;;  %v2597_v50 = vsel %vm582_vm6, %v5139_v23, %v5118_v26  ;;  %v2598_v4 = vsel %vm582_vm6, %v5118_v26, %v5119_v51 }
0x139b   : > { %2678 = vmatpush.msra.mxu1 %v2597_v50 }
0x139c   : > { %2718 = vmatpush.msrb.mxu0 %v2598_v4 }
0x139d   : > { %2679 = vmatpush.msra.mxu1 %v2595_v54 }
0x139e   : > { %2719 = vmatpush.msrb.mxu0 %v2596_v3  ;;  %4220 = vmatmul.msk.f32.vlgmr.msrb.gmra.mxu3 %vm921_vm15, %v4218_v8 }
0x139f   : > { %v5147_v44 = vpop.permute.xlu1 %5146 }
0x13a0   : > { %v5149_v7 = vunpack.i.h.bf16 %v5147_v44  ;;  %v5148_v52 = vunpack.i.l.bf16 %v5147_v44 }
0x13a2   : > { %v2593_v40 = vsel %vm582_vm6, %v6218_v12, %v5148_v52  ;;  %v2594_v6 = vsel %vm582_vm6, %v5148_v52, %v5149_v7  ;;  %v4221_v7 = vld [vmem:[%s7742_s2 + $0x78] sm:$0xff] }
0x13a3   : > { %2680 = vmatpush.msra.mxu1 %v2593_v40  ;;  %2720 = vmatpush.msrb.mxu0 %v2594_v6 }
0x13a5   : > { %2681 = vmatpush.msra.mxu1 %v2591_v45  ;;  %2721 = vmatpush.msrb.mxu0 %v2592_v38 }
0x13a6   : > { %2682 = vmatmul.f32.vlgmr.msra.gmra.mxu1 %v4217_v47  ;;  %2722 = vmatmul.f32.vlgmr.msrb.gmra.mxu0 %v4217_v47 }
0x1419   : > { %v2703_v21 = vpop.f32.mrf.mxu3 }
0x1421   : > { %v2743_v25 = vpop.f32.mrf.mxu3 }
0x1423   : > { %v2683_v8 = vpop.f32.mrf.mxu1  ;;  %v2723_v17 = vpop.f32.mrf.mxu0 }
0x1424   : > { %v2704_v41 = vadd.f32 %v2703_v21, %v2683_v8  ;;  %v2744_v33 = vadd.f32 %v2743_v25, %v2723_v17 }
0x1426   : > { %v2746_v63 = vadd.f32 %v2744_v33, %v2704_v41 }
0x1428   : > { %2747 = vadd.xlane.f32.xlu0 %v2746_v63 }
0x149b   : > { %v2748_v57 = vpop.xlane.xlu0 %2747 }
0x149c   : > { %v2749_v19 = vmul.f32 %v2748_v57, %v5734_v53 }
0x149e   : > { %v2750_v49 = vsub.f32 %v2704_v41, %v2749_v19  ;;  %v2751_v13 = vsub.f32 %v2744_v33, %v2749_v19 }
0x14a0   : > { %v2752_v35 = vmul.f32 %v2750_v49, %v2750_v49  ;;  %v2753_v58 = vmul.f32 %v2751_v13, %v2751_v13 }
0x14a2   : > { %v2754_v23 = vadd.f32 %v2753_v58, %v2752_v35 }
0x14a4   : > { %2755 = vadd.xlane.f32.xlu1 %v2754_v23 }
0x1517   : > { %v2756_v36 = vpop.xlane.xlu1 %2755 }
0x1518   : > { %v2757_v51 = vmul.f32 %v2756_v36, %v5734_v53 }
0x151a   : > { %v2758_v26 = vadd.f32 1e-05, %v2757_v51 }
0x151c   : > { %5605 = vrsqrt.f32 %v2758_v26  ;;  %vm2765_vm4 = vweird.f32 %v2758_v26 }
0x1522   : > { %v5606_v31 = vpop.eup %5605 }
0x1523   : > { %v2760_v9 = vmul.f32 %v5606_v31, %v2758_v26  ;;  %vm2766_vm3 = vweird.f32 %v5606_v31 }
0x1524   : > { %vm2767_vm5 = vmor %vm2765_vm4, %vm2766_vm3 }
0x1525   : > { %v2761_v11 = vmul.f32 %v5606_v31, %v2760_v9 }
0x1527   : > { %v2762_v50 = vmul.f32 0.5, %v2761_v11 }
0x1529   : > { %v2763_v4 = vsub.f32 1.5, %v2762_v50 }
0x152b   : > { %v2764_v54 = vmul.f32 %v5606_v31, %v2763_v4 }
0x152d   : > { %v2768_v42 = vsel %vm2767_vm5, %v5606_v31, %v2764_v54 }
0x152e   : > { %v2769_v3 = vmul.f32 %v2768_v42, %v2750_v49  ;;  %v2770_v44 = vmul.f32 %v2768_v42, %v2751_v13 }
0x1530   : > { %v2771_v14 = vmax.f32 %v2769_v3, 0.0  ;;  %v2772_v46 = vmax.f32 %v2770_v44, 0.0 }
0x1532   : > { %2795 = vmatpush.msrb.mxu2 %v2771_v14  ;;  %2818 = vmatpush.msra.mxu3 %v2772_v46 }
0x1534   : > { %2796 = vmatpush.msrb.mxu2 %v2227_v15  ;;  %2819 = vmatpush.msra.mxu3 %v2228_v34 }
0x1536   : > { %2797 = vmatpush.msrb.mxu2 %v6581_v24  ;;  %2820 = vmatpush.msra.mxu3 %v6583_v39 }
0x1538   : > { %2798 = vmatpush.msrb.mxu2 %v6587_v5  ;;  %2821 = vmatpush.msra.mxu3 %v6589_v18 }
0x1539   : > { %4223 = vmatmul.msk.f32.vlgmr.msrb.gmra.mxu2 %vm7752_vm1, %v4221_v7  ;;  %4225 = vmatmul.msk.f32.vlgmr.msra.gmra.mxu3 %vm7752_vm1, %v4221_v7 }
0x1541   : > { %4224 = vmatmul.msk.f32.gmra.mxu2 %vm7752_vm1, %v4222_v2  ;;  %4226 = vmatmul.msk.f32.gmra.mxu3 %vm7752_vm1, %v4222_v2 }
0x15bc   : > { %v2800_v24 = vpop.f32.mrf.mxu2  ;;  %v2823_v39 = vpop.f32.mrf.mxu3 }
0x15bd   : > { %v2829_v20 = vadd.f32 %v2823_v39, %v2800_v24 }
0x15bf   : > { %2830 = vadd.xlane.f32.xlu0 %v2829_v20 }
0x15c4   : > { %v2803_v15 = vpop.f32.mrf.mxu2  ;;  %v2826_v5 = vpop.f32.mrf.mxu3 }
0x15c5   : > { %v2832_v34 = vadd.f32 %v2826_v5, %v2803_v15 }
0x15c7   : > { %2833 = vadd.xlane.f32.xlu2 %v2832_v34  ;;  %v4227_v34 = vld [vmem:[%s7742_s2 + $0x90] sm:$0xff] }
0x1632   : > { %v2831_v18 = vpop.xlane.xlu0 %2830 }
0x1633   : > { %v2835_v52 = vmul.f32 %v2831_v18, %v5734_v53  ;;  %v4228_v18 = vld [vmem:[%s7742_s2 + $0x98] sm:$0xff] }
0x1635   : > { %v2837_v40 = vsub.f32 %v2800_v24, %v2835_v52  ;;  %v2838_v6 = vsub.f32 %v2823_v39, %v2835_v52 }
0x1637   : > { %v2841_v47 = vmul.f32 %v2837_v40, %v2837_v40  ;;  %v2842_v45 = vmul.f32 %v2838_v6, %v2838_v6 }
0x1639   : > { %v2845_v38 = vadd.f32 %v2842_v45, %v2841_v47 }
0x163a   : > { %v2834_v21 = vpop.xlane.xlu2 %2833 }
0x163b   : > { %v2836_v25 = vmul.f32 %v2834_v21, %v5734_v53  ;;  %2846 = vadd.xlane.f32.xlu2 %v2845_v38 }
0x163d   : > { %v2839_v8 = vsub.f32 %v2803_v15, %v2836_v25  ;;  %v2840_v17 = vsub.f32 %v2826_v5, %v2836_v25 }
0x163f   : > { %v2843_v41 = vmul.f32 %v2839_v8, %v2839_v8  ;;  %v2844_v33 = vmul.f32 %v2840_v17, %v2840_v17 }
0x1641   : > { %v2848_v63 = vadd.f32 %v2844_v33, %v2843_v41 }
0x1643   : > { %2849 = vadd.xlane.f32.xlu1 %v2848_v63 }
0x16ae   : > { %v2847_v57 = vpop.xlane.xlu2 %2846 }
0x16af   : > { %v2851_v19 = vmul.f32 %v2847_v57, %v5734_v53 }
0x16b1   : > { %v2853_v49 = vadd.f32 1e-05, %v2851_v19 }
0x16b3   : > { %5607 = vrsqrt.f32 %v2853_v49  ;;  %vm2861_vm0 = vweird.f32 %v2853_v49 }
0x16b6   : > { %v2850_v13 = vpop.xlane.xlu1 %2849 }
0x16b7   : > { %v2852_v35 = vmul.f32 %v2850_v13, %v5734_v53 }
0x16b9   : > { %v5608_v58 = vpop.eup %5607  ;;  %v2854_v23 = vadd.f32 1e-05, %v2852_v35 }
0x16ba   : > { %v2856_v36 = vmul.f32 %v5608_v58, %v2853_v49  ;;  %vm2862_vm2 = vweird.f32 %v5608_v58 }
0x16bb   : > { %5609 = vrsqrt.f32 %v2854_v23  ;;  %vm2863_vm4 = vmor %vm2861_vm0, %vm2862_vm2  ;;  %vm2871_vm5 = vweird.f32 %v2854_v23 }
0x16bc   : > { %v2857_v51 = vmul.f32 %v5608_v58, %v2856_v36 }
0x16be   : > { %v2858_v26 = vmul.f32 0.5, %v2857_v51 }
0x16c0   : > { %v2859_v9 = vsub.f32 1.5, %v2858_v26 }
0x16c1   : > { %v5610_v31 = vpop.eup %5609 }
0x16c2   : > { %v2866_v11 = vmul.f32 %v5610_v31, %v2854_v23  ;;  %v2860_v54 = vmul.f32 %v5608_v58, %v2859_v9  ;;  %vm2872_vm3 = vweird.f32 %v5610_v31 }
0x16c3   : > { %vm2873_vm1 = vmor %vm2871_vm5, %vm2872_vm3 }
0x16c4   : > { %v2867_v50 = vmul.f32 %v5610_v31, %v2866_v11  ;;  %v2864_v44 = vsel %vm2863_vm4, %v5608_v58, %v2860_v54 }
0x16c5   : > { %v2875_v2 = vmul.f32 %v2864_v44, %v2837_v40  ;;  %v2876_v24 = vmul.f32 %v2864_v44, %v2838_v6 }
0x16c6   : > { %v2868_v4 = vmul.f32 0.5, %v2867_v50 }
0x16c7   : > { %v7127_v15 = vmax.f32 %v2875_v2, 0.0  ;;  %v7129_v5 = vmax.f32 %v2876_v24, 0.0 }
0x16c8   : > { %v2869_v42 = vsub.f32 1.5, %v2868_v4 }
0x16ca   : > { %v2870_v3 = vmul.f32 %v5610_v31, %v2869_v42 }
0x16cc   : > { %v2874_v14 = vsel %vm2873_vm1, %v5610_v31, %v2870_v3 }
0x16cd   : > { %v2877_v46 = vmul.f32 %v2874_v14, %v2839_v8  ;;  %v2878_v7 = vmul.f32 %v2874_v14, %v2840_v17 }
0x16cf   : > { %v7121_v39 = vmax.f32 %v2877_v46, 0.0  ;;  %v7123_v20 = vmax.f32 %v2878_v7, 0.0 }
0x16d1   : > { %2906 = vmatpush.msra.mxu2 %v7121_v39  ;;  %2929 = vmatpush.msrb.mxu1 %v7123_v20 }
0x16d3   : > { %2907 = vmatpush.msra.mxu2 %v7127_v15  ;;  %2930 = vmatpush.msrb.mxu1 %v7129_v5 }
0x16d4   : > { %4229 = vmatmul.msk.f32.vlgmr.msra.gmra.mxu2 %vm921_vm15, %v4227_v34  ;;  %4231 = vmatmul.msk.f32.vlgmr.msrb.gmra.mxu1 %vm921_vm15, %v4227_v34 }
0x16dc   : > { %4230 = vmatmul.msk.f32.gmra.mxu2 %vm921_vm15, %v4228_v18  ;;  %4232 = vmatmul.msk.f32.gmra.mxu1 %vm921_vm15, %v4228_v18 }
0x1751   : > { %v2932_v52 = vpop.f32.mrf.mxu1 }
0x1757   : > { %v2909_v40 = vpop.f32.mrf.mxu2 }
0x1758   : > { %v2938_v6 = vadd.f32 %v2932_v52, %v2909_v40 }
0x1759   : > { %v2935_v47 = vpop.f32.mrf.mxu1 }
0x175a   : > { %2939 = vadd.xlane.f32.xlu1 %v2938_v6 }
0x175f   : > { %v2912_v45 = vpop.f32.mrf.mxu2 }
0x1760   : > { %v2941_v38 = vadd.f32 %v2935_v47, %v2912_v45 }
0x1762   : > { %2942 = vadd.xlane.f32.xlu0 %v2941_v38 }
0x17cd   : > { %v2940_v21 = vpop.xlane.xlu1 %2939 }
0x17ce   : > { %v2944_v25 = vmul.f32 %v2940_v21, %v5734_v53 }
0x17d0   : > { %v2946_v8 = vsub.f32 %v2909_v40, %v2944_v25  ;;  %v2947_v17 = vsub.f32 %v2932_v52, %v2944_v25 }
0x17d2   : > { %v2950_v41 = vmul.f32 %v2946_v8, %v2946_v8  ;;  %v2951_v33 = vmul.f32 %v2947_v17, %v2947_v17 }
0x17d4   : > { %v2954_v63 = vadd.f32 %v2951_v33, %v2950_v41 }
0x17d5   : > { %v2943_v57 = vpop.xlane.xlu0 %2942 }
0x17d6   : > { %v2945_v19 = vmul.f32 %v2943_v57, %v5734_v53  ;;  %2955 = vadd.xlane.f32.xlu0 %v2954_v63 }
0x17d8   : > { %v2948_v49 = vsub.f32 %v2912_v45, %v2945_v19  ;;  %v2949_v13 = vsub.f32 %v2935_v47, %v2945_v19 }
0x17da   : > { %v2952_v35 = vmul.f32 %v2948_v49, %v2948_v49  ;;  %v2953_v58 = vmul.f32 %v2949_v13, %v2949_v13 }
0x17dc   : > { %v2957_v23 = vadd.f32 %v2953_v58, %v2952_v35 }
0x17de   : > { %2958 = vadd.xlane.f32.xlu2 %v2957_v23 }
0x1849   : > { %v2956_v36 = vpop.xlane.xlu0 %2955 }
0x184a   : > { %v2960_v51 = vmul.f32 %v2956_v36, %v5734_v53 }
0x184c   : > { %v2962_v26 = vadd.f32 1e-05, %v2960_v51 }
0x184e   : > { %5611 = vrsqrt.f32 %v2962_v26  ;;  %vm2970_vm2 = vweird.f32 %v2962_v26 }
0x1851   : > { %v2959_v31 = vpop.xlane.xlu2 %2958 }
0x1852   : > { %v2961_v9 = vmul.f32 %v2959_v31, %v5734_v53 }
0x1854   : > { %v5612_v11 = vpop.eup %5611  ;;  %v2963_v50 = vadd.f32 1e-05, %v2961_v9 }
0x1855   : > { %v2965_v4 = vmul.f32 %v5612_v11, %v2962_v26  ;;  %vm2971_vm1 = vweird.f32 %v5612_v11 }
0x1856   : > { %5613 = vrsqrt.f32 %v2963_v50  ;;  %vm2972_vm0 = vmor %vm2970_vm2, %vm2971_vm1  ;;  %vm2980_vm4 = vweird.f32 %v2963_v50 }
0x1857   : > { %v2966_v54 = vmul.f32 %v5612_v11, %v2965_v4 }
0x1859   : > { %v2967_v42 = vmul.f32 0.5, %v2966_v54 }
0x185b   : > { %v2968_v3 = vsub.f32 1.5, %v2967_v42 }
0x185c   : > { %v5614_v44 = vpop.eup %5613 }
0x185d   : > { %v2969_v14 = vmul.f32 %v5612_v11, %v2968_v3  ;;  %v2975_v46 = vmul.f32 %v5614_v44, %v2963_v50  ;;  %vm2981_vm3 = vweird.f32 %v5614_v44 }
0x185e   : > { %vm2982_vm5 = vmor %vm2980_vm4, %vm2981_vm3  ;;  %vm7763_vm3 = vcmask 195584  }
0x185f   : > { %v2973_v7 = vsel %vm2972_vm0, %v5612_v11, %v2969_v14  ;;  %v2976_v2 = vmul.f32 %v5614_v44, %v2975_v46  ;;  %vm7764_vm4 = vmmov %vm7763_vm3 }
0x1860   : > { %v2984_v24 = vmul.f32 %v2973_v7, %v2946_v8  ;;  %v2985_v34 = vmul.f32 %v2973_v7, %v2947_v17 }
0x1861   : > { %v2977_v18 = vmul.f32 0.5, %v2976_v2 }
0x1862   : > { %v2988_v52 = vmax.f32 %v2984_v24, 0.0  ;;  %v2989_v40 = vmax.f32 %v2985_v34, 0.0 }
0x1863   : > { %v2978_v6 = vsub.f32 1.5, %v2977_v18 }
0x1864   : > { %v5155_v47 = vpack.i.bf16 %v2989_v40, %v2988_v52  ;;  %v3008_v45 = vmul.f32 %v5849_v43, %v2988_v52  ;;  %v3009_v38 = vmul.f32 %v2989_v40, %v5857_v48  ;;  %v3004_v21 = vmul.f32 %v5868_v55, %v2988_v52 }
0x1865   : > { %v2979_v25 = vmul.f32 %v5614_v44, %v2978_v6  ;;  %v3005_v41 = vmul.f32 %v2989_v40, %v5875_v59  ;;  %v7155_v19 = vmul.f32 %v2988_v52, %v5823_v27  ;;  %v7158_v35 = vmul.f32 %v5796_v16, %v2989_v40 }
0x1866   : > { %5156 = vrot.lane.b32.xlu2 %v5155_v47, %s5644_s12  ;;  %v5170_v8 = vpack.i.bf16 %v3009_v38, %v3008_v45  ;;  %v3000_v58 = vmul.f32 %v2988_v52, %v5807_v22  ;;  %v3001_v23 = vmul.f32 %v5793_v10, %v2989_v40  ;;  %v2996_v36 = vmul.f32 %v2988_v52, %v5837_v37 }
0x1867   : > { %v2983_v17 = vsel %vm2982_vm5, %v5614_v44, %v2979_v25  ;;  %v5175_v33 = vpack.i.bf16 %v3005_v41, %v3004_v21  ;;  %v2997_v51 = vmul.f32 %v5817_v29, %v2989_v40  ;;  %v3012_v4 = vmul.f32 %v5881_v61, %v2988_v52  ;;  %vm7765_vm5 = vmmov %vm7763_vm3 }
0x1868   : > { %v2986_v63 = vmul.f32 %v2983_v17, %v2948_v49  ;;  %v2987_v57 = vmul.f32 %v2983_v17, %v2949_v13  ;;  %5171 = vrot.lane.b32.xlu0 %v5170_v8, %s5645_s13  ;;  %v5355_v49 = vpack.i.bf16 %v7158_v35, %v7155_v19  ;;  %v5180_v31 = vpack.i.bf16 %v3001_v23, %v3000_v58 }
0x1869   : > { %5176 = vrot.lane.b32.xlu1 %v5175_v33, %s5646_s14  ;;  %v5185_v9 = vpack.i.bf16 %v2997_v51, %v2996_v36  ;;  %v3013_v54 = vmul.f32 %v2989_v40, %v5892_v0 }
0x186a   : > { %v2990_v13 = vmax.f32 %v2986_v63, 0.0  ;;  %v2991_v26 = vmax.f32 %v2987_v57, 0.0 }
0x186b   : > { %v5190_v3 = vpack.i.bf16 %v3013_v54, %v3012_v4 }
0x186c   : > { %v7169_v11 = vmul.f32 %v2990_v13, %v5823_v27  ;;  %v7172_v50 = vmul.f32 %v5796_v16, %v2991_v26  ;;  %v5195_v44 = vpack.i.bf16 %v2991_v26, %v2990_v13  ;;  %v3006_v14 = vmul.f32 %v5868_v55, %v2990_v13 }
0x186d   : > { %v3007_v46 = vmul.f32 %v2991_v26, %v5875_v59  ;;  %v3002_v7 = vmul.f32 %v2990_v13, %v5807_v22  ;;  %v3003_v2 = vmul.f32 %v5793_v10, %v2991_v26  ;;  %v2998_v18 = vmul.f32 %v2990_v13, %v5837_v37 }
0x186e   : > { %5161 = vrot.lane.b32.xlu2 %v5155_v47, %s5641_s9  ;;  %v5330_v42 = vpack.i.bf16 %v7172_v50, %v7169_v11  ;;  %v2999_v52 = vmul.f32 %v5817_v29, %v2991_v26  ;;  %v3014_v40 = vmul.f32 %v5881_v61, %v2990_v13  ;;  %v3015_v6 = vmul.f32 %v2991_v26, %v5892_v0 }
0x186f   : > { %v5215_v24 = vpack.i.bf16 %v3007_v46, %v3006_v14  ;;  %v5220_v34 = vpack.i.bf16 %v3003_v2, %v3002_v7  ;;  %v3010_v38 = vmul.f32 %v5849_v43, %v2990_v13  ;;  %v3011_v21 = vmul.f32 %v2991_v26, %v5857_v48 }
0x1870   : > { %5181 = vrot.lane.b32.xlu0 %v5180_v31, %s5639_s7  ;;  %v5230_v45 = vpack.i.bf16 %v3015_v6, %v3014_v40 }
0x1871   : > { %5186 = vrot.lane.b32.xlu1 %v5185_v9, %s5643_s11  ;;  %v5210_v25 = vpack.i.bf16 %v3011_v21, %v3010_v38 }
0x1876   : > { %5166 = vrot.lane.b32.xlu2 %v5155_v47, %s5635_s25  ;;  %v5225_v47 = vpack.i.bf16 %v2999_v52, %v2998_v18 }
0x1878   : > { %5191 = vrot.lane.b32.xlu0 %v5190_v3, %s5640_s8 }
0x1879   : > { %5196 = vrot.lane.b32.xlu1 %v5195_v44, %s5644_s12 }
0x187e   : > { %5216 = vrot.lane.b32.xlu2 %v5215_v24, %s5646_s14 }
0x1880   : > { %5201 = vrot.lane.b32.xlu0 %v5195_v44, %s5641_s9 }
0x1881   : > { %5221 = vrot.lane.b32.xlu1 %v5220_v34, %s5639_s7 }
0x1886   : > { %5226 = vrot.lane.b32.xlu2 %v5225_v47, %s5643_s11 }
0x1888   : > { %5206 = vrot.lane.b32.xlu0 %v5195_v44, %s5635_s25 }
0x1889   : > { %5231 = vrot.lane.b32.xlu1 %v5230_v45, %s5640_s8 }
0x1890   : > { %5211 = vrot.lane.b32.xlu0 %v5210_v25, %s5645_s13 }
0x18c0   : > { %v5157_v41 = vpop.permute.xlu2 %5156 }
0x18c1   : > { %v5159_v8 = vunpack.i.h.bf16 %v5157_v41  ;;  %v5158_v17 = vunpack.i.l.bf16 %v5157_v41 }
0x18c3   : > { %v3115_v33 = vsel %vm711_vm7, %v5159_v8, %v5945_v60  ;;  %v3114_v63 = vsel %vm711_vm7, %v5158_v17, %v5159_v8 }
0x18c4   : > { %v5235_v57 = vpack.i.bf16 %v3115_v33, %v3114_v63 }
0x18c6   : > { %5236 = vrot.lane.b32.xlu0 %v5235_v57, %s5636_s30 }
0x18c8   : > { %v5162_v58 = vpop.permute.xlu2 %5161 }
0x18c9   : > { %v5164_v23 = vunpack.i.h.bf16 %v5162_v58  ;;  %v5163_v36 = vunpack.i.l.bf16 %v5162_v58 }
0x18cb   : > { %v3072_v51 = vsel %vm510_vm14, %v5163_v36, %v5164_v23 }
0x18cc   : > { %v5240_v13 = vpack.i.bf16 %v5164_v23, %v3072_v51 }
0x18ce   : > { %5241 = vrot.lane.b32.xlu0 %v5240_v13, %s5636_s30 }
0x18d0   : > { %v7236_v13 = vpop.permute.xlu2 %5166 }
0x18da   : > { %v7205_v26 = vpop.permute.xlu0 %5171 }
0x18db   : > { %v5174_v31 = vunpack.i.h.bf16 %v7205_v26  ;;  %v5173_v9 = vunpack.i.l.bf16 %v7205_v26  ;;  %v7209_v4 = vpop.permute.xlu1 %5176 }
0x18dc   : > { %v5179_v14 = vunpack.i.h.bf16 %v7209_v4  ;;  %v5178_v46 = vunpack.i.l.bf16 %v7209_v4 }
0x18dd   : > { %v3103_v54 = vsel %vm696_vm10, %v5174_v31, %v5982_v62  ;;  %v3102_v3 = vsel %vm696_vm10, %v5173_v9, %v5174_v31 }
0x18de   : > { %v5245_v44 = vpack.i.bf16 %v3103_v54, %v3102_v3  ;;  %v3087_v2 = vsel %vm676_vm11, %v5179_v14, %v5994_v28  ;;  %v3086_v24 = vsel %vm676_vm11, %v5178_v46, %v5179_v14  ;;  %v5169_v14 = vunpack.i.h.bf16 %v7236_v13 }
0x18df   : > { %v5250_v18 = vpack.i.bf16 %v3087_v2, %v3086_v24 }
0x18e0   : > { %5246 = vrot.lane.b32.xlu0 %v5245_v44, %s5636_s30 }
0x18e2   : > { %v5182_v7 = vpop.permute.xlu0 %5181 }
0x18e3   : > { %v7224_v34 = vpop.permute.xlu1 %5186  ;;  %v5184_v52 = vunpack.i.h.bf16 %v5182_v7  ;;  %v5183_v40 = vunpack.i.l.bf16 %v5182_v7  ;;  %v5168_v7 = vunpack.i.l.bf16 %v7236_v13 }
0x18e4   : > { %v5189_v8 = vunpack.i.h.bf16 %v7224_v34  ;;  %v5188_v33 = vunpack.i.l.bf16 %v7224_v34 }
0x18e5   : > { %v3061_v47 = vsel %vm646_vm9, %v5183_v40, %v5184_v52 }
0x18e6   : > { %v5255_v25 = vpack.i.bf16 %v5184_v52, %v3061_v47  ;;  %v3045_v58 = vsel %vm626_vm8, %v5188_v33, %v5189_v8 }
0x18e7   : > { %v5310_v3 = vpack.i.bf16 %v5189_v8, %v3045_v58 }
0x18e8   : > { %5251 = vrot.lane.b32.xlu0 %v5250_v18, %s5636_s30 }
0x18ea   : > { %v7227_v6 = vpop.permute.xlu0 %5191 }
0x18eb   : > { %v5197_v45 = vpop.permute.xlu1 %5196  ;;  %v5194_v47 = vunpack.i.h.bf16 %v7227_v6 }
0x18ec   : > { %v5199_v38 = vunpack.i.h.bf16 %v5197_v45  ;;  %v5198_v21 = vunpack.i.l.bf16 %v5197_v45  ;;  %v5193_v45 = vunpack.i.l.bf16 %v7227_v6 }
0x18ee   : > { %v3116_v41 = vsel %vm711_vm7, %v5198_v21, %v5199_v38  ;;  %v3117_v2 = vsel %vm711_vm7, %v5199_v38, %v5945_v60 }
0x18ef   : > { %v5265_v63 = vpack.i.bf16 %v3116_v41, %v5198_v21  ;;  %v5270_v34 = vpack.i.bf16 %v5158_v17, %v3117_v2  ;;  %v3130_v41 = vsel %vm731_vm12, %v5193_v45, %v5194_v47  ;;  %v3060_v17 = vsel %vm646_vm9, %v5788_v1, %v5183_v40 }
0x18f0   : > { %5256 = vrot.lane.b32.xlu0 %v5255_v25, %s5636_s30 }
0x18f1   : > { %5266 = vrot.lane.b32.xlu2 %v5265_v63, %s5636_s30  ;;  %v5217_v63 = vpop.permute.xlu2 %5216 }
0x18f2   : > { %v5202_v57 = vpop.permute.xlu0 %5201  ;;  %v5219_v6 = vunpack.i.h.bf16 %v5217_v63  ;;  %v5218_v13 = vunpack.i.l.bf16 %v5217_v63 }
0x18f3   : > { %v5204_v23 = vunpack.i.h.bf16 %v5202_v57  ;;  %v5203_v51 = vunpack.i.l.bf16 %v5202_v57  ;;  %v5222_v52 = vpop.permute.xlu1 %5221 }
0x18f4   : > { %v5224_v21 = vunpack.i.h.bf16 %v5222_v52  ;;  %v3089_v2 = vsel %vm676_vm11, %v5219_v6, %v5994_v28 }
0x18f5   : > { %v5260_v31 = vpack.i.bf16 %v5163_v36, %v5204_v23  ;;  %v3073_v54 = vsel %vm510_vm14, %v5203_v51, %v5204_v23  ;;  %v3029_v36 = vsel %vm540_vm13, %v5168_v7, %v5169_v14  ;;  %v5335_v23 = vpack.i.bf16 %v3130_v41, %v5193_v45 }
0x18f6   : > { %v5275_v44 = vpack.i.bf16 %v3073_v54, %v5203_v51  ;;  %v5325_v18 = vpack.i.bf16 %v5169_v14, %v3029_v36  ;;  %v5280_v57 = vpack.i.bf16 %v3060_v17, %v5224_v21  ;;  %v3088_v54 = vsel %vm676_vm11, %v5218_v13, %v5219_v6 }
0x18f7   : > { %5261 = vrot.lane.b32.xlu1 %v5260_v31, %s5636_s30  ;;  %v3044_v45 = vsel %vm626_vm8, %v5929_v32, %v5188_v33  ;;  %v3028_v33 = vsel %vm540_vm13, %v5925_v30, %v5168_v7 }
0x18f8   : > { %5311 = vrot.lane.b32.xlu0 %v5310_v3, %s5636_s30  ;;  %v5295_v3 = vpack.i.bf16 %v3088_v54, %v5218_v13  ;;  %v3131_v13 = vsel %vm731_vm12, %v5194_v47, %v5784_v56 }
0x18f9   : > { %5276 = vrot.lane.b32.xlu2 %v5275_v44, %s5636_s30 }
0x18fa   : > { %v5207_v24 = vpop.permute.xlu0 %5206 }
0x18fb   : > { %v5209_v44 = vunpack.i.h.bf16 %v5207_v24  ;;  %v5208_v14 = vunpack.i.l.bf16 %v5207_v24  ;;  %v5227_v24 = vpop.permute.xlu2 %5226  ;;  %v5232_v17 = vpop.permute.xlu1 %5231 }
0x18fc   : > { %v5228_v4 = vunpack.i.l.bf16 %v5227_v24 }
0x18fd   : > { %v3030_v36 = vsel %vm540_vm13, %v5925_v30, %v5208_v14 }
0x18ff   : > { %5271 = vrot.lane.b32.xlu1 %v5270_v34, %s5636_s30  ;;  %v3031_v34 = vsel %vm540_vm13, %v5208_v14, %v5209_v44 }
0x1900   : > { %5326 = vrot.lane.b32.xlu0 %v5325_v18, %s5636_s30  ;;  %v5300_v18 = vpack.i.bf16 %v5178_v46, %v3089_v2  ;;  %v5315_v26 = vpack.i.bf16 %v3031_v34, %v3030_v36  ;;  %v3046_v46 = vsel %vm626_vm8, %v5929_v32, %v5228_v4 }
0x1902   : > { %v5212_v25 = vpop.permute.xlu0 %5211 }
0x1903   : > { %v5214_v8 = vunpack.i.h.bf16 %v5212_v25  ;;  %v5213_v38 = vunpack.i.l.bf16 %v5212_v25  ;;  %v5229_v25 = vunpack.i.h.bf16 %v5227_v24 }
0x1905   : > { %v3104_v58 = vsel %vm696_vm10, %v5213_v38, %v5214_v8  ;;  %v3105_v31 = vsel %vm696_vm10, %v5214_v8, %v5982_v62 }
0x1906   : > { %v5285_v51 = vpack.i.bf16 %v3104_v58, %v5213_v38  ;;  %v5290_v40 = vpack.i.bf16 %v5173_v9, %v3105_v31  ;;  %v5223_v9 = vunpack.i.l.bf16 %v5222_v52  ;;  %v5305_v38 = vpack.i.bf16 %v3044_v45, %v5229_v25 }
0x1907   : > { %5281 = vrot.lane.b32.xlu1 %v5280_v57, %s5636_s30  ;;  %v3047_v52 = vsel %vm626_vm8, %v5228_v4, %v5229_v25  ;;  %v5320_v57 = vpack.i.bf16 %v3028_v33, %v5209_v44 }
0x1908   : > { %5286 = vrot.lane.b32.xlu2 %v5285_v51, %s5636_s30  ;;  %5336 = vrot.lane.b32.xlu0 %v5335_v23, %s5636_s30  ;;  %v3062_v41 = vsel %vm646_vm9, %v5788_v1, %v5223_v9  ;;  %v3063_v8 = vsel %vm646_vm9, %v5223_v9, %v5224_v21  ;;  %v5345_v58 = vpack.i.bf16 %v3047_v52, %v3046_v46  ;;  %v5234_v23 = vunpack.i.h.bf16 %v5232_v17 }
0x1909   : > { %v5340_v63 = vpack.i.bf16 %v3063_v8, %v3062_v41  ;;  %v5233_v21 = vunpack.i.l.bf16 %v5232_v17 }
0x190a   : > { %v3133_v7 = vsel %vm731_vm12, %v5234_v23, %v5784_v56 }
0x190b   : > { %v3132_v51 = vsel %vm731_vm12, %v5233_v21, %v5234_v23  ;;  %v5360_v31 = vpack.i.bf16 %v3131_v13, %v3133_v7 }
0x190c   : > { %v5350_v6 = vpack.i.bf16 %v3132_v51, %v5233_v21 }
0x190f   : > { %5291 = vrot.lane.b32.xlu1 %v5290_v40, %s5636_s30 }
0x1910   : > { %5296 = vrot.lane.b32.xlu2 %v5295_v3, %s5636_s30 }
0x1917   : > { %5301 = vrot.lane.b32.xlu1 %v5300_v18, %s5636_s30 }
0x1918   : > { %5316 = vrot.lane.b32.xlu2 %v5315_v26, %s5636_s30 }
0x191f   : > { %5306 = vrot.lane.b32.xlu1 %v5305_v38, %s5636_s30 }
0x1920   : > { %5341 = vrot.lane.b32.xlu2 %v5340_v63, %s5636_s30 }
0x1927   : > { %5321 = vrot.lane.b32.xlu1 %v5320_v57, %s5636_s30 }
0x1928   : > { %5346 = vrot.lane.b32.xlu2 %v5345_v58, %s5636_s30 }
0x192f   : > { %5331 = vrot.lane.b32.xlu1 %v5330_v42, %s5636_s30 }
0x1930   : > { %5351 = vrot.lane.b32.xlu2 %v5350_v6, %s5636_s30 }
0x1937   : > { %5361 = vrot.lane.b32.xlu1 %v5360_v31, %s5636_s30 }
0x1938   : > { %5356 = vrot.lane.b32.xlu2 %v5355_v49, %s5636_s30  ;;  %v5237_v54 = vpop.permute.xlu0 %5236 }
0x1939   : > { %v5239_v35 = vunpack.i.h.bf16 %v5237_v54  ;;  %v5238_v49 = vunpack.i.l.bf16 %v5237_v54 }
0x193b   : > { %v3274_v4 = vsel %vm582_vm6, %v5238_v49, %v5239_v35 }
0x1940   : > { %v7303_v42 = vpop.permute.xlu0 %5241 }
0x194b   : > { %v5267_v40 = vpop.permute.xlu2 %5266 }
0x194c   : > { %v5269_v11 = vunpack.i.h.bf16 %v5267_v40  ;;  %v5268_v50 = vunpack.i.l.bf16 %v5267_v40 }
0x194e   : > { %v3275_v3 = vsel %vm582_vm6, %v5268_v50, %v5269_v11 }
0x194f   : > { %3320 = vmatpush.msrb.mxu3 %v3275_v3 }
0x1952   : > { %v5247_v44 = vpop.permute.xlu0 %5246 }
0x1953   : > { %v7306_v14 = vpop.permute.xlu2 %5276  ;;  %v5249_v17 = vunpack.i.h.bf16 %v5247_v44  ;;  %v5248_v57 = vunpack.i.l.bf16 %v5247_v44 }
0x1954   : > { %v5279_v50 = vunpack.i.h.bf16 %v7306_v14  ;;  %v5278_v3 = vunpack.i.l.bf16 %v7306_v14 }
0x1955   : > { %v3270_v40 = vsel %vm582_vm6, %v5248_v57, %v5249_v17 }
0x195a   : > { %v7308_v47 = vpop.permute.xlu0 %5251 }
0x1962   : > { %v5287_v2 = vpop.permute.xlu2 %5286  ;;  %v7312_v34 = vpop.permute.xlu0 %5256 }
0x1963   : > { %v5289_v26 = vunpack.i.h.bf16 %v5287_v2  ;;  %v5288_v9 = vunpack.i.l.bf16 %v5287_v2  ;;  %v5254_v2 = vunpack.i.h.bf16 %v7308_v47 }
0x1965   : > { %v3271_v63 = vsel %vm582_vm6, %v5288_v9, %v5289_v26 }
0x1969   : > { %v7310_v36 = vpop.permute.xlu1 %5261 }
0x196a   : > { %v5297_v19 = vpop.permute.xlu2 %5296  ;;  %v7316_v41 = vpop.permute.xlu0 %5311  ;;  %v5263_v14 = vunpack.i.l.bf16 %v7310_v36 }
0x196b   : > { %v5299_v23 = vunpack.i.h.bf16 %v5297_v19  ;;  %v5298_v21 = vunpack.i.l.bf16 %v5297_v19  ;;  %v5253_v19 = vunpack.i.l.bf16 %v7308_v47 }
0x196d   : > { %v3267_v54 = vsel %vm582_vm6, %v5298_v21, %v5299_v23  ;;  %v3266_v21 = vsel %vm582_vm6, %v5253_v19, %v5254_v2 }
0x1971   : > { %v5272_v18 = vpop.permute.xlu1 %5271 }
0x1972   : > { %v5274_v24 = vunpack.i.h.bf16 %v5272_v18  ;;  %v5273_v45 = vunpack.i.l.bf16 %v5272_v18  ;;  %v7314_v25 = vpop.permute.xlu2 %5316  ;;  %v7326_v33 = vpop.permute.xlu0 %5326 }
0x1974   : > { %v3273_v8 = vsel %vm582_vm6, %v5274_v24, %v5238_v49  ;;  %v3276_v38 = vsel %vm582_vm6, %v5269_v11, %v5273_v45 }
0x1975   : > { %3321 = vmatpush.msrb.mxu3 %v3273_v8  ;;  %3360 = vmatpush.msrb.mxu2 %v3276_v38  ;;  %v5264_v8 = vunpack.i.h.bf16 %v7310_v36  ;;  %v3263_v36 = vsel %vm582_vm6, %v5278_v3, %v5279_v50  ;;  %v5258_v3 = vunpack.i.l.bf16 %v7312_v34 }
0x1977   : > { %3322 = vmatpush.msrb.mxu3 %v3271_v63  ;;  %3361 = vmatpush.msrb.mxu2 %v3274_v4  ;;  %v5244_v63 = vunpack.i.h.bf16 %v7303_v42  ;;  %v5243_v4 = vunpack.i.l.bf16 %v7303_v42 }
0x1979   : > { %v7322_v46 = vpop.permute.xlu1 %5281 }
0x197a   : > { %v7324_v52 = vpop.permute.xlu2 %5341  ;;  %v7334_v11 = vpop.permute.xlu0 %5336 }
0x197b   : > { %v5338_v9 = vunpack.i.l.bf16 %v7334_v11 }
0x1981   : > { %v5292_v58 = vpop.permute.xlu1 %5291 }
0x1982   : > { %v5294_v51 = vunpack.i.h.bf16 %v5292_v58  ;;  %v5293_v6 = vunpack.i.l.bf16 %v5292_v58  ;;  %v7328_v7 = vpop.permute.xlu2 %5346  ;;  %v5343_v58 = vunpack.i.l.bf16 %v7324_v52 }
0x1983   : > { %v5348_v2 = vunpack.i.l.bf16 %v7328_v7 }
0x1984   : > { %v3269_v13 = vsel %vm582_vm6, %v5294_v51, %v5248_v57  ;;  %v3272_v31 = vsel %vm582_vm6, %v5289_v26, %v5293_v6  ;;  %v5339_v26 = vunpack.i.h.bf16 %v7334_v11  ;;  %v5344_v57 = vunpack.i.h.bf16 %v7324_v52 }
0x1985   : > { %3323 = vmatpush.msrb.mxu3 %v3269_v13  ;;  %3362 = vmatpush.msrb.mxu2 %v3272_v31  ;;  %v5284_v51 = vunpack.i.h.bf16 %v7322_v46  ;;  %v5283_v52 = vunpack.i.l.bf16 %v7322_v46  ;;  %v3261_v6 = vsel %vm582_vm6, %v5264_v8, %v5243_v4  ;;  %v3264_v13 = vsel %vm582_vm6, %v5279_v50, %v5263_v14 }
0x1986   : > { %v3277_v42 = vsel %vm582_vm6, %v5338_v9, %v5339_v26  ;;  %v5259_v31 = vunpack.i.h.bf16 %v7312_v34  ;;  %v3259_v46 = vsel %vm582_vm6, %v5343_v58, %v5344_v57  ;;  %v5314_v9 = vunpack.i.h.bf16 %v7316_v41 }
0x1987   : > { %3324 = vmatpush.msrb.mxu3 %v3267_v54  ;;  %3363 = vmatpush.msrb.mxu2 %v3270_v40  ;;  %v3262_v40 = vsel %vm582_vm6, %v5243_v4, %v5244_v63  ;;  %v5313_v34 = vunpack.i.l.bf16 %v7316_v41  ;;  %v5329_v63 = vunpack.i.h.bf16 %v7326_v33 }
0x1988   : > { %v3258_v14 = vsel %vm582_vm6, %v5258_v3, %v5259_v31 }
0x1989   : > { %v5302_v44 = vpop.permute.xlu1 %5301  ;;  %v3254_v41 = vsel %vm582_vm6, %v5313_v34, %v5314_v9 }
0x198a   : > { %v5304_v35 = vunpack.i.h.bf16 %v5302_v44  ;;  %v5303_v49 = vunpack.i.l.bf16 %v5302_v44  ;;  %v7340_v18 = vpop.permute.xlu2 %5351  ;;  %v5349_v44 = vunpack.i.h.bf16 %v7328_v7  ;;  %v5319_v7 = vunpack.i.h.bf16 %v7314_v25 }
0x198b   : > { %v5354_v24 = vunpack.i.h.bf16 %v7340_v18  ;;  %v5353_v45 = vunpack.i.l.bf16 %v7340_v18 }
0x198c   : > { %v3265_v38 = vsel %vm582_vm6, %v5304_v35, %v5253_v19  ;;  %v3268_v47 = vsel %vm582_vm6, %v5299_v23, %v5303_v49  ;;  %v7365_v23 = vld [vmem:[%s7743_s3 + $0x48] sm:$0xff]  ;;  %v3257_v35 = vsel %vm582_vm6, %v5284_v51, %v5258_v3  ;;  %v3260_v49 = vsel %vm582_vm6, %v5344_v57, %v5283_v52  ;;  %v4233_v3 = vld [vmem:[%s7743_s3 + $0x40] sm:$0xff] }
0x198d   : > { %3325 = vmatpush.msrb.mxu3 %v3265_v38  ;;  %3364 = vmatpush.msrb.mxu2 %v3268_v47  ;;  %v3279_v17 = vsel %vm582_vm6, %v5353_v45, %v5354_v24  ;;  %v5318_v45 = vunpack.i.l.bf16 %v7314_v25  ;;  %v3255_v8 = vsel %vm582_vm6, %v5348_v2, %v5349_v44 }
0x198e   : > { %3354 = vmatpush.msra.mxu0 %v3279_v17  ;;  %v5328_v17 = vunpack.i.l.bf16 %v7326_v33 }
0x198f   : > { %3326 = vmatpush.msrb.mxu3 %v3263_v36  ;;  %3365 = vmatpush.msrb.mxu2 %v3266_v21  ;;  %v3251_v58 = vsel %vm582_vm6, %v5318_v45, %v5319_v7 }
0x1990   : > { %3355 = vmatpush.msra.mxu0 %v3277_v42  ;;  %v3250_v42 = vsel %vm582_vm6, %v5328_v17, %v5329_v63 }
0x1991   : > { %3327 = vmatpush.msrb.mxu3 %v3261_v6  ;;  %3366 = vmatpush.msrb.mxu2 %v3264_v13  ;;  %v5307_v54 = vpop.permute.xlu1 %5306 }
0x1992   : > { %4235 = vmatmul.msk.f32.vlgmr.msra.gmra.mxu0 %vm921_vm15, %v7365_v23  ;;  %v5309_v50 = vunpack.i.h.bf16 %v5307_v54  ;;  %v5308_v19 = vunpack.i.l.bf16 %v5307_v54  ;;  %v5357_v51 = vpop.permute.xlu2 %5356 }
0x1993   : > { %3328 = vmatpush.msrb.mxu3 %v3259_v46  ;;  %3367 = vmatpush.msrb.mxu2 %v3262_v40  ;;  %v5359_v6 = vunpack.i.h.bf16 %v5357_v51  ;;  %v5358_v13 = vunpack.i.l.bf16 %v5357_v51 }
0x1994   : > { %v3253_v38 = vsel %vm582_vm6, %v5309_v50, %v5313_v34  ;;  %v3256_v47 = vsel %vm582_vm6, %v5349_v44, %v5308_v19 }
0x1995   : > { %3329 = vmatpush.msrb.mxu3 %v3257_v35  ;;  %3368 = vmatpush.msrb.mxu2 %v3260_v49  ;;  %v3245_v44 = vsel %vm582_vm6, %v6218_v12, %v5358_v13  ;;  %v3246_v2 = vsel %vm582_vm6, %v5358_v13, %v5359_v6 }
0x1997   : > { %3330 = vmatpush.msrb.mxu3 %v3255_v8  ;;  %3369 = vmatpush.msrb.mxu2 %v3258_v14 }
0x1999   : > { %v5322_v4 = vpop.permute.xlu1 %5321  ;;  %3331 = vmatpush.msrb.mxu3 %v3253_v38  ;;  %3370 = vmatpush.msrb.mxu2 %v3256_v47 }
0x199a   : > { %v5324_v25 = vunpack.i.h.bf16 %v5322_v4  ;;  %v5323_v57 = vunpack.i.l.bf16 %v5322_v4 }
0x199b   : > { %3332 = vmatpush.msrb.mxu3 %v3251_v58  ;;  %3371 = vmatpush.msrb.mxu2 %v3254_v41 }
0x199c   : > { %v3249_v36 = vsel %vm582_vm6, %v5324_v25, %v5328_v17  ;;  %v3252_v21 = vsel %vm582_vm6, %v5319_v7, %v5323_v57 }
0x199d   : > { %3333 = vmatpush.msrb.mxu3 %v3249_v36  ;;  %3372 = vmatpush.msrb.mxu2 %v3252_v21 }
0x199f   : > { %3373 = vmatpush.msrb.mxu2 %v3250_v42 }
0x19a1   : > { %v5332_v52 = vpop.permute.xlu1 %5331 }
0x19a2   : > { %v5334_v33 = vunpack.i.h.bf16 %v5332_v52  ;;  %v5333_v31 = vunpack.i.l.bf16 %v5332_v52 }
0x19a4   : > { %v3247_v54 = vsel %vm582_vm6, %v6218_v12, %v5333_v31  ;;  %v3248_v40 = vsel %vm582_vm6, %v5333_v31, %v5334_v33  ;;  %v4237_v31 = vld [vmem:[%s7742_s2 + $0xa8] sm:$0xff] }
0x19a5   : > { %3334 = vmatpush.msrb.mxu3 %v3247_v54  ;;  %3374 = vmatpush.msrb.mxu2 %v3248_v40  ;;  %v4238_v54 = vld [vmem:[%s7742_s2 + $0xb0] sm:$0xff] }
0x19a7   : > { %3335 = vmatpush.msrb.mxu3 %v3245_v44  ;;  %3375 = vmatpush.msrb.mxu2 %v3246_v2 }
0x19a8   : > { %3336 = vmatmul.f32.vlgmr.msrb.gmra.mxu3 %v4233_v3  ;;  %3376 = vmatmul.f32.vlgmr.msrb.gmra.mxu2 %v4233_v3 }
0x19a9   : > { %v5362_v46 = vpop.permute.xlu1 %5361 }
0x19aa   : > { %v5364_v50 = vunpack.i.h.bf16 %v5362_v46  ;;  %v5363_v19 = vunpack.i.l.bf16 %v5362_v46 }
0x19ac   : > { %v3280_v35 = vsel %vm582_vm6, %v5354_v24, %v5363_v19  ;;  %v3278_v49 = vsel %vm582_vm6, %v5339_v26, %v5364_v50 }
0x19ad   : > { %3394 = vmatpush.msrb.mxu0 %v3280_v35 }
0x19af   : > { %3395 = vmatpush.msrb.mxu0 %v3278_v49 }
0x19b0   : > { %4236 = vmatmul.msk.f32.vlgmr.msrb.gmra.mxu0 %vm921_vm15, %v7365_v23 }
0x1a0f   : > { %v3357_v9 = vpop.f32.mrf.mxu0 }
0x1a2b   : > { %v3337_v34 = vpop.f32.mrf.mxu3  ;;  %v3377_v7 = vpop.f32.mrf.mxu2 }
0x1a2c   : > { %v3358_v8 = vadd.f32 %v3357_v9, %v3337_v34 }
0x1a2d   : > { %v3397_v45 = vpop.f32.mrf.mxu0 }
0x1a2e   : > { %v3398_v14 = vadd.f32 %v3397_v45, %v3377_v7 }
0x1a30   : > { %v3400_v38 = vadd.f32 %v3398_v14, %v3358_v8 }
0x1a32   : > { %3401 = vadd.xlane.f32.xlu0 %v3400_v38 }
0x1aa5   : > { %v3402_v18 = vpop.xlane.xlu0 %3401 }
0x1aa6   : > { %v3403_v24 = vmul.f32 %v3402_v18, %v5734_v53 }
0x1aa8   : > { %v3404_v47 = vsub.f32 %v3358_v8, %v3403_v24  ;;  %v3405_v63 = vsub.f32 %v3398_v14, %v3403_v24 }
0x1aaa   : > { %v3406_v11 = vmul.f32 %v3404_v47, %v3404_v47  ;;  %v3407_v4 = vmul.f32 %v3405_v63, %v3405_v63 }
0x1aac   : > { %v3408_v26 = vadd.f32 %v3407_v4, %v3406_v11 }
0x1aae   : > { %3409 = vadd.xlane.f32.xlu2 %v3408_v26 }
0x1b21   : > { %v3410_v41 = vpop.xlane.xlu2 %3409 }
0x1b22   : > { %v3411_v23 = vmul.f32 %v3410_v41, %v5734_v53 }
0x1b24   : > { %v3412_v17 = vadd.f32 1e-05, %v3411_v23 }
0x1b26   : > { %5615 = vrsqrt.f32 %v3412_v17  ;;  %vm3419_vm2 = vweird.f32 %v3412_v17 }
0x1b2c   : > { %v5616_v25 = vpop.eup %5615 }
0x1b2d   : > { %v3414_v57 = vmul.f32 %v5616_v25, %v3412_v17  ;;  %vm3420_vm1 = vweird.f32 %v5616_v25 }
0x1b2e   : > { %vm3421_vm0 = vmor %vm3419_vm2, %vm3420_vm1 }
0x1b2f   : > { %v3415_v58 = vmul.f32 %v5616_v25, %v3414_v57  ;;  %vm7766_vm1 = vmmov %vm7763_vm3 }
0x1b31   : > { %v3416_v36 = vmul.f32 0.5, %v3415_v58 }
0x1b33   : > { %v3417_v21 = vsub.f32 1.5, %v3416_v36 }
0x1b35   : > { %v3418_v42 = vmul.f32 %v5616_v25, %v3417_v21 }
0x1b37   : > { %v3422_v51 = vsel %vm3421_vm0, %v5616_v25, %v3418_v42 }
0x1b38   : > { %v7415_v52 = vmul.f32 %v3422_v51, %v3404_v47  ;;  %v7417_v6 = vmul.f32 %v3422_v51, %v3405_v63 }
0x1b3a   : > { %v3425_v13 = vmax.f32 %v7415_v52, 0.0  ;;  %v3426_v33 = vmax.f32 %v7417_v6, 0.0  ;;  %v4248_v52 = vld [vmem:[%s7742_s2 + $0xc8] sm:$0xff] }
0x1b3c   : > { %3449 = vmatpush.msra.mxu1 %v3425_v13  ;;  %3472 = vmatpush.msra.mxu0 %v3426_v33 }
0x1b3e   : > { %3450 = vmatpush.msra.mxu1 %v7121_v39  ;;  %3473 = vmatpush.msra.mxu0 %v7123_v20 }
0x1b40   : > { %3451 = vmatpush.msra.mxu1 %v7127_v15  ;;  %3474 = vmatpush.msra.mxu0 %v7129_v5 }
0x1b41   : > { %4239 = vmatmul.msk.f32.vlgmr.msra.gmra.mxu1 %vm7763_vm3, %v4237_v31  ;;  %4241 = vmatmul.msk.f32.vlgmr.msra.gmra.mxu0 %vm7764_vm4, %v4237_v31 }
0x1b49   : > { %4240 = vmatmul.msk.f32.gmra.mxu1 %vm7765_vm5, %v4238_v54  ;;  %4242 = vmatmul.msk.f32.gmra.mxu0 %vm7766_vm1, %v4238_v54 }
0x1bbe   : > { %v3453_v40 = vpop.f32.mrf.mxu1  ;;  %v3476_v3 = vpop.f32.mrf.mxu0 }
0x1bbf   : > { %v3482_v44 = vadd.f32 %v3476_v3, %v3453_v40 }
0x1bc1   : > { %3483 = vadd.xlane.f32.xlu2 %v3482_v44 }
0x1bc6   : > { %v3456_v2 = vpop.f32.mrf.mxu1  ;;  %v3479_v46 = vpop.f32.mrf.mxu0 }
0x1bc7   : > { %v3485_v50 = vadd.f32 %v3479_v46, %v3456_v2 }
0x1bc9   : > { %3486 = vadd.xlane.f32.xlu1 %v3485_v50 }
0x1c34   : > { %v3484_v19 = vpop.xlane.xlu2 %3483 }
0x1c35   : > { %v3488_v35 = vmul.f32 %v3484_v19, %v5734_v53 }
0x1c37   : > { %v3490_v49 = vsub.f32 %v3453_v40, %v3488_v35  ;;  %v3491_v9 = vsub.f32 %v3476_v3, %v3488_v35 }
0x1c39   : > { %v3494_v34 = vmul.f32 %v3490_v49, %v3490_v49  ;;  %v3495_v7 = vmul.f32 %v3491_v9, %v3491_v9 }
0x1c3b   : > { %v3498_v45 = vadd.f32 %v3495_v7, %v3494_v34 }
0x1c3c   : > { %v3487_v8 = vpop.xlane.xlu1 %3486 }
0x1c3d   : > { %v3489_v14 = vmul.f32 %v3487_v8, %v5734_v53  ;;  %3499 = vadd.xlane.f32.xlu1 %v3498_v45 }
0x1c3f   : > { %v3492_v38 = vsub.f32 %v3456_v2, %v3489_v14  ;;  %v3493_v18 = vsub.f32 %v3479_v46, %v3489_v14 }
0x1c41   : > { %v3496_v24 = vmul.f32 %v3492_v38, %v3492_v38  ;;  %v3497_v47 = vmul.f32 %v3493_v18, %v3493_v18 }
0x1c43   : > { %v3501_v63 = vadd.f32 %v3497_v47, %v3496_v24 }
0x1c45   : > { %3502 = vadd.xlane.f32.xlu0 %v3501_v63 }
0x1cb0   : > { %v3500_v11 = vpop.xlane.xlu1 %3499 }
0x1cb1   : > { %v3504_v4 = vmul.f32 %v3500_v11, %v5734_v53 }
0x1cb3   : > { %v3506_v26 = vadd.f32 1e-05, %v3504_v4 }
0x1cb5   : > { %5617 = vrsqrt.f32 %v3506_v26  ;;  %vm3514_vm0 = vweird.f32 %v3506_v26 }
0x1cb8   : > { %v3503_v41 = vpop.xlane.xlu0 %3502 }
0x1cb9   : > { %v3505_v23 = vmul.f32 %v3503_v41, %v5734_v53 }
0x1cbb   : > { %v5618_v17 = vpop.eup %5617  ;;  %v3507_v25 = vadd.f32 1e-05, %v3505_v23 }
0x1cbc   : > { %v3509_v57 = vmul.f32 %v5618_v17, %v3506_v26  ;;  %vm3515_vm2 = vweird.f32 %v5618_v17 }
0x1cbd   : > { %5619 = vrsqrt.f32 %v3507_v25  ;;  %vm3516_vm3 = vmor %vm3514_vm0, %vm3515_vm2  ;;  %vm3524_vm5 = vweird.f32 %v3507_v25 }
0x1cbe   : > { %v3510_v58 = vmul.f32 %v5618_v17, %v3509_v57 }
0x1cc0   : > { %v3511_v36 = vmul.f32 0.5, %v3510_v58 }
0x1cc2   : > { %v3512_v21 = vsub.f32 1.5, %v3511_v36 }
0x1cc3   : > { %v5620_v42 = vpop.eup %5619 }
0x1cc4   : > { %v3513_v51 = vmul.f32 %v5618_v17, %v3512_v21  ;;  %v3519_v31 = vmul.f32 %v5620_v42, %v3507_v25  ;;  %vm3525_vm4 = vweird.f32 %v5620_v42 }
0x1cc5   : > { %vm3526_vm1 = vmor %vm3524_vm5, %vm3525_vm4 }
0x1cc6   : > { %v3517_v54 = vsel %vm3516_vm3, %v5618_v17, %v3513_v51  ;;  %v3520_v40 = vmul.f32 %v5620_v42, %v3519_v31 }
0x1cc7   : > { %v3528_v3 = vmul.f32 %v3517_v54, %v3490_v49  ;;  %v3529_v44 = vmul.f32 %v3517_v54, %v3491_v9 }
0x1cc8   : > { %v3521_v2 = vmul.f32 0.5, %v3520_v40 }
0x1cc9   : > { %v3532_v46 = vmax.f32 %v3528_v3, 0.0  ;;  %v3533_v50 = vmax.f32 %v3529_v44, 0.0 }
0x1cca   : > { %v3522_v19 = vsub.f32 1.5, %v3521_v2 }
0x1ccb   : > { %v5370_v35 = vpack.i.bf16 %v3533_v50, %v3532_v46  ;;  %v3548_v34 = vmul.f32 %v5868_v55, %v3532_v46  ;;  %v3549_v7 = vmul.f32 %v3533_v50, %v5875_v59  ;;  %v3556_v24 = vmul.f32 %v5881_v61, %v3532_v46 }
0x1ccc   : > { %v3523_v45 = vmul.f32 %v5620_v42, %v3522_v19  ;;  %v3557_v47 = vmul.f32 %v3533_v50, %v5892_v0  ;;  %v7451_v63 = vmul.f32 %v3532_v46, %v5823_v27  ;;  %v7454_v11 = vmul.f32 %v5796_v16, %v3533_v50 }
0x1ccd   : > { %5371 = vrot.lane.b32.xlu2 %v5370_v35, %s5641_s9  ;;  %5366 = vrot.lane.b32.xlu0 %v5370_v35, %s5644_s12  ;;  %v5385_v8 = vpack.i.bf16 %v3549_v7, %v3548_v34  ;;  %v3544_v4 = vmul.f32 %v3532_v46, %v5807_v22  ;;  %v3545_v26 = vmul.f32 %v5793_v10, %v3533_v50 }
0x1cce   : > { %v3527_v49 = vsel %vm3526_vm1, %v5620_v42, %v3523_v45  ;;  %v5390_v23 = vpack.i.bf16 %v3557_v47, %v3556_v24  ;;  %v3552_v25 = vmul.f32 %v5849_v43, %v3532_v46  ;;  %v3553_v57 = vmul.f32 %v3533_v50, %v5857_v48 }
0x1ccf   : > { %v3530_v9 = vmul.f32 %v3527_v49, %v3492_v38  ;;  %v3531_v14 = vmul.f32 %v3527_v49, %v3493_v18  ;;  %5386 = vrot.lane.b32.xlu1 %v5385_v8, %s5646_s14  ;;  %v5570_v38 = vpack.i.bf16 %v7454_v11, %v7451_v63  ;;  %v5395_v17 = vpack.i.bf16 %v3545_v26, %v3544_v4 }
0x1cd0   : > { %v3540_v58 = vmul.f32 %v3532_v46, %v5837_v37  ;;  %v3541_v36 = vmul.f32 %v5817_v29, %v3533_v50  ;;  %v5380_v31 = vpack.i.bf16 %v3553_v57, %v3552_v25 }
0x1cd1   : > { %v3534_v18 = vmax.f32 %v3530_v9, 0.0  ;;  %v3535_v41 = vmax.f32 %v3531_v14, 0.0 }
0x1cd2   : > { %v5400_v54 = vpack.i.bf16 %v3541_v36, %v3540_v58 }
0x1cd3   : > { %v7468_v21 = vmul.f32 %v3534_v18, %v5823_v27  ;;  %v7471_v42 = vmul.f32 %v5796_v16, %v3535_v41  ;;  %v5415_v40 = vpack.i.bf16 %v3535_v41, %v3534_v18  ;;  %v3554_v3 = vmul.f32 %v5849_v43, %v3534_v18 }
0x1cd4   : > { %v3555_v27 = vmul.f32 %v3535_v41, %v5857_v48  ;;  %v3546_v44 = vmul.f32 %v3534_v18, %v5807_v22  ;;  %v3547_v2 = vmul.f32 %v5793_v10, %v3535_v41  ;;  %v3550_v46 = vmul.f32 %v5868_v55, %v3534_v18 }
0x1cd5   : > { %5376 = vrot.lane.b32.xlu0 %v5370_v35, %s5635_s25  ;;  %5391 = vrot.lane.b32.xlu2 %v5390_v23, %s5640_s8  ;;  %v5565_v51 = vpack.i.bf16 %v7471_v42, %v7468_v21  ;;  %v3551_v50 = vmul.f32 %v3535_v41, %v5875_v59  ;;  %v3558_v19 = vmul.f32 %v5881_v61, %v3534_v18 }
0x1cd6   : > { %v5420_v16 = vpack.i.bf16 %v3555_v27, %v3554_v3  ;;  %v3559_v43 = vmul.f32 %v3535_v41, %v5892_v0  ;;  %v5435_v48 = vpack.i.bf16 %v3547_v2, %v3546_v44  ;;  %v3542_v22 = vmul.f32 %v3534_v18, %v5837_v37 }
0x1cd7   : > { %5396 = vrot.lane.b32.xlu1 %v5395_v17, %s5639_s7  ;;  %v5425_v35 = vpack.i.bf16 %v3551_v50, %v3550_v46  ;;  %v3543_v10 = vmul.f32 %v5817_v29, %v3535_v41 }
0x1cd8   : > { %v5430_v34 = vpack.i.bf16 %v3559_v43, %v3558_v19 }
0x1cd9   : > { %v5440_v55 = vpack.i.bf16 %v3543_v10, %v3542_v22 }
0x1cdd   : > { %5381 = vrot.lane.b32.xlu0 %v5380_v31, %s5645_s13  ;;  %5401 = vrot.lane.b32.xlu2 %v5400_v54, %s5643_s11 }
0x1cdf   : > { %5416 = vrot.lane.b32.xlu1 %v5415_v40, %s5635_s25 }
0x1ce5   : > { %5411 = vrot.lane.b32.xlu0 %v5415_v40, %s5641_s9  ;;  %5406 = vrot.lane.b32.xlu2 %v5415_v40, %s5644_s12 }
0x1ce7   : > { %5421 = vrot.lane.b32.xlu1 %v5420_v16, %s5645_s13 }
0x1ced   : > { %5436 = vrot.lane.b32.xlu0 %v5435_v48, %s5639_s7  ;;  %5426 = vrot.lane.b32.xlu2 %v5425_v35, %s5646_s14 }
0x1cef   : > { %5431 = vrot.lane.b32.xlu1 %v5430_v34, %s5640_s8 }
0x1cf5   : > { %5441 = vrot.lane.b32.xlu0 %v5440_v55, %s5643_s11 }
0x1d27   : > { %v5372_v59 = vpop.permute.xlu2 %5371 }
0x1d28   : > { %v5374_v14 = vunpack.i.h.bf16 %v5372_v59  ;;  %v5373_v24 = vunpack.i.l.bf16 %v5372_v59 }
0x1d2a   : > { %v3616_v4 = vsel %vm510_vm14, %v5373_v24, %v5374_v14 }
0x1d2b   : > { %v5450_v23 = vpack.i.bf16 %v5374_v14, %v3616_v4 }
0x1d2f   : > { %v7495_v61 = vpop.permute.xlu2 %5391 }
0x1d30   : > { %v5394_v18 = vunpack.i.h.bf16 %v7495_v61  ;;  %v5393_v41 = vunpack.i.l.bf16 %v7495_v61 }
0x1d32   : > { %v3674_v58 = vsel %vm731_vm12, %v5393_v41, %v5394_v18 }
0x1d37   : > { %v7508_v37 = vpop.permute.xlu2 %5401 }
0x1d38   : > { %v5404_v54 = vunpack.i.h.bf16 %v7508_v37  ;;  %v5403_v40 = vunpack.i.l.bf16 %v7508_v37 }
0x1d3a   : > { %v3589_v35 = vsel %vm626_vm8, %v5403_v40, %v5404_v54 }
0x1d3b   : > { %v5475_v59 = vpack.i.bf16 %v5404_v54, %v3589_v35 }
0x1d3f   : > { %v7497_v0 = vpop.permute.xlu0 %5366  ;;  %v5407_v57 = vpop.permute.xlu2 %5406 }
0x1d40   : > { %v5369_v7 = vunpack.i.h.bf16 %v7497_v0  ;;  %v5368_v45 = vunpack.i.l.bf16 %v7497_v0  ;;  %v5409_v44 = vunpack.i.h.bf16 %v5407_v57  ;;  %v5408_v2 = vunpack.i.l.bf16 %v5407_v57 }
0x1d41   : > { %v7501_v8 = vpop.permute.xlu1 %5386 }
0x1d42   : > { %v3659_v49 = vsel %vm711_vm7, %v5369_v7, %v5945_v60  ;;  %v3658_v29 = vsel %vm711_vm7, %v5368_v45, %v5369_v7  ;;  %v3660_v34 = vsel %vm711_vm7, %v5408_v2, %v5409_v44  ;;  %v5389_v22 = vunpack.i.h.bf16 %v7501_v8 }
0x1d43   : > { %v5445_v9 = vpack.i.bf16 %v3659_v49, %v3658_v29  ;;  %v5388_v10 = vunpack.i.l.bf16 %v7501_v8  ;;  %v5485_v7 = vpack.i.bf16 %v3660_v34, %v5408_v2  ;;  %v3588_v2 = vsel %vm626_vm8, %v5929_v32, %v5403_v40 }
0x1d44   : > { %v3631_v29 = vsel %vm676_vm11, %v5389_v22, %v5994_v28 }
0x1d45   : > { %5446 = vrot.lane.b32.xlu0 %v5445_v9, %s5636_s30  ;;  %v3630_v37 = vsel %vm676_vm11, %v5388_v10, %v5389_v22 }
0x1d46   : > { %v5460_v4 = vpack.i.bf16 %v3631_v29, %v3630_v37 }
0x1d47   : > { %v7511_v47 = vpop.permute.xlu0 %5376 }
0x1d48   : > { %v5378_v29 = vunpack.i.l.bf16 %v7511_v47 }
0x1d49   : > { %v5397_v26 = vpop.permute.xlu1 %5396 }
0x1d4a   : > { %v5399_v17 = vunpack.i.h.bf16 %v5397_v26  ;;  %v5398_v25 = vunpack.i.l.bf16 %v5397_v26 }
0x1d4c   : > { %v3605_v36 = vsel %vm646_vm9, %v5398_v25, %v5399_v17  ;;  %v3604_v31 = vsel %vm646_vm9, %v5788_v1, %v5398_v25 }
0x1d4d   : > { %5451 = vrot.lane.b32.xlu0 %v5450_v23, %s5636_s30  ;;  %v5470_v3 = vpack.i.bf16 %v5399_v17, %v3605_v36  ;;  %v5465_v27 = vpack.i.bf16 %v3604_v31, %v3674_v58  ;;  %v3661_v36 = vsel %vm711_vm7, %v5409_v44, %v5945_v60  ;;  %vm7767_vm7 = vcmask 261120  }
0x1d4e   : > { %v5490_v31 = vpack.i.bf16 %v5368_v45, %v3661_v36  ;;  %v3572_v36 = vsel %vm540_vm13, %v5925_v30, %v5378_v29 }
0x1d4f   : > { %v5382_v16 = vpop.permute.xlu0 %5381  ;;  %5471 = vrot.lane.b32.xlu1 %v5470_v3, %s5636_s30  ;;  %5466 = vrot.lane.b32.xlu2 %v5465_v27, %s5636_s30 }
0x1d50   : > { %v5384_v46 = vunpack.i.h.bf16 %v5382_v16  ;;  %v5383_v50 = vunpack.i.l.bf16 %v5382_v16 }
0x1d51   : > { %v7534_v55 = vpop.permute.xlu1 %5416 }
0x1d52   : > { %v3647_v19 = vsel %vm696_vm10, %v5384_v46, %v5982_v62  ;;  %v3646_v43 = vsel %vm696_vm10, %v5383_v50, %v5384_v46  ;;  %v5418_v40 = vunpack.i.l.bf16 %v7534_v55 }
0x1d53   : > { %v5455_v48 = vpack.i.bf16 %v3647_v19, %v3646_v43  ;;  %v5427_v43 = vpop.permute.xlu2 %5426 }
0x1d55   : > { %5456 = vrot.lane.b32.xlu0 %v5455_v48, %s5636_s30 }
0x1d57   : > { %v5412_v49 = vpop.permute.xlu0 %5411  ;;  %5486 = vrot.lane.b32.xlu2 %v5485_v7, %s5636_s30  ;;  %5476 = vrot.lane.b32.xlu1 %v5475_v59, %s5636_s30  ;;  %v5428_v59 = vunpack.i.l.bf16 %v5427_v43 }
0x1d58   : > { %v5414_v9 = vunpack.i.h.bf16 %v5412_v49  ;;  %v5413_v14 = vunpack.i.l.bf16 %v5412_v49  ;;  %v5379_v49 = vunpack.i.h.bf16 %v7511_v47 }
0x1d59   : > { %v5422_v17 = vpop.permute.xlu1 %5421 }
0x1d5a   : > { %v3617_v8 = vsel %vm510_vm14, %v5413_v14, %v5414_v9  ;;  %v5480_v26 = vpack.i.bf16 %v5373_v24, %v5414_v9  ;;  %v5424_v3 = vunpack.i.h.bf16 %v5422_v17  ;;  %v5423_v46 = vunpack.i.l.bf16 %v5422_v17 }
0x1d5b   : > { %v5495_v23 = vpack.i.bf16 %v3617_v8, %v5413_v14  ;;  %v3573_v14 = vsel %vm540_vm13, %v5378_v29, %v5379_v49 }
0x1d5c   : > { %v3649_v0 = vsel %vm696_vm10, %v5424_v3, %v5982_v62  ;;  %v3648_v35 = vsel %vm696_vm10, %v5423_v46, %v5424_v3  ;;  %v3574_v62 = vsel %vm540_vm13, %v5925_v30, %v5418_v40  ;;  %vm7770_vm10 = vmmov %vm7767_vm7 }
0x1d5d   : > { %5461 = vrot.lane.b32.xlu0 %v5460_v4, %s5636_s30  ;;  %v5515_v48 = vpack.i.bf16 %v5383_v50, %v3649_v0  ;;  %v5510_v22 = vpack.i.bf16 %v3648_v35, %v5423_v46 }
0x1d5f   : > { %v5437_v25 = vpop.permute.xlu0 %5436  ;;  %5496 = vrot.lane.b32.xlu2 %v5495_v23, %s5636_s30  ;;  %5481 = vrot.lane.b32.xlu1 %v5480_v26, %s5636_s30  ;;  %v5560_v26 = vpack.i.bf16 %v5379_v49, %v3573_v14 }
0x1d60   : > { %v5439_v57 = vunpack.i.h.bf16 %v5437_v25  ;;  %v5438_v4 = vunpack.i.l.bf16 %v5437_v25 }
0x1d61   : > { %v5432_v16 = vpop.permute.xlu1 %5431 }
0x1d62   : > { %v5500_v58 = vpack.i.bf16 %v5393_v41, %v5439_v57  ;;  %v5434_v45 = vunpack.i.h.bf16 %v5432_v16  ;;  %v5433_v23 = vunpack.i.l.bf16 %v5432_v16  ;;  %v3606_v47 = vsel %vm646_vm9, %v5788_v1, %v5438_v4 }
0x1d63   : > { %v3675_v1 = vsel %vm731_vm12, %v5394_v18, %v5784_v56 }
0x1d64   : > { %v3677_v34 = vsel %vm731_vm12, %v5434_v45, %v5784_v56  ;;  %v3676_v17 = vsel %vm731_vm12, %v5433_v23, %v5434_v45  ;;  %vm7772_vm12 = vmmov %vm7767_vm7 }
0x1d65   : > { %5501 = vrot.lane.b32.xlu0 %v5500_v58, %s5636_s30  ;;  %v5555_v7 = vpack.i.bf16 %v3574_v62, %v3677_v34  ;;  %v5530_v25 = vpack.i.bf16 %v3676_v17, %v5433_v23  ;;  %v5419_v58 = vunpack.i.h.bf16 %v7534_v55 }
0x1d67   : > { %v5442_v54 = vpop.permute.xlu0 %5441  ;;  %5491 = vrot.lane.b32.xlu1 %v5490_v31, %s5636_s30  ;;  %v3575_v31 = vsel %vm540_vm13, %v5418_v40, %v5419_v58 }
0x1d68   : > { %v5444_v24 = vunpack.i.h.bf16 %v5442_v54  ;;  %v5443_v27 = vunpack.i.l.bf16 %v5442_v54  ;;  %v5535_v54 = vpack.i.bf16 %v5419_v58, %v3575_v31 }
0x1d6a   : > { %v3590_v41 = vsel %vm626_vm8, %v5929_v32, %v5443_v27  ;;  %v3591_v60 = vsel %vm626_vm8, %v5443_v27, %v5444_v24  ;;  %v5505_v44 = vpack.i.bf16 %v3588_v2, %v5444_v24  ;;  %v5429_v32 = vunpack.i.h.bf16 %v5427_v43  ;;  %vm7768_vm8 = vmmov %vm7767_vm7 }
0x1d6b   : > { %v5550_v19 = vpack.i.bf16 %v3591_v60, %v3590_v41 }
0x1d6c   : > { %5506 = vrot.lane.b32.xlu2 %v5505_v44, %s5636_s30  ;;  %v3633_v50 = vsel %vm676_vm11, %v5429_v32, %v5994_v28  ;;  %v3632_v9 = vsel %vm676_vm11, %v5428_v59, %v5429_v32  ;;  %v3607_v28 = vsel %vm646_vm9, %v5438_v4, %v5439_v57  ;;  %v5545_v57 = vpack.i.bf16 %v3572_v36, %v3675_v1  ;;  %vm7769_vm9 = vmmov %vm7767_vm7 }
0x1d6d   : > { %5551 = vrot.lane.b32.xlu0 %v5550_v19, %s5636_s30  ;;  %v5525_v37 = vpack.i.bf16 %v5388_v10, %v3633_v50  ;;  %v5520_v8 = vpack.i.bf16 %v3632_v9, %v5428_v59  ;;  %v5540_v10 = vpack.i.bf16 %v3607_v28, %v3606_v47  ;;  %v7634_v50 = vld [vmem:[%s7743_s3 + $0x58] sm:$0xff]  ;;  %vm7771_vm11 = vmmov %vm7767_vm7 }
0x1d6f   : > { %5516 = vrot.lane.b32.xlu1 %v5515_v48, %s5636_s30 }
0x1d74   : > { %5511 = vrot.lane.b32.xlu2 %v5510_v22, %s5636_s30 }
0x1d75   : > { %5556 = vrot.lane.b32.xlu0 %v5555_v7, %s5636_s30 }
0x1d77   : > { %5526 = vrot.lane.b32.xlu1 %v5525_v37, %s5636_s30 }
0x1d7c   : > { %5521 = vrot.lane.b32.xlu2 %v5520_v8, %s5636_s30 }
0x1d7d   : > { %5561 = vrot.lane.b32.xlu0 %v5560_v26, %s5636_s30 }
0x1d7f   : > { %5541 = vrot.lane.b32.xlu1 %v5540_v10, %s5636_s30 }
0x1d84   : > { %5531 = vrot.lane.b32.xlu2 %v5530_v25, %s5636_s30 }
0x1d87   : > { %5546 = vrot.lane.b32.xlu1 %v5545_v57, %s5636_s30 }
0x1d8c   : > { %5536 = vrot.lane.b32.xlu2 %v5535_v54, %s5636_s30 }
0x1d8f   : > { %5571 = vrot.lane.b32.xlu1 %v5570_v38, %s5636_s30 }
0x1d94   : > { %5566 = vrot.lane.b32.xlu2 %v5565_v51, %s5636_s30 }
0x1da9   : > { %v7603_v30 = vpop.permute.xlu2 %5466 }
0x1daa   : > { %v5468_v49 = vunpack.i.l.bf16 %v7603_v30 }
0x1db1   : > { %v5487_v56 = vpop.permute.xlu2 %5486 }
0x1db2   : > { %v5489_v61 = vunpack.i.h.bf16 %v5487_v56  ;;  %v5488_v18 = vunpack.i.l.bf16 %v5487_v56 }
0x1db4   : > { %v3819_v55 = vsel %vm582_vm6, %v5488_v18, %v5489_v61 }
0x1db5   : > { %3864 = vmatpush.msrb.mxu1 %v3819_v55 }
0x1db7   : > { %v5447_v3 = vpop.permute.xlu0 %5446 }
0x1db8   : > { %v5449_v60 = vunpack.i.h.bf16 %v5447_v3  ;;  %v5448_v44 = vunpack.i.l.bf16 %v5447_v3 }
0x1db9   : > { %v7606_v24 = vpop.permute.xlu2 %5496 }
0x1dba   : > { %v3818_v7 = vsel %vm582_vm6, %v5448_v44, %v5449_v60  ;;  %v5499_v57 = vunpack.i.h.bf16 %v7606_v24  ;;  %v5498_v31 = vunpack.i.l.bf16 %v7606_v24 }
0x1dbf   : > { %v7608_v27 = vpop.permute.xlu0 %5451 }
0x1dc0   : > { %v5454_v60 = vunpack.i.h.bf16 %v7608_v27  ;;  %v5453_v24 = vunpack.i.l.bf16 %v7608_v27 }
0x1dc1   : > { %v7610_v63 = vpop.permute.xlu1 %5471 }
0x1dc2   : > { %v3806_v27 = vsel %vm582_vm6, %v5453_v24, %v5454_v60 }
0x1dc6   : > { %v7612_v11 = vpop.permute.xlu2 %5506 }
0x1dc7   : > { %v5457_v38 = vpop.permute.xlu0 %5456 }
0x1dc8   : > { %v5459_v37 = vunpack.i.h.bf16 %v5457_v38  ;;  %v5458_v9 = vunpack.i.l.bf16 %v5457_v38 }
0x1dc9   : > { %v7614_v21 = vpop.permute.xlu1 %5476 }
0x1dca   : > { %v3814_v36 = vsel %vm582_vm6, %v5458_v9, %v5459_v37  ;;  %v5478_v37 = vunpack.i.l.bf16 %v7614_v21 }
0x1dce   : > { %v5512_v42 = vpop.permute.xlu2 %5511 }
0x1dcf   : > { %v7616_v51 = vpop.permute.xlu0 %5461  ;;  %v5514_v19 = vunpack.i.h.bf16 %v5512_v42  ;;  %v5513_v0 = vunpack.i.l.bf16 %v5512_v42 }
0x1dd0   : > { %v5464_v56 = vunpack.i.h.bf16 %v7616_v51 }
0x1dd1   : > { %v7618_v16 = vpop.permute.xlu1 %5481  ;;  %v3815_v59 = vsel %vm582_vm6, %v5513_v0, %v5514_v19  ;;  %v5474_v0 = vunpack.i.h.bf16 %v7610_v63 }
0x1dd2   : > { %v5484_v3 = vunpack.i.h.bf16 %v7618_v16  ;;  %v5483_v38 = vunpack.i.l.bf16 %v7618_v16 }
0x1dd4   : > { %v3808_v16 = vsel %vm582_vm6, %v5499_v57, %v5483_v38 }
0x1dd6   : > { %v5522_v2 = vpop.permute.xlu2 %5521 }
0x1dd7   : > { %v7620_v41 = vpop.permute.xlu0 %5501  ;;  %v5524_v8 = vunpack.i.h.bf16 %v5522_v2  ;;  %v5523_v26 = vunpack.i.l.bf16 %v5522_v2 }
0x1dd8   : > { %v5504_v32 = vunpack.i.h.bf16 %v7620_v41 }
0x1dd9   : > { %v5492_v46 = vpop.permute.xlu1 %5491  ;;  %v3811_v58 = vsel %vm582_vm6, %v5523_v26, %v5524_v8 }
0x1dda   : > { %v5494_v45 = vunpack.i.h.bf16 %v5492_v46  ;;  %v5493_v43 = vunpack.i.l.bf16 %v5492_v46  ;;  %v3821_v4 = vsel %vm582_vm6, %v5504_v32, %v5468_v49  ;;  %v5469_v32 = vunpack.i.h.bf16 %v7603_v30 }
0x1ddc   : > { %v3817_v40 = vsel %vm582_vm6, %v5494_v45, %v5448_v44  ;;  %v3820_v48 = vsel %vm582_vm6, %v5489_v61, %v5493_v43  ;;  %v5463_v61 = vunpack.i.l.bf16 %v7616_v51  ;;  %v3807_v44 = vsel %vm582_vm6, %v5498_v31, %v5499_v57 }
0x1ddd   : > { %3865 = vmatpush.msrb.mxu1 %v3817_v40  ;;  %3904 = vmatpush.msrb.mxu0 %v3820_v48  ;;  %v5473_v43 = vunpack.i.l.bf16 %v7610_v63  ;;  %v5503_v40 = vunpack.i.l.bf16 %v7620_v41  ;;  %v5508_v63 = vunpack.i.l.bf16 %v7612_v11 }
0x1dde   : > { %v5532_v35 = vpop.permute.xlu2 %5531  ;;  %v3810_v51 = vsel %vm582_vm6, %v5463_v61, %v5464_v56 }
0x1ddf   : > { %v5534_v34 = vunpack.i.h.bf16 %v5532_v35  ;;  %v5533_v62 = vunpack.i.l.bf16 %v5532_v35  ;;  %v7625_v22 = vpop.permute.xlu0 %5551  ;;  %3866 = vmatpush.msrb.mxu1 %v3815_v59  ;;  %3905 = vmatpush.msrb.mxu0 %v3818_v7  ;;  %v3801_v41 = vsel %vm582_vm6, %v5469_v32, %v5473_v43 }
0x1de1   : > { %v3823_v29 = vsel %vm582_vm6, %v5533_v62, %v5534_v34  ;;  %v5517_v14 = vpop.permute.xlu1 %5516  ;;  %v5553_v62 = vunpack.i.l.bf16 %v7625_v22 }
0x1de2   : > { %3898 = vmatpush.msra.mxu3 %v3823_v29  ;;  %v5519_v23 = vunpack.i.h.bf16 %v5517_v14  ;;  %v5518_v47 = vunpack.i.l.bf16 %v5517_v14  ;;  %v5479_v29 = vunpack.i.h.bf16 %v7614_v21  ;;  %v5509_v14 = vunpack.i.h.bf16 %v7612_v11 }
0x1de4   : > { %3899 = vmatpush.msra.mxu3 %v3821_v4  ;;  %v3813_v28 = vsel %vm582_vm6, %v5519_v23, %v5458_v9  ;;  %v3816_v10 = vsel %vm582_vm6, %v5514_v19, %v5518_v47  ;;  %v3805_v19 = vsel %vm582_vm6, %v5484_v3, %v5453_v24  ;;  %v3802_v9 = vsel %vm582_vm6, %v5473_v43, %v5474_v0 }
0x1de5   : > { %4245 = vmatmul.msk.f32.vlgmr.msra.gmra.mxu3 %vm921_vm15, %v7634_v50  ;;  %3867 = vmatpush.msrb.mxu1 %v3813_v28 }
0x1de6   : > { %3906 = vmatpush.msrb.mxu0 %v3816_v10  ;;  %v5537_v46 = vpop.permute.xlu2 %5536  ;;  %v3797_v10 = vsel %vm582_vm6, %v5509_v14, %v5478_v37 }
0x1de7   : > { %v7643_v17 = vpop.permute.xlu0 %5556  ;;  %3868 = vmatpush.msrb.mxu1 %v3811_v58  ;;  %v5539_v4 = vunpack.i.h.bf16 %v5537_v46 }
0x1de8   : > { %v5558_v25 = vunpack.i.l.bf16 %v7643_v17  ;;  %3907 = vmatpush.msrb.mxu0 %v3814_v36  ;;  %v5559_v26 = vunpack.i.h.bf16 %v7643_v17 }
0x1de9   : > { %v5527_v54 = vpop.permute.xlu1 %5526 }
0x1dea   : > { %v3824_v1 = vsel %vm582_vm6, %v5534_v34, %v5558_v25  ;;  %v5529_v18 = vunpack.i.h.bf16 %v5527_v54  ;;  %v5528_v55 = vunpack.i.l.bf16 %v5527_v54  ;;  %v5554_v34 = vunpack.i.h.bf16 %v7625_v22 }
0x1deb   : > { %3938 = vmatpush.msrb.mxu3 %v3824_v1  ;;  %v5538_v22 = vunpack.i.l.bf16 %v5537_v46  ;;  %v3798_v25 = vsel %vm582_vm6, %v5478_v37, %v5479_v29 }
0x1dec   : > { %v3809_v42 = vsel %vm582_vm6, %v5529_v18, %v5463_v61  ;;  %v3812_v2 = vsel %vm582_vm6, %v5524_v8, %v5528_v55  ;;  %v3799_v23 = vsel %vm582_vm6, %v5553_v62, %v5554_v34  ;;  %v3800_v21 = vsel %vm582_vm6, %v5554_v34, %v5508_v63 }
0x1ded   : > { %3869 = vmatpush.msrb.mxu1 %v3809_v42  ;;  %3908 = vmatpush.msrb.mxu0 %v3812_v2  ;;  %v3796_v17 = vsel %vm582_vm6, %v5538_v22, %v5539_v4  ;;  %v3795_v54 = vsel %vm582_vm6, %v5559_v26, %v5538_v22  ;;  %v4243_v42 = vld [vmem:[%s7743_s3 + $0x50] sm:$0xff]  ;;  %v4256_v26 = vld [vmem:[%s7742_s2 + $0xd8] sm:$0xff] }
0x1dee   : > { %v5567_v47 = vpop.permute.xlu2 %5566 }
0x1def   : > { %3870 = vmatpush.msrb.mxu1 %v3807_v44  ;;  %3909 = vmatpush.msrb.mxu0 %v3810_v51  ;;  %v5562_v8 = vpop.permute.xlu0 %5561  ;;  %v5569_v57 = vunpack.i.h.bf16 %v5567_v47  ;;  %v5568_v31 = vunpack.i.l.bf16 %v5567_v47 }
0x1df0   : > { %v5564_v11 = vunpack.i.h.bf16 %v5562_v8  ;;  %v5563_v58 = vunpack.i.l.bf16 %v5562_v8  ;;  %v4247_v8 = vld [vmem:[%s7742_s2 + $0xc0] sm:$0xff] }
0x1df1   : > { %v5542_v45 = vpop.permute.xlu1 %5541  ;;  %3871 = vmatpush.msrb.mxu1 %v3805_v19  ;;  %3910 = vmatpush.msrb.mxu0 %v3808_v16  ;;  %v3791_v55 = vsel %vm582_vm6, %v6218_v12, %v5568_v31  ;;  %v3792_v3 = vsel %vm582_vm6, %v5568_v31, %v5569_v57 }
0x1df2   : > { %v5544_v48 = vunpack.i.h.bf16 %v5542_v45  ;;  %v5543_v35 = vunpack.i.l.bf16 %v5542_v45  ;;  %v3794_v18 = vsel %vm582_vm6, %v5563_v58, %v5564_v11 }
0x1df3   : > { %3911 = vmatpush.msrb.mxu0 %v3806_v27 }
0x1df4   : > { %v3803_v59 = vsel %vm582_vm6, %v5543_v35, %v5544_v48  ;;  %v3804_v7 = vsel %vm582_vm6, %v5544_v48, %v5503_v40 }
0x1df5   : > { %3872 = vmatpush.msrb.mxu1 %v3803_v59  ;;  %3912 = vmatpush.msrb.mxu0 %v3804_v7 }
0x1df7   : > { %3873 = vmatpush.msrb.mxu1 %v3801_v41  ;;  %3913 = vmatpush.msrb.mxu0 %v3802_v9 }
0x1df9   : > { %v5547_v28 = vpop.permute.xlu1 %5546  ;;  %3874 = vmatpush.msrb.mxu1 %v3799_v23  ;;  %3914 = vmatpush.msrb.mxu0 %v3800_v21 }
0x1dfa   : > { %v5549_v36 = vunpack.i.h.bf16 %v5547_v28  ;;  %v5548_v1 = vunpack.i.l.bf16 %v5547_v28 }
0x1dfb   : > { %3875 = vmatpush.msrb.mxu1 %v3797_v10  ;;  %3915 = vmatpush.msrb.mxu0 %v3798_v25 }
0x1dfc   : > { %v3822_v56 = vsel %vm582_vm6, %v5468_v49, %v5548_v1  ;;  %v3793_v61 = vsel %vm582_vm6, %v5549_v36, %v5563_v58 }
0x1dfd   : > { %3876 = vmatpush.msrb.mxu1 %v3795_v54  ;;  %3916 = vmatpush.msrb.mxu0 %v3796_v17 }
0x1dfe   : > { %3939 = vmatpush.msrb.mxu3 %v3822_v56 }
0x1dff   : > { %3877 = vmatpush.msrb.mxu1 %v3793_v61  ;;  %3917 = vmatpush.msrb.mxu0 %v3794_v18 }
0x1e00   : > { %4246 = vmatmul.msk.f32.vlgmr.msrb.gmra.mxu3 %vm921_vm15, %v7634_v50  ;;  %vm7773_vm15 = vcmask 195584  }
0x1e01   : > { %3878 = vmatpush.msrb.mxu1 %v3791_v55  ;;  %3918 = vmatpush.msrb.mxu0 %v3792_v3  ;;  %v5572_v30 = vpop.permute.xlu1 %5571  ;;  %vm7774_vm2 = vmmov %vm7773_vm15 }
0x1e02   : > { %v5574_v49 = vunpack.i.h.bf16 %v5572_v30  ;;  %v5573_v38 = vunpack.i.l.bf16 %v5572_v30 }
0x1e04   : > { %v3789_v2 = vsel %vm582_vm6, %v6218_v12, %v5573_v38  ;;  %v3790_v60 = vsel %vm582_vm6, %v5573_v38, %v5574_v49 }
0x1e05   : > { %3879 = vmatpush.msrb.mxu1 %v3789_v2  ;;  %3919 = vmatpush.msrb.mxu0 %v3790_v60 }
0x1e06   : > { %3880 = vmatmul.f32.vlgmr.msrb.gmra.mxu1 %v4243_v42  ;;  %3920 = vmatmul.f32.vlgmr.msrb.gmra.mxu0 %v4243_v42 }
0x1e68   : > { %v3901_v50 = vpop.f32.mrf.mxu3 }
0x1e83   : > { %v3881_v24 = vpop.f32.mrf.mxu1  ;;  %v3921_v44 = vpop.f32.mrf.mxu0 }
0x1e84   : > { %v3902_v51 = vadd.f32 %v3901_v50, %v3881_v24  ;;  %v3941_v46 = vpop.f32.mrf.mxu3 }
0x1e85   : > { %v3942_v19 = vadd.f32 %v3941_v46, %v3921_v44 }
0x1e87   : > { %v3944_v16 = vadd.f32 %v3942_v19, %v3902_v51 }
0x1e89   : > { %3945 = vadd.xlane.f32.xlu0 %v3944_v16 }
0x1efc   : > { %v3946_v0 = vpop.xlane.xlu0 %3945 }
0x1efd   : > { %v3947_v45 = vmul.f32 %v3946_v0, %v5734_v53 }
0x1eff   : > { %v3948_v27 = vsub.f32 %v3902_v51, %v3947_v45  ;;  %v3949_v43 = vsub.f32 %v3942_v19, %v3947_v45 }
0x1f01   : > { %v3950_v12 = vmul.f32 %v3948_v27, %v3948_v27  ;;  %v3951_v40 = vmul.f32 %v3949_v43, %v3949_v43 }
0x1f03   : > { %v3952_v48 = vadd.f32 %v3951_v40, %v3950_v12 }
0x1f05   : > { %3953 = vadd.xlane.f32.xlu2 %v3952_v48 }
0x1f78   : > { %v3954_v35 = vpop.xlane.xlu2 %3953 }
0x1f79   : > { %v3955_v32 = vmul.f32 %v3954_v35, %v5734_v53 }
0x1f7b   : > { %v3956_v34 = vadd.f32 1e-05, %v3955_v32 }
0x1f7d   : > { %5621 = vrsqrt.f32 %v3956_v34  ;;  %vm3963_vm14 = vweird.f32 %v3956_v34 }
0x1f83   : > { %v5622_v62 = vpop.eup %5621 }
0x1f84   : > { %v3958_v59 = vmul.f32 %v5622_v62, %v3956_v34  ;;  %vm3964_vm13 = vweird.f32 %v5622_v62 }
0x1f85   : > { %vm3965_vm6 = vmor %vm3963_vm14, %vm3964_vm13 }
0x1f86   : > { %v3959_v7 = vmul.f32 %v5622_v62, %v3958_v59 }
0x1f88   : > { %v3960_v29 = vmul.f32 0.5, %v3959_v7 }
0x1f8a   : > { %v3961_v37 = vsub.f32 1.5, %v3960_v29 }
0x1f8c   : > { %v3962_v63 = vmul.f32 %v5622_v62, %v3961_v37 }
0x1f8e   : > { %v3966_v41 = vsel %vm3965_vm6, %v5622_v62, %v3962_v63 }
0x1f8f   : > { %v3967_v9 = vmul.f32 %v3966_v41, %v3948_v27  ;;  %v3968_v14 = vmul.f32 %v3966_v41, %v3949_v43 }
0x1f91   : > { %v3969_v4 = vmax.f32 %v3967_v9, 0.0  ;;  %v3970_v22 = vmax.f32 %v3968_v14, 0.0 }
0x1f93   : > { %3996 = vmatpush.msra.mxu2 %v3969_v4  ;;  %4022 = vmatpush.msra.mxu3 %v3970_v22 }
0x1f95   : > { %3997 = vmatpush.msra.mxu2 %v3425_v13  ;;  %4023 = vmatpush.msra.mxu3 %v3426_v33 }
0x1f97   : > { %3998 = vmatpush.msra.mxu2 %v7121_v39  ;;  %4024 = vmatpush.msra.mxu3 %v7123_v20  ;;  %v4249_v39 = vld [vmem:[%s7742_s2 + $0xd0] sm:$0xff] }
0x1f99   : > { %3999 = vmatpush.msra.mxu2 %v7127_v15  ;;  %4025 = vmatpush.msra.mxu3 %v7129_v5 }
0x1f9a   : > { %4250 = vmatmul.msk.f32.vlgmr.msra.gmra.mxu2 %vm7767_vm7, %v4247_v8  ;;  %4253 = vmatmul.msk.f32.vlgmr.msra.gmra.mxu3 %vm7768_vm8, %v4247_v8 }
0x1fa2   : > { %4251 = vmatmul.msk.f32.gmra.mxu2 %vm7769_vm9, %v4248_v52  ;;  %4254 = vmatmul.msk.f32.gmra.mxu3 %vm7770_vm10, %v4248_v52 }
0x1faa   : > { %4252 = vmatmul.msk.f32.gmra.mxu2 %vm7771_vm11, %v4249_v39  ;;  %4255 = vmatmul.msk.f32.gmra.mxu3 %vm7772_vm12, %v4249_v39 }
0x201d   : > { %v4001_v20 = vpop.f32.mrf.mxu2  ;;  %v4027_v15 = vpop.f32.mrf.mxu3 }
0x2025   : > { %v4004_v5 = vpop.f32.mrf.mxu2  ;;  %v4030_v6 = vpop.f32.mrf.mxu3 }
0x202d   : > { %v4007_v13 = vpop.f32.mrf.mxu2  ;;  %v4033_v33 = vpop.f32.mrf.mxu3 }
0x202e   : > { %4054 = vmatpush.msra.mxu1 %v4007_v13  ;;  %4074 = vmatpush.msra.mxu0 %v4033_v33 }
0x2030   : > { %4055 = vmatpush.msra.mxu1 %v4004_v5  ;;  %4075 = vmatpush.msra.mxu0 %v4030_v6 }
0x2032   : > { %4056 = vmatpush.msra.mxu1 %v4001_v20  ;;  %4076 = vmatpush.msra.mxu0 %v4027_v15 }
0x2033   : > { %4257 = vmatmul.msk.f32.vlgmr.msra.gmra.mxu1 %vm7773_vm15, %v4256_v26  ;;  %4258 = vmatmul.msk.f32.vlgmr.msra.gmra.mxu0 %vm7774_vm2, %v4256_v26 }
0x20b0   : > { %v4058_v23 = vpop.f32.mrf.mxu1  ;;  %v4078_v21 = vpop.f32.mrf.mxu0 }
0x20b1   : > { %v4081_v47 = vadd.f32 %v4078_v21, %v4058_v23 }
0x20b3   : > { %4082 = vadd.xlane.f32.xlu1 %v4081_v47 }
0x2126   : > { %v4083_v28 = vpop.xlane.xlu1 %4082 }
0x2127   : > { %v4084_v10 = vmul.f32 %v4083_v28, %v5734_v53 }
0x2129   : > { %v4085_v25 = vsub.f32 %v4058_v23, %v4084_v10  ;;  %v4086_v11 = vsub.f32 %v4078_v21, %v4084_v10 }
0x212b   : > { %v4087_v58 = vmul.f32 %v4085_v25, %v4085_v25  ;;  %v4088_v36 = vmul.f32 %v4086_v11, %v4086_v11 }
0x212d   : > { %v4089_v1 = vadd.f32 %v4088_v36, %v4087_v58 }
0x212f   : > { %4090 = vadd.xlane.f32.xlu0 %v4089_v1 }
0x21a2   : > { %v4091_v17 = vpop.xlane.xlu0 %4090 }
0x21a3   : > { %v4092_v57 = vmul.f32 %v4091_v17, %v5734_v53 }
0x21a5   : > { %v4093_v31 = vadd.f32 1e-05, %v4092_v57 }
0x21a7   : > { %5623 = vrsqrt.f32 %v4093_v31  ;;  %vm4100_vm3 = vweird.f32 %v4093_v31 }
0x21ad   : > { %v5624_v54 = vpop.eup %5623 }
0x21ae   : > { %v4095_v56 = vmul.f32 %v5624_v54, %v4093_v31  ;;  %vm4101_vm0 = vweird.f32 %v5624_v54 }
0x21af   : > { %vm4102_vm4 = vmor %vm4100_vm3, %vm4101_vm0 }
0x21b0   : > { %v4096_v61 = vmul.f32 %v5624_v54, %v4095_v56 }
0x21b2   : > { %v4097_v18 = vmul.f32 0.5, %v4096_v61 }
0x21b4   : > { %v4098_v55 = vsub.f32 1.5, %v4097_v18 }
0x21b6   : > { %v4099_v3 = vmul.f32 %v5624_v54, %v4098_v55 }
0x21b8   : > { %v4103_v30 = vsel %vm4102_vm4, %v5624_v54, %v4099_v3 }
0x21b9   : > { %v4104_v49 = vmul.f32 %v4103_v30, %v4085_v25  ;;  %v4105_v38 = vmul.f32 %v4103_v30, %v4086_v11 }
0x21bb   : > { %v4106_v53 = vmax.f32 %v4104_v49, 0.0  ;;  %v4107_v42 = vmax.f32 %v4105_v38, 0.0 }
0x21bd   : > { %4108 = vst [vmem:[%s197_s27] sm:$0xff] %v4106_v53 }
0x21be   : > { %4109 = vst [vmem:[%s197_s27 + $0x8] sm:$0xff] %v4107_v42 }
0x21bf PF: > { %s14_s15 = sadd.s32 1, %s5631_s15  }
0x21c0   : > { %p11_p4 = scmp.ge.s32.totalorder %s14_s15, 4  }
0x21c2   :  { %13 = sbr.rel (!%p11_p4) target bundleno = 1 (0x1), region = 80 }

</bundles_post_ra>
